<compile_context>
chip_gen: v7x
topology: tpu7x:2x2x1
jax: 0.10.0
libtpu: 0.0.40
codegen_flags: <defaults>
</compile_context>

<pallas_src>
import functools

import jax
import jax.numpy as jnp
import numpy as np
from jax.experimental import pallas as pl
from jax.experimental.pallas import tpu as pltpu

EPS = 1e-5          # InstanceNorm2d eps (PyTorch default)
NEG_SLOPE = 0.2     # LeakyReLU slope
LANE = 128          # TPU lane width
MIB = 1024 * 1024


def _round_up(v, m):
    return ((v + m - 1) // m) * m


# ----------------------------- Pallas kernels ------------------------------

def _conv_gemm_kernel(a_ref, w_ref, b_ref, o_ref, *, apply_lrelu):
    """im2col GEMM tile: bf16 A/W on the MXU, f32 accumulate, +bias (+LeakyReLU)."""
    acc = jnp.dot(a_ref[...], w_ref[...], preferred_element_type=jnp.float32)
    acc = acc + b_ref[...]                                    # (1, Cp) broadcast
    if apply_lrelu:
        acc = jnp.where(acc >= 0.0, acc, NEG_SLOPE * acc)
    o_ref[...] = acc.astype(o_ref.dtype)


def _inorm_lrelu_kernel(y_ref, o_ref):
    """InstanceNorm2d (no affine, biased two-pass var) + LeakyReLU(0.2).

    Block = one sample x one 128-channel group, full spatial extent.
    Stats in f32; output stored as o_ref.dtype (bf16, GEMM-ready).
    """
    y = y_ref[...].astype(jnp.float32)                        # (1, P, 128)
    mean = jnp.mean(y, axis=1, keepdims=True)
    cen = y - mean
    var = jnp.mean(cen * cen, axis=1, keepdims=True)          # two-pass (biased)
    yn = cen * jax.lax.rsqrt(var + EPS)
    yn = jnp.where(yn >= 0.0, yn, NEG_SLOPE * yn)
    o_ref[...] = yn.astype(o_ref.dtype)


# ------------------------------ layer wrappers ------------------------------

def _conv_vmem_limit(TM, K, Cp, out_bytes):
    """Scoped-VMEM request sized from the actual (lane/sublane padded) tiles."""
    a_bytes = 2 * TM * _round_up(K, LANE) * 2        # double-buffered bf16 A tile
    w_bytes = 2 * _round_up(K, 16) * Cp * 2          # resident bf16 weights (x2: default buffering)
    b_bytes = 2 * 8 * Cp * 4                         # bias
    o_bytes = 2 * TM * Cp * out_bytes                # double-buffered output tile
    total = a_bytes + w_bytes + b_bytes + o_bytes + 4 * MIB   # compiler headroom
    return int(min(max(total, 16 * MIB), 48 * MIB))


def conv2d_pallas(x, w, b, stride, padding, apply_lrelu, out_dtype):
    """Conv2d(k=4) as a tiled im2col GEMM on channel-padded NHWC activations.

    x: (N, H, W, Cin_pad) NHWC (bf16 or f32; Cin_pad >= w's Cin, extra channels 0).
    w: (Cout, Cin, 4, 4) OIHW.  b: (Cout,).
    Returns (N, Ho, Wo, Cp) with Cp = round_up(Cout, 128); padded channels are 0.
    """
    N, H, W_, Cin_pad = x.shape
    Cout, Cin, k, _ = w.shape
    Ho = (H + 2 * padding - k) // stride + 1
    Wo = (W_ + 2 * padding - k) // stride + 1

    # bf16 BEFORE the im2col expansion (review: halves the pre-kernel traffic).
    xb = x.astype(jnp.bfloat16)
    xp = jnp.pad(xb, ((0, 0), (padding, padding), (padding, padding), (0, 0)))
    cols = []
    for kh in range(k):
        for kw in range(k):
            cols.append(xp[:, kh:kh + stride * Ho:stride,
                              kw:kw + stride * Wo:stride, :])
    A = jnp.concatenate(cols, axis=-1).reshape(N * Ho * Wo, k * k * Cin_pad)

    # Weights: pad Cin -> Cin_pad (zero rows for carried channel padding),
    # Cout -> Cp (lane-dense output stores).  Column order (kh, kw, cin) matches A.
    Cp = _round_up(Cout, LANE)
    wp = jnp.pad(w, ((0, 0), (0, Cin_pad - Cin), (0, 0), (0, 0)))
    Wm = jnp.transpose(wp, (2, 3, 1, 0)).reshape(k * k * Cin_pad, Cout)
    Wm = jnp.pad(Wm, ((0, 0), (0, Cp - Cout))).astype(jnp.bfloat16)
    bp = jnp.pad(b, (0, Cp - Cout)).astype(jnp.float32).reshape(1, Cp)

    M, K = A.shape
    out_bytes = jnp.dtype(out_dtype).itemsize

    # Pixel tile: multiple of 16 (bf16 sublane packing), capped at 512 rows
    # (fits v7x's 64 MiB VMEM).  If the whole layer would be one grid step,
    # split it so a 2-TensorCore chip can shard the "parallel" M axis.
    TM = min(512, _round_up(M, 16))
    if TM >= M and M > 32:
        TM = _round_up((M + 1) // 2, 16)
    Mp = _round_up(M, TM)
    A = jnp.pad(A, ((0, Mp - M), (0, 0)))

    cost = pl.CostEstimate(
        flops=2 * Mp * K * Cp,
        transcendentals=0,
        bytes_accessed=Mp * K * 2 + K * Cp * 2 + Cp * 4 + Mp * Cp * out_bytes)

    out = pl.pallas_call(
        functools.partial(_conv_gemm_kernel, apply_lrelu=apply_lrelu),
        out_shape=jax.ShapeDtypeStruct((Mp, Cp), out_dtype),
        grid=(Mp // TM,),
        in_specs=[
            pl.BlockSpec((TM, K), lambda i: (i, 0)),   # streamed pixel tiles
            pl.BlockSpec((K, Cp), lambda i: (0, 0)),   # weights VMEM-resident
            pl.BlockSpec((1, Cp), lambda i: (0, 0)),   # bias VMEM-resident
        ],
        out_specs=pl.BlockSpec((TM, Cp), lambda i: (i, 0)),
        compiler_params=pltpu.CompilerParams(
            dimension_semantics=("parallel",),
            vmem_limit_bytes=_conv_vmem_limit(TM, K, Cp, out_bytes)),
        cost_estimate=cost,
    )(A, Wm, bp)

    return out[:M].reshape(N, Ho, Wo, Cp)


def instance_norm_lrelu_pallas(x, out_dtype=jnp.bfloat16):
    """LeakyReLU(InstanceNorm2d(x), 0.2) on a channel-padded NHWC tensor.

    Tiled over (sample, 128-channel group); per-(n,c) stats make the split free.
    Emits bf16, still channel-padded, ready for the next conv's GEMM.
    """
    N, H, W_, C = x.shape
    assert C % LANE == 0, C
    P = H * W_
    y = x.reshape(N, P, C)

    in_bytes = jnp.dtype(x.dtype).itemsize
    out_bytes = jnp.dtype(out_dtype).itemsize
    p_pad = _round_up(P, 8)
    vmem = (2 * p_pad * LANE * in_bytes          # double-buffered input block
            + 2 * p_pad * LANE * out_bytes       # double-buffered output block
            + p_pad * LANE * 4                   # f32 temporaries
            + 4 * MIB)
    vmem = int(min(max(vmem, 16 * MIB), 48 * MIB))

    out = pl.pallas_call(
        _inorm_lrelu_kernel,
        out_shape=jax.ShapeDtypeStruct((N, P, C), out_dtype),
        grid=(N, C // LANE),
        in_specs=[pl.BlockSpec((1, P, LANE), lambda n, c: (n, 0, c))],
        out_specs=pl.BlockSpec((1, P, LANE), lambda n, c: (n, 0, c)),
        compiler_params=pltpu.CompilerParams(
            dimension_semantics=("parallel", "parallel"),
            vmem_limit_bytes=vmem),
    )(y)
    return out.reshape(N, H, W_, C)


# ------------------------------ forward pass --------------------------------

def nlayer_discriminator_forward(inp, patch, params):
    """inp, patch: NCHW f32.  Returns torch.cat((x, x_patch), dim=3) in NCHW."""

    def branch(z_nchw, names, strides, norms):
        # NCHW -> NHWC, bf16 once at the top; padding/layout is carried after that.
        z = jnp.transpose(z_nchw, (0, 2, 3, 1)).astype(jnp.bfloat16)
        n_layers = len(names)
        for i, name in enumerate(names):
            w, b = params[name]
            last = i == n_layers - 1
            # Fuse the LeakyReLU into the GEMM when no norm follows (first layer);
            # otherwise it is fused into the IN kernel.  Outputs feeding IN stay
            # f32 (stats precision); outputs feeding a GEMM directly are bf16;
            # the final (module-output) conv is f32.
            z = conv2d_pallas(
                z, w, b, stride=strides[i], padding=1,
                apply_lrelu=(not last and not norms[i]),
                out_dtype=(jnp.float32 if (last or norms[i]) else jnp.bfloat16))
            if norms[i]:
                z = instance_norm_lrelu_pallas(z, out_dtype=jnp.bfloat16)
        cout_last = params[names[-1]][0].shape[0]
        z = z[..., :cout_last]                     # drop channel padding once, at branch end
        return jnp.transpose(z, (0, 3, 1, 2))      # NHWC -> NCHW

    x = branch(inp,
               ["conv1", "conv2", "conv3", "conv4", "conv5"],
               strides=[2, 2, 2, 1, 1],
               norms=[False, True, True, True, False])
    xp = branch(patch,
                ["pconv1", "pconv2", "pconv3", "pconv4"],
                strides=[2, 2, 1, 1],
                norms=[False, True, True, False])

    # Final width-concat of the two tiny (N,1,h,w) maps is left to XLA.
    return jnp.concatenate([x, xp], axis=3)


# --------------------------- pure-JAX reference ------------------------------

def reference_forward(inp, patch, params):
    hp = jax.lax.Precision.HIGHEST

    def conv(z, w, b, s, p):
        y = jax.lax.conv_general_dilated(
            z, w, (s, s), [(p, p), (p, p)],
            dimension_numbers=("NCHW", "OIHW", "NCHW"), precision=hp)
        return y + b.reshape(1, -1, 1, 1)

    def inorm(z):
        m = jnp.mean(z, axis=(2, 3), keepdims=True)
        v = jnp.mean((z - m) ** 2, axis=(2, 3), keepdims=True)
        return (z - m) * jax.lax.rsqrt(v + EPS)

    def lrelu(z):
        return jnp.where(z >= 0.0, z, NEG_SLOPE * z)

    w1, b1 = params["conv1"]; w2, b2 = params["conv2"]; w3, b3 = params["conv3"]
    w4, b4 = params["conv4"]; w5, b5 = params["conv5"]
    pw1, pb1 = params["pconv1"]; pw2, pb2 = params["pconv2"]
    pw3, pb3 = params["pconv3"]; pw4, pb4 = params["pconv4"]

    x = lrelu(conv(inp, w1, b1, 2, 1))
    x = lrelu(inorm(conv(x, w2, b2, 2, 1)))
    x = lrelu(inorm(conv(x, w3, b3, 2, 1)))
    x = lrelu(inorm(conv(x, w4, b4, 1, 1)))
    x = conv(x, w5, b5, 1, 1)

    xp = lrelu(conv(patch, pw1, pb1, 2, 1))
    xp = lrelu(inorm(conv(xp, pw2, pb2, 2, 1)))
    xp = lrelu(inorm(conv(xp, pw3, pb3, 1, 1)))
    xp = conv(xp, pw4, pb4, 1, 1)

    return jnp.concatenate([x, xp], axis=3)


# ---------------------------------- main -------------------------------------

if __name__ == "__main__":
    N, input_nc, ndf = 2, 3, 8
    H = W = 32           # main input
    Hp = Wp = 16         # patch (half-size so the final heights match for cat(dim=3))

    key = jax.random.PRNGKey(0)
    keys = jax.random.split(key, 12)

    def init_conv(k, cout, cin):
        kw, kb = jax.random.split(k)
        fan_in = cin * 16
        w = jax.random.normal(kw, (cout, cin, 4, 4), jnp.float32) / np.sqrt(fan_in)
        b = 0.1 * jax.random.normal(kb, (cout,), jnp.float32)
        return (w, b)

    params = {
        "conv1":  init_conv(keys[0], ndf,        input_nc),
        "conv2":  init_conv(keys[1], ndf * 2,    ndf),
        "conv3":  init_conv(keys[2], ndf * 4,    ndf * 2),
        "conv4":  init_conv(keys[3], ndf * 8,    ndf * 4),
        "conv5":  init_conv(keys[4], 1,          ndf * 8),
        "pconv1": init_conv(keys[5], ndf,        input_nc),
        "pconv2": init_conv(keys[6], ndf * 2,    ndf),
        "pconv3": init_conv(keys[7], ndf * 4,    ndf * 2),
        "pconv4": init_conv(keys[8], 1,          ndf * 4),
    }

    inp = jax.random.normal(keys[9], (N, input_nc, H, W), jnp.float32)
    patch = jax.random.normal(keys[10], (N, input_nc, Hp, Wp), jnp.float32)

    out = jax.block_until_ready(
        jax.jit(nlayer_discriminator_forward)(inp, patch, params))
    ref = jax.block_until_ready(reference_forward(inp, patch, params))

    assert out.shape == ref.shape, (out.shape, ref.shape)
    max_diff = float(jnp.max(jnp.abs(out - ref)))
    # Mixed-precision kernel (bf16 GEMM operands / bf16 inter-layer activations,
    # f32 accumulation & stats) vs. an all-f32 reference: a few percent of
    # accumulated error is expected; real bugs show up as O(1) mismatches.
    assert bool(jnp.allclose(out, ref, rtol=2e-1, atol=2e-1)), (
        "mismatch vs reference, max abs diff = %e" % max_diff)

    print("KERNEL_OK")
</pallas_src>

<mosaic_0001>
module attributes {stable_mosaic.version = 11 : i64} {
  func.func @_conv_gemm_kernel(%arg0: i32, %arg1: memref<256x48xbf16, #tpu.memory_space<vmem>>, %arg2: memref<48x128xbf16, #tpu.memory_space<vmem>>, %arg3: memref<1x128xf32, #tpu.memory_space<vmem>>, %arg4: memref<256x128xbf16, #tpu.memory_space<vmem>>) attributes {dimension_semantics = [#tpu.dimension_semantics<parallel>], iteration_bounds = array<i64: 2>, scalar_prefetch = 0 : i64, scratch_operands = 0 : i64, tpu.core_type = #tpu.core_type<tc>, window_params = [{transform_indices = @transform_0, window_bounds = array<i64: 256, 48>}, {pipeline_mode = #tpu.pipeline_mode<synchronous>, transform_indices = @transform_1, window_bounds = array<i64: 48, 128>}, {pipeline_mode = #tpu.pipeline_mode<synchronous>, transform_indices = @transform_2, window_bounds = array<i64: 1, 128>}, {transform_indices = @transform_3, window_bounds = array<i64: 256, 128>}]} {
    %c0 = arith.constant 0 : index
    %c0_0 = arith.constant 0 : index
    %0 = vector.load %arg1[%c0, %c0_0] : memref<256x48xbf16, #tpu.memory_space<vmem>>, vector<256x48xbf16>
    %c0_1 = arith.constant 0 : index
    %c0_2 = arith.constant 0 : index
    %1 = vector.load %arg2[%c0_1, %c0_2] : memref<48x128xbf16, #tpu.memory_space<vmem>>, vector<48x128xbf16>
    %cst = arith.constant dense<0.000000e+00> : vector<256x128xf32>
    %2 = tpu.matmul %0, %1, %cst {dimension_numbers = #tpu.dot_dimension_numbers<[1], [0], [0], [1], [0, 0, 1, 1], [], []>} : vector<256x48xbf16>, vector<48x128xbf16>, vector<256x128xf32> -> vector<256x128xf32>
    %c0_3 = arith.constant 0 : index
    %c0_4 = arith.constant 0 : index
    %3 = vector.load %arg3[%c0_3, %c0_4] : memref<1x128xf32, #tpu.memory_space<vmem>>, vector<1x128xf32>
    %4 = vector.broadcast %3 : vector<1x128xf32> to vector<256x128xf32>
    %5 = arith.addf %2, %4 : vector<256x128xf32>
    %cst_5 = arith.constant 0.000000e+00 : f32
    %6 = vector.broadcast %cst_5 : f32 to vector<256x128xf32>
    %7 = arith.cmpf oge, %5, %6 : vector<256x128xf32>
    %cst_6 = arith.constant 2.000000e-01 : f32
    %8 = vector.broadcast %cst_6 : f32 to vector<256x128xf32>
    %9 = arith.mulf %8, %5 : vector<256x128xf32>
    %10 = arith.select %7, %5, %9 : vector<256x128xi1>, vector<256x128xf32>
    %11 = arith.truncf %10 : vector<256x128xf32> to vector<256x128xbf16>
    %c0_7 = arith.constant 0 : index
    %c0_8 = arith.constant 0 : index
    %12 = vector.load %arg4[%c0_7, %c0_8] : memref<256x128xbf16, #tpu.memory_space<vmem>>, vector<256x128xbf16>
    tpu.vector_store %arg4[%c0_7, %c0_8], %11 {strides = array<i32>} : memref<256x128xbf16, #tpu.memory_space<vmem>>, vector<256x128xbf16>,
    return
  }
  func.func @transform_0(%arg0: i32) -> (i32, i32) {
    %c0_i32 = arith.constant 0 : i32
    %c0_i32_0 = arith.constant 0 : i32
    return %arg0, %c0_i32 : i32, i32
  }
  func.func @transform_1(%arg0: i32) -> (i32, i32) {
    %c0_i32 = arith.constant 0 : i32
    %c0_i32_0 = arith.constant 0 : i32
    %c0_i32_1 = arith.constant 0 : i32
    return %c0_i32, %c0_i32_0 : i32, i32
  }
  func.func @transform_2(%arg0: i32) -> (i32, i32) {
    %c0_i32 = arith.constant 0 : i32
    %c0_i32_0 = arith.constant 0 : i32
    %c0_i32_1 = arith.constant 0 : i32
    return %c0_i32, %c0_i32_0 : i32, i32
  }
  func.func @transform_3(%arg0: i32) -> (i32, i32) {
    %c0_i32 = arith.constant 0 : i32
    %c0_i32_0 = arith.constant 0 : i32
    return %arg0, %c0_i32 : i32, i32
  }
}

module attributes {stable_mosaic.version = 11 : i64} {
  func.func @_inorm_lrelu_kernel(%arg0: i32, %arg1: i32, %arg2: memref<1x64x128xf32, #tpu.memory_space<vmem>>, %arg3: memref<1x64x128xbf16, #tpu.memory_space<vmem>>) attributes {dimension_semantics = [#tpu.dimension_semantics<parallel>, #tpu.dimension_semantics<parallel>], iteration_bounds = array<i64: 2, 1>, scalar_prefetch = 0 : i64, scratch_operands = 0 : i64, tpu.core_type = #tpu.core_type<tc>, window_params = [{transform_indices = @transform_0, window_bounds = array<i64: 1, 64, 128>}, {transform_indices = @transform_1, window_bounds = array<i64: 1, 64, 128>}]} {
    %c0 = arith.constant 0 : index
    %c0_0 = arith.constant 0 : index
    %c0_1 = arith.constant 0 : index
    %0 = vector.load %arg2[%c0, %c0_0, %c0_1] : memref<1x64x128xf32, #tpu.memory_space<vmem>>, vector<1x64x128xf32>
    %cst = arith.constant dense<0.000000e+00> : vector<1x128xf32>
    %1 = vector.multi_reduction <add>, %0, %cst [1] : vector<1x64x128xf32> to vector<1x128xf32>
    %2 = vector.shape_cast %1 : vector<1x128xf32> to vector<1x1x128xf32>
    %cst_2 = arith.constant 6.400000e+01 : f32
    %3 = vector.broadcast %cst_2 : f32 to vector<1x1x128xf32>
    %4 = arith.divf %2, %3 : vector<1x1x128xf32>
    %5 = vector.broadcast %4 : vector<1x1x128xf32> to vector<1x64x128xf32>
    %6 = arith.subf %0, %5 : vector<1x64x128xf32>
    %7 = arith.mulf %6, %6 : vector<1x64x128xf32>
    %cst_3 = arith.constant dense<0.000000e+00> : vector<1x128xf32>
    %8 = vector.multi_reduction <add>, %7, %cst_3 [1] : vector<1x64x128xf32> to vector<1x128xf32>
    %9 = vector.shape_cast %8 : vector<1x128xf32> to vector<1x1x128xf32>
    %cst_4 = arith.constant 6.400000e+01 : f32
    %10 = vector.broadcast %cst_4 : f32 to vector<1x1x128xf32>
    %11 = arith.divf %9, %10 : vector<1x1x128xf32>
    %cst_5 = arith.constant 9.99999974E-6 : f32
    %12 = vector.broadcast %cst_5 : f32 to vector<1x1x128xf32>
    %13 = arith.addf %11, %12 : vector<1x1x128xf32>
    %14 = math.rsqrt %13 : vector<1x1x128xf32>
    %15 = vector.broadcast %14 : vector<1x1x128xf32> to vector<1x64x128xf32>
    %16 = arith.mulf %6, %15 : vector<1x64x128xf32>
    %cst_6 = arith.constant 0.000000e+00 : f32
    %17 = vector.broadcast %cst_6 : f32 to vector<1x64x128xf32>
    %18 = arith.cmpf oge, %16, %17 : vector<1x64x128xf32>
    %cst_7 = arith.constant 2.000000e-01 : f32
    %19 = vector.broadcast %cst_7 : f32 to vector<1x64x128xf32>
    %20 = arith.mulf %19, %16 : vector<1x64x128xf32>
    %21 = arith.select %18, %16, %20 : vector<1x64x128xi1>, vector<1x64x128xf32>
    %22 = arith.truncf %21 : vector<1x64x128xf32> to vector<1x64x128xbf16>
    %c0_8 = arith.constant 0 : index
    %c0_9 = arith.constant 0 : index
    %c0_10 = arith.constant 0 : index
    %23 = vector.load %arg3[%c0_8, %c0_9, %c0_10] : memref<1x64x128xbf16, #tpu.memory_space<vmem>>, vector<1x64x128xbf16>
    tpu.vector_store %arg3[%c0_8, %c0_9, %c0_10], %22 {strides = array<i32>} : memref<1x64x128xbf16, #tpu.memory_space<vmem>>, vector<1x64x128xbf16>,
    return
  }
  func.func @transform_0(%arg0: i32, %arg1: i32) -> (i32, i32, i32) {
    %c0_i32 = arith.constant 0 : i32
    %c0_i32_0 = arith.constant 0 : i32
    return %arg0, %c0_i32, %arg1 : i32, i32, i32
  }
  func.func @transform_1(%arg0: i32, %arg1: i32) -> (i32, i32, i32) {
    %c0_i32 = arith.constant 0 : i32
    %c0_i32_0 = arith.constant 0 : i32
    return %arg0, %c0_i32, %arg1 : i32, i32, i32
  }
}

module attributes {stable_mosaic.version = 11 : i64} {
  func.func @_conv_gemm_kernel(%arg0: i32, %arg1: memref<64x2048xbf16, #tpu.memory_space<vmem>>, %arg2: memref<2048x128xbf16, #tpu.memory_space<vmem>>, %arg3: memref<1x128xf32, #tpu.memory_space<vmem>>, %arg4: memref<64x128xf32, #tpu.memory_space<vmem>>) attributes {dimension_semantics = [#tpu.dimension_semantics<parallel>], iteration_bounds = array<i64: 2>, scalar_prefetch = 0 : i64, scratch_operands = 0 : i64, tpu.core_type = #tpu.core_type<tc>, window_params = [{transform_indices = @transform_0, window_bounds = array<i64: 64, 2048>}, {pipeline_mode = #tpu.pipeline_mode<synchronous>, transform_indices = @transform_1, window_bounds = array<i64: 2048, 128>}, {pipeline_mode = #tpu.pipeline_mode<synchronous>, transform_indices = @transform_2, window_bounds = array<i64: 1, 128>}, {transform_indices = @transform_3, window_bounds = array<i64: 64, 128>}]} {
    %c0 = arith.constant 0 : index
    %c0_0 = arith.constant 0 : index
    %0 = vector.load %arg1[%c0, %c0_0] : memref<64x2048xbf16, #tpu.memory_space<vmem>>, vector<64x2048xbf16>
    %c0_1 = arith.constant 0 : index
    %c0_2 = arith.constant 0 : index
    %1 = vector.load %arg2[%c0_1, %c0_2] : memref<2048x128xbf16, #tpu.memory_space<vmem>>, vector<2048x128xbf16>
    %cst = arith.constant dense<0.000000e+00> : vector<64x128xf32>
    %2 = tpu.matmul %0, %1, %cst {dimension_numbers = #tpu.dot_dimension_numbers<[1], [0], [0], [1], [0, 0, 1, 1], [], []>} : vector<64x2048xbf16>, vector<2048x128xbf16>, vector<64x128xf32> -> vector<64x128xf32>
    %c0_3 = arith.constant 0 : index
    %c0_4 = arith.constant 0 : index
    %3 = vector.load %arg3[%c0_3, %c0_4] : memref<1x128xf32, #tpu.memory_space<vmem>>, vector<1x128xf32>
    %4 = vector.broadcast %3 : vector<1x128xf32> to vector<64x128xf32>
    %5 = arith.addf %2, %4 : vector<64x128xf32>
    %c0_5 = arith.constant 0 : index
    %c0_6 = arith.constant 0 : index
    %6 = vector.load %arg4[%c0_5, %c0_6] : memref<64x128xf32, #tpu.memory_space<vmem>>, vector<64x128xf32>
    tpu.vector_store %arg4[%c0_5, %c0_6], %5 {strides = array<i32>} : memref<64x128xf32, #tpu.memory_space<vmem>>, vector<64x128xf32>,
    return
  }
  func.func @transform_0(%arg0: i32) -> (i32, i32) {
    %c0_i32 = arith.constant 0 : i32
    %c0_i32_0 = arith.constant 0 : i32
    return %arg0, %c0_i32 : i32, i32
  }
  func.func @transform_1(%arg0: i32) -> (i32, i32) {
    %c0_i32 = arith.constant 0 : i32
    %c0_i32_0 = arith.constant 0 : i32
    %c0_i32_1 = arith.constant 0 : i32
    return %c0_i32, %c0_i32_0 : i32, i32
  }
  func.func @transform_2(%arg0: i32) -> (i32, i32) {
    %c0_i32 = arith.constant 0 : i32
    %c0_i32_0 = arith.constant 0 : i32
    %c0_i32_1 = arith.constant 0 : i32
    return %c0_i32, %c0_i32_0 : i32, i32
  }
  func.func @transform_3(%arg0: i32) -> (i32, i32) {
    %c0_i32 = arith.constant 0 : i32
    %c0_i32_0 = arith.constant 0 : i32
    return %arg0, %c0_i32 : i32, i32
  }
}

module attributes {stable_mosaic.version = 11 : i64} {
  func.func @_inorm_lrelu_kernel(%arg0: i32, %arg1: i32, %arg2: memref<1x16x128xf32, #tpu.memory_space<vmem>>, %arg3: memref<1x16x128xbf16, #tpu.memory_space<vmem>>) attributes {dimension_semantics = [#tpu.dimension_semantics<parallel>, #tpu.dimension_semantics<parallel>], iteration_bounds = array<i64: 2, 1>, scalar_prefetch = 0 : i64, scratch_operands = 0 : i64, tpu.core_type = #tpu.core_type<tc>, window_params = [{transform_indices = @transform_0, window_bounds = array<i64: 1, 16, 128>}, {transform_indices = @transform_1, window_bounds = array<i64: 1, 16, 128>}]} {
    %c0 = arith.constant 0 : index
    %c0_0 = arith.constant 0 : index
    %c0_1 = arith.constant 0 : index
    %0 = vector.load %arg2[%c0, %c0_0, %c0_1] : memref<1x16x128xf32, #tpu.memory_space<vmem>>, vector<1x16x128xf32>
    %cst = arith.constant dense<0.000000e+00> : vector<1x128xf32>
    %1 = vector.multi_reduction <add>, %0, %cst [1] : vector<1x16x128xf32> to vector<1x128xf32>
    %2 = vector.shape_cast %1 : vector<1x128xf32> to vector<1x1x128xf32>
    %cst_2 = arith.constant 1.600000e+01 : f32
    %3 = vector.broadcast %cst_2 : f32 to vector<1x1x128xf32>
    %4 = arith.divf %2, %3 : vector<1x1x128xf32>
    %5 = vector.broadcast %4 : vector<1x1x128xf32> to vector<1x16x128xf32>
    %6 = arith.subf %0, %5 : vector<1x16x128xf32>
    %7 = arith.mulf %6, %6 : vector<1x16x128xf32>
    %cst_3 = arith.constant dense<0.000000e+00> : vector<1x128xf32>
    %8 = vector.multi_reduction <add>, %7, %cst_3 [1] : vector<1x16x128xf32> to vector<1x128xf32>
    %9 = vector.shape_cast %8 : vector<1x128xf32> to vector<1x1x128xf32>
    %cst_4 = arith.constant 1.600000e+01 : f32
    %10 = vector.broadcast %cst_4 : f32 to vector<1x1x128xf32>
    %11 = arith.divf %9, %10 : vector<1x1x128xf32>
    %cst_5 = arith.constant 9.99999974E-6 : f32
    %12 = vector.broadcast %cst_5 : f32 to vector<1x1x128xf32>
    %13 = arith.addf %11, %12 : vector<1x1x128xf32>
    %14 = math.rsqrt %13 : vector<1x1x128xf32>
    %15 = vector.broadcast %14 : vector<1x1x128xf32> to vector<1x16x128xf32>
    %16 = arith.mulf %6, %15 : vector<1x16x128xf32>
    %cst_6 = arith.constant 0.000000e+00 : f32
    %17 = vector.broadcast %cst_6 : f32 to vector<1x16x128xf32>
    %18 = arith.cmpf oge, %16, %17 : vector<1x16x128xf32>
    %cst_7 = arith.constant 2.000000e-01 : f32
    %19 = vector.broadcast %cst_7 : f32 to vector<1x16x128xf32>
    %20 = arith.mulf %19, %16 : vector<1x16x128xf32>
    %21 = arith.select %18, %16, %20 : vector<1x16x128xi1>, vector<1x16x128xf32>
    %22 = arith.truncf %21 : vector<1x16x128xf32> to vector<1x16x128xbf16>
    %c0_8 = arith.constant 0 : index
    %c0_9 = arith.constant 0 : index
    %c0_10 = arith.constant 0 : index
    %23 = vector.load %arg3[%c0_8, %c0_9, %c0_10] : memref<1x16x128xbf16, #tpu.memory_space<vmem>>, vector<1x16x128xbf16>
    tpu.vector_store %arg3[%c0_8, %c0_9, %c0_10], %22 {strides = array<i32>} : memref<1x16x128xbf16, #tpu.memory_space<vmem>>, vector<1x16x128xbf16>,
    return
  }
  func.func @transform_0(%arg0: i32, %arg1: i32) -> (i32, i32, i32) {
    %c0_i32 = arith.constant 0 : i32
    %c0_i32_0 = arith.constant 0 : i32
    return %arg0, %c0_i32, %arg1 : i32, i32, i32
  }
  func.func @transform_1(%arg0: i32, %arg1: i32) -> (i32, i32, i32) {
    %c0_i32 = arith.constant 0 : i32
    %c0_i32_0 = arith.constant 0 : i32
    return %arg0, %c0_i32, %arg1 : i32, i32, i32
  }
}

module attributes {stable_mosaic.version = 11 : i64} {
  func.func @_conv_gemm_kernel(%arg0: i32, %arg1: memref<32x2048xbf16, #tpu.memory_space<vmem>>, %arg2: memref<2048x128xbf16, #tpu.memory_space<vmem>>, %arg3: memref<1x128xf32, #tpu.memory_space<vmem>>, %arg4: memref<32x128xf32, #tpu.memory_space<vmem>>) attributes {dimension_semantics = [#tpu.dimension_semantics<parallel>], iteration_bounds = array<i64: 1>, scalar_prefetch = 0 : i64, scratch_operands = 0 : i64, tpu.core_type = #tpu.core_type<tc>, window_params = [{transform_indices = @transform_0, window_bounds = array<i64: 32, 2048>}, {pipeline_mode = #tpu.pipeline_mode<synchronous>, transform_indices = @transform_1, window_bounds = array<i64: 2048, 128>}, {pipeline_mode = #tpu.pipeline_mode<synchronous>, transform_indices = @transform_2, window_bounds = array<i64: 1, 128>}, {transform_indices = @transform_3, window_bounds = array<i64: 32, 128>}]} {
    %c0 = arith.constant 0 : index
    %c0_0 = arith.constant 0 : index
    %0 = vector.load %arg1[%c0, %c0_0] : memref<32x2048xbf16, #tpu.memory_space<vmem>>, vector<32x2048xbf16>
    %c0_1 = arith.constant 0 : index
    %c0_2 = arith.constant 0 : index
    %1 = vector.load %arg2[%c0_1, %c0_2] : memref<2048x128xbf16, #tpu.memory_space<vmem>>, vector<2048x128xbf16>
    %cst = arith.constant dense<0.000000e+00> : vector<32x128xf32>
    %2 = tpu.matmul %0, %1, %cst {dimension_numbers = #tpu.dot_dimension_numbers<[1], [0], [0], [1], [0, 0, 1, 1], [], []>} : vector<32x2048xbf16>, vector<2048x128xbf16>, vector<32x128xf32> -> vector<32x128xf32>
    %c0_3 = arith.constant 0 : index
    %c0_4 = arith.constant 0 : index
    %3 = vector.load %arg3[%c0_3, %c0_4] : memref<1x128xf32, #tpu.memory_space<vmem>>, vector<1x128xf32>
    %4 = vector.broadcast %3 : vector<1x128xf32> to vector<32x128xf32>
    %5 = arith.addf %2, %4 : vector<32x128xf32>
    %c0_5 = arith.constant 0 : index
    %c0_6 = arith.constant 0 : index
    %6 = vector.load %arg4[%c0_5, %c0_6] : memref<32x128xf32, #tpu.memory_space<vmem>>, vector<32x128xf32>
    tpu.vector_store %arg4[%c0_5, %c0_6], %5 {strides = array<i32>} : memref<32x128xf32, #tpu.memory_space<vmem>>, vector<32x128xf32>,
    return
  }
  func.func @transform_0(%arg0: i32) -> (i32, i32) {
    %c0_i32 = arith.constant 0 : i32
    %c0_i32_0 = arith.constant 0 : i32
    return %arg0, %c0_i32 : i32, i32
  }
  func.func @transform_1(%arg0: i32) -> (i32, i32) {
    %c0_i32 = arith.constant 0 : i32
    %c0_i32_0 = arith.constant 0 : i32
    %c0_i32_1 = arith.constant 0 : i32
    return %c0_i32, %c0_i32_0 : i32, i32
  }
  func.func @transform_2(%arg0: i32) -> (i32, i32) {
    %c0_i32 = arith.constant 0 : i32
    %c0_i32_0 = arith.constant 0 : i32
    %c0_i32_1 = arith.constant 0 : i32
    return %c0_i32, %c0_i32_0 : i32, i32
  }
  func.func @transform_3(%arg0: i32) -> (i32, i32) {
    %c0_i32 = arith.constant 0 : i32
    %c0_i32_0 = arith.constant 0 : i32
    return %arg0, %c0_i32 : i32, i32
  }
}

module attributes {stable_mosaic.version = 11 : i64} {
  func.func @_inorm_lrelu_kernel(%arg0: i32, %arg1: i32, %arg2: memref<1x9x128xf32, #tpu.memory_space<vmem>>, %arg3: memref<1x9x128xbf16, #tpu.memory_space<vmem>>) attributes {dimension_semantics = [#tpu.dimension_semantics<parallel>, #tpu.dimension_semantics<parallel>], iteration_bounds = array<i64: 2, 1>, scalar_prefetch = 0 : i64, scratch_operands = 0 : i64, tpu.core_type = #tpu.core_type<tc>, window_params = [{transform_indices = @transform_0, window_bounds = array<i64: 1, 9, 128>}, {transform_indices = @transform_1, window_bounds = array<i64: 1, 9, 128>}]} {
    %c0 = arith.constant 0 : index
    %c0_0 = arith.constant 0 : index
    %c0_1 = arith.constant 0 : index
    %0 = vector.load %arg2[%c0, %c0_0, %c0_1] : memref<1x9x128xf32, #tpu.memory_space<vmem>>, vector<1x9x128xf32>
    %cst = arith.constant dense<0.000000e+00> : vector<1x128xf32>
    %1 = vector.multi_reduction <add>, %0, %cst [1] : vector<1x9x128xf32> to vector<1x128xf32>
    %2 = vector.shape_cast %1 : vector<1x128xf32> to vector<1x1x128xf32>
    %cst_2 = arith.constant 9.000000e+00 : f32
    %3 = vector.broadcast %cst_2 : f32 to vector<1x1x128xf32>
    %4 = arith.divf %2, %3 : vector<1x1x128xf32>
    %5 = vector.broadcast %4 : vector<1x1x128xf32> to vector<1x9x128xf32>
    %6 = arith.subf %0, %5 : vector<1x9x128xf32>
    %7 = arith.mulf %6, %6 : vector<1x9x128xf32>
    %cst_3 = arith.constant dense<0.000000e+00> : vector<1x128xf32>
    %8 = vector.multi_reduction <add>, %7, %cst_3 [1] : vector<1x9x128xf32> to vector<1x128xf32>
    %9 = vector.shape_cast %8 : vector<1x128xf32> to vector<1x1x128xf32>
    %cst_4 = arith.constant 9.000000e+00 : f32
    %10 = vector.broadcast %cst_4 : f32 to vector<1x1x128xf32>
    %11 = arith.divf %9, %10 : vector<1x1x128xf32>
    %cst_5 = arith.constant 9.99999974E-6 : f32
    %12 = vector.broadcast %cst_5 : f32 to vector<1x1x128xf32>
    %13 = arith.addf %11, %12 : vector<1x1x128xf32>
    %14 = math.rsqrt %13 : vector<1x1x128xf32>
    %15 = vector.broadcast %14 : vector<1x1x128xf32> to vector<1x9x128xf32>
    %16 = arith.mulf %6, %15 : vector<1x9x128xf32>
    %cst_6 = arith.constant 0.000000e+00 : f32
    %17 = vector.broadcast %cst_6 : f32 to vector<1x9x128xf32>
    %18 = arith.cmpf oge, %16, %17 : vector<1x9x128xf32>
    %cst_7 = arith.constant 2.000000e-01 : f32
    %19 = vector.broadcast %cst_7 : f32 to vector<1x9x128xf32>
    %20 = arith.mulf %19, %16 : vector<1x9x128xf32>
    %21 = arith.select %18, %16, %20 : vector<1x9x128xi1>, vector<1x9x128xf32>
    %22 = arith.truncf %21 : vector<1x9x128xf32> to vector<1x9x128xbf16>
    %c0_8 = arith.constant 0 : index
    %c0_9 = arith.constant 0 : index
    %c0_10 = arith.constant 0 : index
    %23 = vector.load %arg3[%c0_8, %c0_9, %c0_10] : memref<1x9x128xbf16, #tpu.memory_space<vmem>>, vector<1x9x128xbf16>
    tpu.vector_store %arg3[%c0_8, %c0_9, %c0_10], %22 {strides = array<i32>} : memref<1x9x128xbf16, #tpu.memory_space<vmem>>, vector<1x9x128xbf16>,
    return
  }
  func.func @transform_0(%arg0: i32, %arg1: i32) -> (i32, i32, i32) {
    %c0_i32 = arith.constant 0 : i32
    %c0_i32_0 = arith.constant 0 : i32
    return %arg0, %c0_i32, %arg1 : i32, i32, i32
  }
  func.func @transform_1(%arg0: i32, %arg1: i32) -> (i32, i32, i32) {
    %c0_i32 = arith.constant 0 : i32
    %c0_i32_0 = arith.constant 0 : i32
    return %arg0, %c0_i32, %arg1 : i32, i32, i32
  }
}

module attributes {stable_mosaic.version = 11 : i64} {
  func.func @_conv_gemm_kernel(%arg0: i32, %arg1: memref<64x48xbf16, #tpu.memory_space<vmem>>, %arg2: memref<48x128xbf16, #tpu.memory_space<vmem>>, %arg3: memref<1x128xf32, #tpu.memory_space<vmem>>, %arg4: memref<64x128xbf16, #tpu.memory_space<vmem>>) attributes {dimension_semantics = [#tpu.dimension_semantics<parallel>], iteration_bounds = array<i64: 2>, scalar_prefetch = 0 : i64, scratch_operands = 0 : i64, tpu.core_type = #tpu.core_type<tc>, window_params = [{transform_indices = @transform_0, window_bounds = array<i64: 64, 48>}, {pipeline_mode = #tpu.pipeline_mode<synchronous>, transform_indices = @transform_1, window_bounds = array<i64: 48, 128>}, {pipeline_mode = #tpu.pipeline_mode<synchronous>, transform_indices = @transform_2, window_bounds = array<i64: 1, 128>}, {transform_indices = @transform_3, window_bounds = array<i64: 64, 128>}]} {
    %c0 = arith.constant 0 : index
    %c0_0 = arith.constant 0 : index
    %0 = vector.load %arg1[%c0, %c0_0] : memref<64x48xbf16, #tpu.memory_space<vmem>>, vector<64x48xbf16>
    %c0_1 = arith.constant 0 : index
    %c0_2 = arith.constant 0 : index
    %1 = vector.load %arg2[%c0_1, %c0_2] : memref<48x128xbf16, #tpu.memory_space<vmem>>, vector<48x128xbf16>
    %cst = arith.constant dense<0.000000e+00> : vector<64x128xf32>
    %2 = tpu.matmul %0, %1, %cst {dimension_numbers = #tpu.dot_dimension_numbers<[1], [0], [0], [1], [0, 0, 1, 1], [], []>} : vector<64x48xbf16>, vector<48x128xbf16>, vector<64x128xf32> -> vector<64x128xf32>
    %c0_3 = arith.constant 0 : index
    %c0_4 = arith.constant 0 : index
    %3 = vector.load %arg3[%c0_3, %c0_4] : memref<1x128xf32, #tpu.memory_space<vmem>>, vector<1x128xf32>
    %4 = vector.broadcast %3 : vector<1x128xf32> to vector<64x128xf32>
    %5 = arith.addf %2, %4 : vector<64x128xf32>
    %cst_5 = arith.constant 0.000000e+00 : f32
    %6 = vector.broadcast %cst_5 : f32 to vector<64x128xf32>
    %7 = arith.cmpf oge, %5, %6 : vector<64x128xf32>
    %cst_6 = arith.constant 2.000000e-01 : f32
    %8 = vector.broadcast %cst_6 : f32 to vector<64x128xf32>
    %9 = arith.mulf %8, %5 : vector<64x128xf32>
    %10 = arith.select %7, %5, %9 : vector<64x128xi1>, vector<64x128xf32>
    %11 = arith.truncf %10 : vector<64x128xf32> to vector<64x128xbf16>
    %c0_7 = arith.constant 0 : index
    %c0_8 = arith.constant 0 : index
    %12 = vector.load %arg4[%c0_7, %c0_8] : memref<64x128xbf16, #tpu.memory_space<vmem>>, vector<64x128xbf16>
    tpu.vector_store %arg4[%c0_7, %c0_8], %11 {strides = array<i32>} : memref<64x128xbf16, #tpu.memory_space<vmem>>, vector<64x128xbf16>,
    return
  }
  func.func @transform_0(%arg0: i32) -> (i32, i32) {
    %c0_i32 = arith.constant 0 : i32
    %c0_i32_0 = arith.constant 0 : i32
    return %arg0, %c0_i32 : i32, i32
  }
  func.func @transform_1(%arg0: i32) -> (i32, i32) {
    %c0_i32 = arith.constant 0 : i32
    %c0_i32_0 = arith.constant 0 : i32
    %c0_i32_1 = arith.constant 0 : i32
    return %c0_i32, %c0_i32_0 : i32, i32
  }
  func.func @transform_2(%arg0: i32) -> (i32, i32) {
    %c0_i32 = arith.constant 0 : i32
    %c0_i32_0 = arith.constant 0 : i32
    %c0_i32_1 = arith.constant 0 : i32
    return %c0_i32, %c0_i32_0 : i32, i32
  }
  func.func @transform_3(%arg0: i32) -> (i32, i32) {
    %c0_i32 = arith.constant 0 : i32
    %c0_i32_0 = arith.constant 0 : i32
    return %arg0, %c0_i32 : i32, i32
  }
}

module attributes {stable_mosaic.version = 11 : i64} {
  func.func @_conv_gemm_kernel(%arg0: i32, %arg1: memref<16x2048xbf16, #tpu.memory_space<vmem>>, %arg2: memref<2048x128xbf16, #tpu.memory_space<vmem>>, %arg3: memref<1x128xf32, #tpu.memory_space<vmem>>, %arg4: memref<16x128xf32, #tpu.memory_space<vmem>>) attributes {dimension_semantics = [#tpu.dimension_semantics<parallel>], iteration_bounds = array<i64: 1>, scalar_prefetch = 0 : i64, scratch_operands = 0 : i64, tpu.core_type = #tpu.core_type<tc>, window_params = [{transform_indices = @transform_0, window_bounds = array<i64: 16, 2048>}, {pipeline_mode = #tpu.pipeline_mode<synchronous>, transform_indices = @transform_1, window_bounds = array<i64: 2048, 128>}, {pipeline_mode = #tpu.pipeline_mode<synchronous>, transform_indices = @transform_2, window_bounds = array<i64: 1, 128>}, {transform_indices = @transform_3, window_bounds = array<i64: 16, 128>}]} {
    %c0 = arith.constant 0 : index
    %c0_0 = arith.constant 0 : index
    %0 = vector.load %arg1[%c0, %c0_0] : memref<16x2048xbf16, #tpu.memory_space<vmem>>, vector<16x2048xbf16>
    %c0_1 = arith.constant 0 : index
    %c0_2 = arith.constant 0 : index
    %1 = vector.load %arg2[%c0_1, %c0_2] : memref<2048x128xbf16, #tpu.memory_space<vmem>>, vector<2048x128xbf16>
    %cst = arith.constant dense<0.000000e+00> : vector<16x128xf32>
    %2 = tpu.matmul %0, %1, %cst {dimension_numbers = #tpu.dot_dimension_numbers<[1], [0], [0], [1], [0, 0, 1, 1], [], []>} : vector<16x2048xbf16>, vector<2048x128xbf16>, vector<16x128xf32> -> vector<16x128xf32>
    %c0_3 = arith.constant 0 : index
    %c0_4 = arith.constant 0 : index
    %3 = vector.load %arg3[%c0_3, %c0_4] : memref<1x128xf32, #tpu.memory_space<vmem>>, vector<1x128xf32>
    %4 = vector.broadcast %3 : vector<1x128xf32> to vector<16x128xf32>
    %5 = arith.addf %2, %4 : vector<16x128xf32>
    %c0_5 = arith.constant 0 : index
    %c0_6 = arith.constant 0 : index
    %6 = vector.load %arg4[%c0_5, %c0_6] : memref<16x128xf32, #tpu.memory_space<vmem>>, vector<16x128xf32>
    tpu.vector_store %arg4[%c0_5, %c0_6], %5 {strides = array<i32>} : memref<16x128xf32, #tpu.memory_space<vmem>>, vector<16x128xf32>,
    return
  }
  func.func @transform_0(%arg0: i32) -> (i32, i32) {
    %c0_i32 = arith.constant 0 : i32
    %c0_i32_0 = arith.constant 0 : i32
    return %arg0, %c0_i32 : i32, i32
  }
  func.func @transform_1(%arg0: i32) -> (i32, i32) {
    %c0_i32 = arith.constant 0 : i32
    %c0_i32_0 = arith.constant 0 : i32
    %c0_i32_1 = arith.constant 0 : i32
    return %c0_i32, %c0_i32_0 : i32, i32
  }
  func.func @transform_2(%arg0: i32) -> (i32, i32) {
    %c0_i32 = arith.constant 0 : i32
    %c0_i32_0 = arith.constant 0 : i32
    %c0_i32_1 = arith.constant 0 : i32
    return %c0_i32, %c0_i32_0 : i32, i32
  }
  func.func @transform_3(%arg0: i32) -> (i32, i32) {
    %c0_i32 = arith.constant 0 : i32
    %c0_i32_0 = arith.constant 0 : i32
    return %arg0, %c0_i32 : i32, i32
  }
}

</mosaic_0001>

<bundles_post_ra>
// kernel: nlayer_discriminator_forward.14
= control target key start
LH: loop header
LB: loop body
LE: loop exit
PB: predicated region body
PF: predicated region fallthrough
CT: control target
= control target key end

     0   :  { %s1164_s12 = smov 0   ;;  %s1292_s0 = inlined_call_operand.vmem [shape: bf16[512,48], index: 0, kind: input, shape index: {}]   ;;  %s1293_s1 = inlined_call_operand.vmem [shape: bf16[48,128], index: 1, kind: input, shape index: {}]   ;;  %s1294_s2 = inlined_call_operand.vmem [shape: f32[1,128], index: 2, kind: input, shape index: {}]   ;;  %s1295_s3 = inlined_call_operand.vmem [shape: bf16[512,128], index: 3, kind: output, shape index: {}]  }
   0x1 LB: > { %s840_s13 = sadd.s32 4294967295, %s1142_s12   ;;  %p844_p0 = scmp.ge.s32.totalorder %s1142_s12, 1  ;;  %s1142_s12 = sphi %s1164_s12, %s13_s12  }
   0x2   : > { %p138_p1 = scmp.lt.s32.totalorder %s1142_s12, 3 }
   0x4   : > { %p139_p2 = pnand %p844_p0, %p138_p1 }
   0x5   : > { %v1117_v0 = vld [vmem:[%s1293_s1] sm:$0xff] (!%p139_p2)   ;;  %s845_s16 = sshll.u32 (!%p139_p2), %s840_s13, 5  ;;  %v1118_v1 = vld [vmem:[%s1293_s1 + $0x8] sm:$0xff] (!%p139_p2)   ;;  %v1119_v2 = vld [vmem:[%s1293_s1 + $0x10] sm:$0xff] (!%p139_p2)   ;;  %vm318_vm0 = vcmask (!%p139_p2), 392192  }
   0x6   : > { %142 = sbr.rel (%p139_p2) target bundleno = 273 (0x111), region = 32  ;;  %p163_p3 = scmp.lt.s32.totalorder (!%p139_p2), %s845_s16, 63  ;;  %1065 = vmatprep.subr.bf16.mxu0 (!%p139_p2), %v1117_v0  ;;  %1103 = vmatprep.subr.bf16.mxu1 (!%p139_p2), %v1117_v0  ;;  %v1226_v19 = vld [vmem:[%s1294_s2] ss:$0 sm:$0xff] (!%p139_p2) }
   0x7   : > { %1066 = vmatpush3.bf16.msra.mxu0 (!%p139_p2), %v1117_v0  ;;  %1106 = vmatpush3.bf16.msra.mxu1 (!%p139_p2), %v1117_v0 }
   0x8   : > { %1067 = vmatprep.subr.bf16.mxu0 (!%p139_p2), %v1118_v1  ;;  %1104 = vmatprep.subr.bf16.mxu1 (!%p139_p2), %v1118_v1 }
   0xb   : > { %1068 = vmatpush3.bf16.msra.mxu0 (!%p139_p2), %v1118_v1  ;;  %1107 = vmatpush3.bf16.msra.mxu1 (!%p139_p2), %v1118_v1 }
   0xc   : > { %1069 = vmatprep.subr.bf16.mxu0 (!%p139_p2), %v1119_v2  ;;  %1105 = vmatprep.subr.bf16.mxu1 (!%p139_p2), %v1119_v2 }
   0xd   : > { %s1297_s16 = smov (!%p163_p3, %s845_s16), 63 }
   0xe   : > { %s846_s21 = sshll.u32 %s1297_s16, 2 }
   0xf   : > { %s1189_s24 = scalar_lea.vmem %s1292_s0, %s846_s21  ;;  %1070 = vmatpush3.bf16.msra.mxu0 %v1119_v2  ;;  %1108 = vmatpush3.bf16.msra.mxu1 %v1119_v2  ;;  %s1243_s29 = scalar_lea.vmem %s1295_s3, %s846_s21 }
  0x10   : > { %v1120_v3 = vld [vmem:[%s1189_s24] sm:$0xff]   ;;  %v1122_v5 = vld [vmem:[%s1189_s24 + $0x8] sm:$0xff]   ;;  %v1124_v7 = vld [vmem:[%s1189_s24 + $0x10] sm:$0xff]  }
  0x11   : > { %v1121_v4 = vld [vmem:[%s1189_s24 + $0x40] sm:$0xff]   ;;  %1071 = vmatprep.mubr.msk.bf16.mxu0 %vm318_vm0, %v1120_v3  ;;  %v1123_v6 = vld [vmem:[%s1189_s24 + $0x48] sm:$0xff]   ;;  %v1125_v8 = vld [vmem:[%s1189_s24 + $0x50] sm:$0xff]  }
  0x12   : > { %1087 = vmatprep.mubr.msk.bf16.mxu1 %vm318_vm0, %v1121_v4  ;;  %1072 = vmatmul.mubr.msk.bf16.vlgmr.msra.gmra.mrb[0].mxu0 %vm318_vm0, %v1122_v5  ;;  %v1126_v9 = vld [vmem:[%s1189_s24 + $0x18] sm:$0xff]   ;;  %v1128_v11 = vld [vmem:[%s1189_s24 + $0x20] sm:$0xff]   ;;  %v1130_v13 = vld [vmem:[%s1189_s24 + $0x28] sm:$0xff]  }
  0x13   : > { %1088 = vmatmul.mubr.msk.bf16.vlgmr.msra.gmra.mrb[0].mxu1 %vm318_vm0, %v1123_v6  ;;  %1075 = vmatprep.mubr.msk.bf16.mxu0 %vm318_vm0, %v1124_v7  ;;  %v1127_v10 = vld [vmem:[%s1189_s24 + $0x58] sm:$0xff]   ;;  %v1129_v12 = vld [vmem:[%s1189_s24 + $0x60] sm:$0xff]   ;;  %v1131_v14 = vld [vmem:[%s1189_s24 + $0x68] sm:$0xff]  }
  0x14   : > { %1091 = vmatprep.mubr.msk.bf16.mxu1 %vm318_vm0, %v1125_v8  ;;  %v1132_v15 = vld [vmem:[%s1189_s24 + $0x30] sm:$0xff]   ;;  %v1134_v17 = vld [vmem:[%s1189_s24 + $0x38] sm:$0xff]  }
  0x15   : > { %v1133_v16 = vld [vmem:[%s1189_s24 + $0x70] sm:$0xff]   ;;  %v1135_v18 = vld [vmem:[%s1189_s24 + $0x78] sm:$0xff]  }
  0x1a   : > { %1076 = vmatmul.mubr.msk.bf16.gmra.mrb[4].mxu0 %vm318_vm0, %v1126_v9 }
  0x1b   : > { %1092 = vmatmul.mubr.msk.bf16.gmra.mrb[4].mxu1 %vm318_vm0, %v1127_v10  ;;  %1079 = vmatprep.mubr.msk.bf16.mxu0 %vm318_vm0, %v1128_v11 }
  0x1c   : > { %1095 = vmatprep.mubr.msk.bf16.mxu1 %vm318_vm0, %v1129_v12 }
  0x22   : > { %1080 = vmatmul.mubr.msk.bf16.gmra.mrb[8].mxu0 %vm318_vm0, %v1130_v13 }
  0x23   : > { %1096 = vmatmul.mubr.msk.bf16.gmra.mrb[8].mxu1 %vm318_vm0, %v1131_v14  ;;  %1083 = vmatprep.mubr.msk.bf16.mxu0 %vm318_vm0, %v1132_v15 }
  0x24   : > { %1099 = vmatprep.mubr.msk.bf16.mxu1 %vm318_vm0, %v1133_v16 }
  0x2a   : > { %1084 = vmatmul.mubr.msk.bf16.gmra.mrb[12].mxu0 %vm318_vm0, %v1134_v17 }
  0x2b   : > { %1100 = vmatmul.mubr.msk.bf16.gmra.mrb[12].mxu1 %vm318_vm0, %v1135_v18 }
  0xe5   : > { %v1073_v20 = vpop.f32.mrb[0].mxu0 }
  0xe6   : > { %v1089_v21 = vpop.f32.mrb[0].mxu1  ;;  %v410_v22 = vadd.f32 %v1073_v20, %v1226_v19  ;;  %v401_v24 = vpop.f32.mrb[1].mxu0 }
  0xe7   : > { %v474_v23 = vadd.f32 %v1089_v21, %v1226_v19  ;;  %v465_v25 = vpop.f32.mrb[1].mxu1  ;;  %v402_v26 = vadd.f32 %v1226_v19, %v401_v24  ;;  %v1074_v28 = vpop.f32.mrb[2].mxu0 }
  0xe8   : > { %v466_v27 = vadd.f32 %v1226_v19, %v465_v25  ;;  %v1090_v29 = vpop.f32.mrb[2].mxu1  ;;  %vm530_vm1 = vcmp.ge.f32.partialorder %v410_v22, 0.0  ;;  %v562_v30 = vmul.f32 0.2, %v410_v22  ;;  %v413_v34 = vadd.f32 %v1074_v28, %v1226_v19  ;;  %v404_v36 = vpop.f32.mrb[3].mxu0 }
  0xe9   : > { %vm546_vm2 = vcmp.ge.f32.partialorder %v474_v23, 0.0  ;;  %v578_v31 = vmul.f32 0.2, %v474_v23  ;;  %vm528_vm3 = vcmp.ge.f32.partialorder %v402_v26, 0.0  ;;  %v560_v32 = vmul.f32 0.2, %v402_v26 }
  0xea   : > { %vm544_vm4 = vcmp.ge.f32.partialorder %v466_v27, 0.0  ;;  %v576_v33 = vmul.f32 0.2, %v466_v27  ;;  %v477_v35 = vadd.f32 %v1090_v29, %v1226_v19  ;;  %v468_v37 = vpop.f32.mrb[3].mxu1  ;;  %v594_v38 = vsel %vm530_vm1, %v410_v22, %v562_v30 }
  0xeb   : > { %v610_v39 = vsel %vm546_vm2, %v474_v23, %v578_v31  ;;  %v405_v40 = vadd.f32 %v1226_v19, %v404_v36  ;;  %v469_v41 = vadd.f32 %v1226_v19, %v468_v37  ;;  %vm531_vm5 = vcmp.ge.f32.partialorder %v413_v34, 0.0 }
  0xec   : > { %v563_v42 = vmul.f32 0.2, %v413_v34  ;;  %vm547_vm6 = vcmp.ge.f32.partialorder %v477_v35, 0.0  ;;  %v579_v43 = vmul.f32 0.2, %v477_v35  ;;  %v592_v46 = vsel %vm528_vm3, %v402_v26, %v560_v32 }
  0xed   : > { %vm529_vm7 = vcmp.ge.f32.partialorder %v405_v40, 0.0  ;;  %v561_v44 = vmul.f32 0.2, %v405_v40  ;;  %vm545_vm8 = vcmp.ge.f32.partialorder %v469_v41, 0.0  ;;  %v577_v45 = vmul.f32 0.2, %v469_v41 }
  0xee   : > { %v608_v47 = vsel %vm544_vm4, %v466_v27, %v576_v33  ;;  %v595_v48 = vsel %vm531_vm5, %v413_v34, %v563_v42  ;;  %v611_v49 = vsel %vm547_vm6, %v477_v35, %v579_v43  ;;  %v1077_v50 = vpop.f32.mrb[4].mxu0  ;;  %v1093_v51 = vpop.f32.mrb[4].mxu1 }
  0xef   : > { %v959_v52 = vpack.c.bf16 %v595_v48, %v594_v38  ;;  %v999_v53 = vpack.c.bf16 %v611_v49, %v610_v39  ;;  %v593_v54 = vsel %vm529_vm7, %v405_v40, %v561_v44  ;;  %v609_v55 = vsel %vm545_vm8, %v469_v41, %v577_v45  ;;  %v417_v56 = vpop.f32.mrb[5].mxu0  ;;  %v481_v57 = vpop.f32.mrb[5].mxu1 }
  0xf0   : > { %v954_v58 = vpack.c.bf16 %v593_v54, %v592_v46  ;;  %v994_v59 = vpack.c.bf16 %v609_v55, %v608_v47  ;;  %v426_v60 = vadd.f32 %v1077_v50, %v1226_v19  ;;  %v490_v61 = vadd.f32 %v1093_v51, %v1226_v19  ;;  %v1078_v62 = vpop.f32.mrb[6].mxu0  ;;  %v1094_v63 = vpop.f32.mrb[6].mxu1 }
  0xf1   : > { %1031 = vst [vmem:[%s1243_s29 + $0x8] sm:$0xff] %v959_v52   ;;  %1039 = vst [vmem:[%s1243_s29 + $0x48] sm:$0xff] %v999_v53   ;;  %v418_v0 = vadd.f32 %v1226_v19, %v417_v56  ;;  %v482_v1 = vadd.f32 %v1226_v19, %v481_v57  ;;  %v429_v2 = vadd.f32 %v1078_v62, %v1226_v19  ;;  %v420_v4 = vpop.f32.mrb[7].mxu0  ;;  %v484_v5 = vpop.f32.mrb[7].mxu1 }
  0xf2   : > { %v493_v3 = vadd.f32 %v1094_v63, %v1226_v19  ;;  %955 = vst [vmem:[%s1243_s29] sm:$0xff] %v954_v58   ;;  %1038 = vst [vmem:[%s1243_s29 + $0x40] sm:$0xff] %v994_v59   ;;  %vm534_vm9 = vcmp.ge.f32.partialorder %v426_v60, 0.0  ;;  %v566_v6 = vmul.f32 0.2, %v426_v60  ;;  %vm550_vm10 = vcmp.ge.f32.partialorder %v490_v61, 0.0 }
  0xf3   : > { %v582_v7 = vmul.f32 0.2, %v490_v61  ;;  %vm532_vm11 = vcmp.ge.f32.partialorder %v418_v0, 0.0  ;;  %v564_v8 = vmul.f32 0.2, %v418_v0  ;;  %vm548_vm12 = vcmp.ge.f32.partialorder %v482_v1, 0.0 }
  0xf4   : > { %v598_v9 = vsel %vm534_vm9, %v426_v60, %v566_v6  ;;  %v580_v10 = vmul.f32 0.2, %v482_v1  ;;  %vm535_vm13 = vcmp.ge.f32.partialorder %v429_v2, 0.0  ;;  %v567_v11 = vmul.f32 0.2, %v429_v2 }
  0xf5   : > { %v614_v12 = vsel %vm550_vm10, %v490_v61, %v582_v7  ;;  %v596_v13 = vsel %vm532_vm11, %v418_v0, %v564_v8  ;;  %vm551_vm14 = vcmp.ge.f32.partialorder %v493_v3, 0.0  ;;  %v583_v14 = vmul.f32 0.2, %v493_v3  ;;  %v1081_v15 = vpop.f32.mrb[8].mxu0 }
  0xf6   : > { %v1097_v16 = vpop.f32.mrb[8].mxu1  ;;  %v599_v17 = vsel %vm535_vm13, %v429_v2, %v567_v11  ;;  %v421_v18 = vadd.f32 %v1226_v19, %v420_v4  ;;  %v485_v20 = vadd.f32 %v1226_v19, %v484_v5  ;;  %v442_v21 = vadd.f32 %v1081_v15, %v1226_v19  ;;  %v433_v22 = vpop.f32.mrb[9].mxu0 }
  0xf7   : > { %v497_v23 = vpop.f32.mrb[9].mxu1  ;;  %v969_v24 = vpack.c.bf16 %v599_v17, %v598_v9  ;;  %v615_v25 = vsel %vm551_vm14, %v493_v3, %v583_v14  ;;  %v506_v26 = vadd.f32 %v1097_v16, %v1226_v19  ;;  %v434_v27 = vadd.f32 %v1226_v19, %v433_v22  ;;  %v1082_v28 = vpop.f32.mrb[10].mxu0 }
  0xf8   : > { %v1098_v29 = vpop.f32.mrb[10].mxu1  ;;  %v1009_v30 = vpack.c.bf16 %v615_v25, %v614_v12  ;;  %vm533_vm15 = vcmp.ge.f32.partialorder %v421_v18, 0.0  ;;  %v565_v31 = vmul.f32 0.2, %v421_v18  ;;  %vm549_vm0 = vcmp.ge.f32.partialorder %v485_v20, 0.0  ;;  %v436_v32 = vpop.f32.mrb[11].mxu0 }
  0xf9   : > { %v500_v33 = vpop.f32.mrb[11].mxu1  ;;  %1033 = vst [vmem:[%s1243_s29 + $0x18] sm:$0xff] %v969_v24   ;;  %v581_v34 = vmul.f32 0.2, %v485_v20  ;;  %vm538_vm1 = vcmp.ge.f32.partialorder %v442_v21, 0.0  ;;  %vm554_vm2 = vcmp.ge.f32.partialorder %v506_v26, 0.0  ;;  %v612_v36 = vsel %vm548_vm12, %v482_v1, %v580_v10 }
  0xfa   : > { %v570_v35 = vmul.f32 0.2, %v442_v21  ;;  %1041 = vst [vmem:[%s1243_s29 + $0x58] sm:$0xff] %v1009_v30   ;;  %v597_v37 = vsel %vm533_vm15, %v421_v18, %v565_v31  ;;  %v586_v38 = vmul.f32 0.2, %v506_v26  ;;  %vm536_vm3 = vcmp.ge.f32.partialorder %v434_v27, 0.0 }
  0xfb   : > { %v964_v39 = vpack.c.bf16 %v597_v37, %v596_v13  ;;  %v613_v40 = vsel %vm549_vm0, %v485_v20, %v581_v34  ;;  %v568_v41 = vmul.f32 0.2, %v434_v27  ;;  %v498_v42 = vadd.f32 %v1226_v19, %v497_v23 }
  0xfc   : > { %v1004_v43 = vpack.c.bf16 %v613_v40, %v612_v36  ;;  %v602_v44 = vsel %vm538_vm1, %v442_v21, %v570_v35  ;;  %v618_v45 = vsel %vm554_vm2, %v506_v26, %v586_v38  ;;  %v445_v46 = vadd.f32 %v1082_v28, %v1226_v19 }
  0xfd   : > { %1032 = vst [vmem:[%s1243_s29 + $0x10] sm:$0xff] %v964_v39   ;;  %vm552_vm4 = vcmp.ge.f32.partialorder %v498_v42, 0.0  ;;  %v584_v47 = vmul.f32 0.2, %v498_v42  ;;  %v509_v48 = vadd.f32 %v1098_v29, %v1226_v19  ;;  %v437_v49 = vadd.f32 %v1226_v19, %v436_v32  ;;  %v1085_v50 = vpop.f32.mrb[12].mxu0 }
  0xfe   : > { %v1101_v51 = vpop.f32.mrb[12].mxu1  ;;  %1040 = vst [vmem:[%s1243_s29 + $0x50] sm:$0xff] %v1004_v43   ;;  %vm539_vm5 = vcmp.ge.f32.partialorder %v445_v46, 0.0  ;;  %v571_v52 = vmul.f32 0.2, %v445_v46  ;;  %v501_v53 = vadd.f32 %v1226_v19, %v500_v33  ;;  %v458_v54 = vadd.f32 %v1085_v50, %v1226_v19  ;;  %v449_v55 = vpop.f32.mrb[13].mxu0 }
  0xff   : > { %v513_v56 = vpop.f32.mrb[13].mxu1  ;;  %v600_v57 = vsel %vm536_vm3, %v434_v27, %v568_v41  ;;  %vm555_vm6 = vcmp.ge.f32.partialorder %v509_v48, 0.0  ;;  %v587_v58 = vmul.f32 0.2, %v509_v48  ;;  %vm537_vm7 = vcmp.ge.f32.partialorder %v437_v49, 0.0  ;;  %v1086_v59 = vpop.f32.mrb[14].mxu0 }
 0x100   : > { %v1102_v60 = vpop.f32.mrb[14].mxu1  ;;  %v603_v61 = vsel %vm539_vm5, %v445_v46, %v571_v52  ;;  %v569_v62 = vmul.f32 0.2, %v437_v49  ;;  %vm553_vm8 = vcmp.ge.f32.partialorder %v501_v53, 0.0  ;;  %v585_v63 = vmul.f32 0.2, %v501_v53 }
 0x101   : > { %v452_v0 = vpop.f32.mrb[15].mxu0  ;;  %v616_v1 = vsel %vm552_vm4, %v498_v42, %v584_v47  ;;  %v979_v2 = vpack.c.bf16 %v603_v61, %v602_v44  ;;  %v619_v3 = vsel %vm555_vm6, %v509_v48, %v587_v58  ;;  %v574_v4 = vmul.f32 0.2, %v458_v54  ;;  %v516_v5 = vpop.f32.mrb[15].mxu1 }
 0x102   : > { %v1019_v6 = vpack.c.bf16 %v619_v3, %v618_v45  ;;  %v601_v7 = vsel %vm537_vm7, %v437_v49, %v569_v62  ;;  %v617_v8 = vsel %vm553_vm8, %v501_v53, %v585_v63  ;;  %v522_v9 = vadd.f32 %v1101_v51, %v1226_v19 }
 0x103   : > { %1035 = vst [vmem:[%s1243_s29 + $0x28] sm:$0xff] %v979_v2   ;;  %v974_v10 = vpack.c.bf16 %v601_v7, %v600_v57  ;;  %v1014_v11 = vpack.c.bf16 %v617_v8, %v616_v1  ;;  %vm542_vm9 = vcmp.ge.f32.partialorder %v458_v54, 0.0  ;;  %v450_v12 = vadd.f32 %v1226_v19, %v449_v55 }
 0x104   : > { %1043 = vst [vmem:[%s1243_s29 + $0x68] sm:$0xff] %v1019_v6   ;;  %vm558_vm10 = vcmp.ge.f32.partialorder %v522_v9, 0.0  ;;  %v590_v13 = vmul.f32 0.2, %v522_v9  ;;  %v514_v14 = vadd.f32 %v1226_v19, %v513_v56  ;;  %v461_v15 = vadd.f32 %v1086_v59, %v1226_v19 }
 0x105   : > { %1034 = vst [vmem:[%s1243_s29 + $0x20] sm:$0xff] %v974_v10   ;;  %1042 = vst [vmem:[%s1243_s29 + $0x60] sm:$0xff] %v1014_v11   ;;  %v572_v16 = vmul.f32 0.2, %v450_v12  ;;  %v525_v17 = vadd.f32 %v1102_v60, %v1226_v19  ;;  %v453_v18 = vadd.f32 %v1226_v19, %v452_v0  ;;  %v606_v20 = vsel %vm542_vm9, %v458_v54, %v574_v4 }
 0x106   : > { %vm540_vm11 = vcmp.ge.f32.partialorder %v450_v12, 0.0  ;;  %vm543_vm12 = vcmp.ge.f32.partialorder %v461_v15, 0.0  ;;  %v622_v21 = vsel %vm558_vm10, %v522_v9, %v590_v13  ;;  %v575_v22 = vmul.f32 0.2, %v461_v15 }
 0x107   : > { %vm559_vm13 = vcmp.ge.f32.partialorder %v525_v17, 0.0  ;;  %v591_v23 = vmul.f32 0.2, %v525_v17  ;;  %vm556_vm14 = vcmp.ge.f32.partialorder %v514_v14, 0.0  ;;  %vm541_vm15 = vcmp.ge.f32.partialorder %v453_v18, 0.0 }
 0x108   : > { %v573_v24 = vmul.f32 0.2, %v453_v18  ;;  %v517_v25 = vadd.f32 %v1226_v19, %v516_v5  ;;  %v604_v26 = vsel %vm540_vm11, %v450_v12, %v572_v16  ;;  %v588_v27 = vmul.f32 0.2, %v514_v14 }
 0x109   : > { %v607_v28 = vsel %vm543_vm12, %v461_v15, %v575_v22  ;;  %v623_v29 = vsel %vm559_vm13, %v525_v17, %v591_v23 }
 0x10a   : > { %v989_v30 = vpack.c.bf16 %v607_v28, %v606_v20  ;;  %v1029_v31 = vpack.c.bf16 %v623_v29, %v622_v21  ;;  %v605_v32 = vsel %vm541_vm15, %v453_v18, %v573_v24  ;;  %vm557_vm0 = vcmp.ge.f32.partialorder %v517_v25, 0.0 }
 0x10b   : > { %v984_v33 = vpack.c.bf16 %v605_v32, %v604_v26  ;;  %v589_v34 = vmul.f32 0.2, %v517_v25  ;;  %v620_v35 = vsel %vm556_vm14, %v514_v14, %v588_v27 }
 0x10c   : > { %1037 = vst [vmem:[%s1243_s29 + $0x38] sm:$0xff] %v989_v30   ;;  %1045 = vst [vmem:[%s1243_s29 + $0x78] sm:$0xff] %v1029_v31  }
 0x10d   : > { %1036 = vst [vmem:[%s1243_s29 + $0x30] sm:$0xff] %v984_v33   ;;  %v621_v36 = vsel %vm557_vm0, %v517_v25, %v589_v34 }
 0x10e   : > { %v1024_v37 = vpack.c.bf16 %v621_v36, %v620_v35 }
 0x110   : > { %1044 = vst [vmem:[%s1243_s29 + $0x70] sm:$0xff] %v1024_v37  }
 0x111 PF: > { %s13_s12 = sadd.s32 1, %s1142_s12  }
 0x112   : > { %p10_p4 = scmp.ge.s32.totalorder %s13_s12, 4  }
 0x114   :  { %12 = sbr.rel (!%p10_p4) target bundleno = 1 (0x1), region = 62 }

// kernel: nlayer_discriminator_forward.16
= control target key start
LH: loop header
LB: loop body
LE: loop exit
PB: predicated region body
PF: predicated region fallthrough
CT: control target
= control target key end

     0   :  { %s470_s6 = smov 0   ;;  %s472_s7 = smov 0   ;;  %s507_s0 = inlined_call_operand.vmem [shape: f32[2,64,128], index: 0, kind: input, shape index: {}]   ;;  %s508_s1 = inlined_call_operand.vmem [shape: bf16[2,64,128], index: 1, kind: output, shape index: {}]  }
   0x1   :  { %s474_s8 = smov 0  }
   0x2 LB: > { %s23_s9 = sadd.s32 1, %s454_s7  ;;  %p362_p0 = scmp.ge.s32.totalorder %s458_s8, 1  ;;  %s458_s8 = sphi %s474_s8, %s11_s8   ;;  %s454_s7 = sphi %s472_s7, %s510_s7   ;;  %s450_s6 = sphi %s470_s6, %s509_s6  }
   0x3   : > { %p25_p1 = scmp.ge.s32.totalorder %s23_s9, 2  ;;  %p106_p2 = scmp.lt.s32.totalorder %s458_s8, 3 }
   0x5   : > { %s512_s9 = smov (%p25_p1, %s23_s9), 0  ;;  %p107_p3 = pnand %p362_p0, %p106_p2 }
   0x6   : > { %p132_p4 = scmp.lt.s32.totalorder (!%p107_p3), %s450_s6, 1 }
   0x7   : > { %110 = sbr.rel (%p107_p3) target bundleno = 104 (0x68), region = 24 }
   0xe   : > { %s514_s6 = smov (!%p132_p4, %s450_s6), 1 }
   0xf   : > { %s377_s10 = sshll.u32 %s514_s6, 6  ;;  %s378_s14 = sshll.u32 %s514_s6, 5 }
  0x10   : > { %s139_s13 = scalar_lea.vmem %s507_s0, %s377_s10  ;;  %s147_s17 = scalar_lea.vmem %s508_s1, %s378_s14 }
  0x11   : > { %v148_v0 = vld [vmem:[%s139_s13] sm:$0xff]  ;;  %v149_v1 = vld [vmem:[%s139_s13 + $0x8] sm:$0xff]  ;;  %v150_v2 = vld [vmem:[%s139_s13 + $0x10] sm:$0xff] }
  0x12   : > { %v156_v3 = vadd.f32 %v149_v1, %v148_v0  ;;  %v151_v4 = vld [vmem:[%s139_s13 + $0x18] sm:$0xff]  ;;  %v152_v6 = vld [vmem:[%s139_s13 + $0x20] sm:$0xff]  ;;  %v153_v8 = vld [vmem:[%s139_s13 + $0x28] sm:$0xff] }
  0x13   : > { %v154_v10 = vld [vmem:[%s139_s13 + $0x30] sm:$0xff]  ;;  %v155_v12 = vld [vmem:[%s139_s13 + $0x38] sm:$0xff] }
  0x14   : > { %v157_v5 = vadd.f32 %v156_v3, %v150_v2 }
  0x16   : > { %v158_v7 = vadd.f32 %v157_v5, %v151_v4 }
  0x18   : > { %v159_v9 = vadd.f32 %v158_v7, %v152_v6 }
  0x1a   : > { %v160_v11 = vadd.f32 %v159_v9, %v153_v8 }
  0x1c   : > { %v161_v13 = vadd.f32 %v160_v11, %v154_v10 }
  0x1e   : > { %v162_v14 = vadd.f32 %v161_v13, %v155_v12 }
  0x20   : > { %v163_v15 = vrot.slane %v162_v14, 4 }
  0x22   : > { %v164_v16 = vadd.f32 %v163_v15, %v162_v14 }
  0x24   : > { %v165_v17 = vrot.slane %v164_v16, 2 }
  0x26   : > { %v166_v18 = vadd.f32 %v165_v17, %v164_v16 }
  0x28   : > { %v167_v19 = vrot.slane %v166_v18, 1 }
  0x2a   : > { %v168_v20 = vadd.f32 %v167_v19, %v166_v18 }
  0x2c   : > { %v170_v21 = vmul.f32 0.015625, %v168_v20 }
  0x2e   : > { %v171_v22 = vsub.f32 %v148_v0, %v170_v21  ;;  %v172_v23 = vsub.f32 %v149_v1, %v170_v21  ;;  %v173_v24 = vsub.f32 %v150_v2, %v170_v21  ;;  %v174_v25 = vsub.f32 %v151_v4, %v170_v21 }
  0x2f   : > { %v175_v26 = vsub.f32 %v152_v6, %v170_v21  ;;  %v176_v30 = vsub.f32 %v153_v8, %v170_v21  ;;  %v177_v33 = vsub.f32 %v154_v10, %v170_v21  ;;  %v178_v36 = vsub.f32 %v155_v12, %v170_v21 }
  0x30   : > { %v179_v27 = vmul.f32 %v171_v22, %v171_v22  ;;  %v180_v28 = vmul.f32 %v172_v23, %v172_v23  ;;  %v181_v29 = vmul.f32 %v173_v24, %v173_v24  ;;  %v182_v31 = vmul.f32 %v174_v25, %v174_v25 }
  0x31   : > { %v183_v34 = vmul.f32 %v175_v26, %v175_v26  ;;  %v184_v37 = vmul.f32 %v176_v30, %v176_v30  ;;  %v185_v39 = vmul.f32 %v177_v33, %v177_v33  ;;  %v186_v41 = vmul.f32 %v178_v36, %v178_v36 }
  0x32   : > { %v187_v32 = vadd.f32 %v180_v28, %v179_v27 }
  0x34   : > { %v188_v35 = vadd.f32 %v187_v32, %v181_v29 }
  0x36   : > { %v189_v38 = vadd.f32 %v188_v35, %v182_v31 }
  0x38   : > { %v190_v40 = vadd.f32 %v189_v38, %v183_v34 }
  0x3a   : > { %v191_v42 = vadd.f32 %v190_v40, %v184_v37 }
  0x3c   : > { %v192_v43 = vadd.f32 %v191_v42, %v185_v39 }
  0x3e   : > { %v193_v44 = vadd.f32 %v192_v43, %v186_v41 }
  0x40   : > { %v194_v45 = vrot.slane %v193_v44, 4 }
  0x42   : > { %v195_v46 = vadd.f32 %v194_v45, %v193_v44 }
  0x44   : > { %v196_v47 = vrot.slane %v195_v46, 2 }
  0x46   : > { %v197_v48 = vadd.f32 %v196_v47, %v195_v46 }
  0x48   : > { %v198_v49 = vrot.slane %v197_v48, 1 }
  0x4a   : > { %v199_v50 = vadd.f32 %v198_v49, %v197_v48 }
  0x4c   : > { %v200_v51 = vmul.f32 0.015625, %v199_v50 }
  0x4e   : > { %v201_v52 = vadd.f32 1e-05, %v200_v51 }
  0x50   : > { %434 = vrsqrt.f32 %v201_v52 }
  0x5a   : > { %v435_v53 = vpop.eup %434 }
  0x5b   : > { %v203_v54 = vmul.f32 %v435_v53, %v171_v22  ;;  %v204_v55 = vmul.f32 %v435_v53, %v172_v23  ;;  %v205_v56 = vmul.f32 %v435_v53, %v173_v24  ;;  %v206_v57 = vmul.f32 %v435_v53, %v174_v25 }
  0x5c   : > { %v207_v58 = vmul.f32 %v435_v53, %v175_v26  ;;  %v208_v59 = vmul.f32 %v435_v53, %v176_v30  ;;  %v209_v60 = vmul.f32 %v435_v53, %v177_v33  ;;  %v210_v61 = vmul.f32 %v435_v53, %v178_v36 }
  0x5d   : > { %vm211_vm0 = vcmp.ge.f32.partialorder %v203_v54, 0.0  ;;  %vm212_vm1 = vcmp.ge.f32.partialorder %v204_v55, 0.0  ;;  %v219_v62 = vmul.f32 0.2, %v203_v54  ;;  %v220_v63 = vmul.f32 0.2, %v204_v55 }
  0x5e   : > { %vm213_vm2 = vcmp.ge.f32.partialorder %v205_v56, 0.0  ;;  %vm214_vm3 = vcmp.ge.f32.partialorder %v206_v57, 0.0  ;;  %v221_v0 = vmul.f32 0.2, %v205_v56  ;;  %v222_v1 = vmul.f32 0.2, %v206_v57 }
  0x5f   : > { %v227_v2 = vsel %vm211_vm0, %v203_v54, %v219_v62  ;;  %v228_v3 = vsel %vm212_vm1, %v204_v55, %v220_v63  ;;  %vm215_vm4 = vcmp.ge.f32.partialorder %v207_v58, 0.0  ;;  %vm216_vm5 = vcmp.ge.f32.partialorder %v208_v59, 0.0 }
  0x60   : > { %v390_v4 = vpack.c.bf16 %v228_v3, %v227_v2  ;;  %v229_v5 = vsel %vm213_vm2, %v205_v56, %v221_v0  ;;  %v230_v6 = vsel %vm214_vm3, %v206_v57, %v222_v1  ;;  %v223_v7 = vmul.f32 0.2, %v207_v58 }
  0x61   : > { %v395_v8 = vpack.c.bf16 %v230_v6, %v229_v5  ;;  %v224_v9 = vmul.f32 0.2, %v208_v59  ;;  %vm217_vm6 = vcmp.ge.f32.partialorder %v209_v60, 0.0  ;;  %vm218_vm7 = vcmp.ge.f32.partialorder %v210_v61, 0.0 }
  0x62   : > { %391 = vst [vmem:[%s147_s17] sm:$0xff] %v390_v4   ;;  %v231_v10 = vsel %vm215_vm4, %v207_v58, %v223_v7  ;;  %v225_v11 = vmul.f32 0.2, %v209_v60  ;;  %v226_v12 = vmul.f32 0.2, %v210_v61 }
  0x63   : > { %407 = vst [vmem:[%s147_s17 + $0x8] sm:$0xff] %v395_v8   ;;  %v232_v13 = vsel %vm216_vm5, %v208_v59, %v224_v9 }
  0x64   : > { %v400_v14 = vpack.c.bf16 %v232_v13, %v231_v10  ;;  %v233_v15 = vsel %vm217_vm6, %v209_v60, %v225_v11  ;;  %v234_v16 = vsel %vm218_vm7, %v210_v61, %v226_v12 }
  0x65   : > { %v405_v17 = vpack.c.bf16 %v234_v16, %v233_v15 }
  0x66   : > { %408 = vst [vmem:[%s147_s17 + $0x10] sm:$0xff] %v400_v14  }
  0x67   : > { %409 = vst [vmem:[%s147_s17 + $0x18] sm:$0xff] %v405_v17  }
  0x68 PF: > { %s11_s8 = sadd.s32 1, %s458_s8   ;;  %s509_s6 = smov %s454_s7 }
  0x69   : > { %p8_p5 = scmp.ge.s32.totalorder %s11_s8, 4   ;;  %s510_s7 = smov %s512_s9 }
  0x6b   :  { %10 = sbr.rel (!%p8_p5) target bundleno = 2 (0x2), region = 54 }

// kernel: nlayer_discriminator_forward.15
= control target key start
LH: loop header
LB: loop body
LE: loop exit
PB: predicated region body
PF: predicated region fallthrough
CT: control target
= control target key end

     0   :  { %s2867_s12 = smov 0   ;;  %s3398_s0 = inlined_call_operand.vmem [shape: bf16[128,2048], index: 0, kind: input, shape index: {}]   ;;  %s3399_s1 = inlined_call_operand.vmem [shape: bf16[2048,128], index: 1, kind: input, shape index: {}]   ;;  %s3400_s2 = inlined_call_operand.vmem [shape: f32[1,128], index: 2, kind: input, shape index: {}]   ;;  %s3401_s3 = inlined_call_operand.vmem [shape: f32[128,128], index: 3, kind: output, shape index: {}]  }
   0x1 LB: > { %s2177_s13 = sadd.s32 4294967295, %s2845_s12   ;;  %p2181_p0 = scmp.ge.s32.totalorder %s2845_s12, 1  ;;  %s2845_s12 = sphi %s2867_s12, %s13_s12  }
   0x2   : > { %p139_p1 = scmp.lt.s32.totalorder %s2845_s12, 3 }
   0x4   : > { %p140_p2 = pnand %p2181_p0, %p139_p1 }
   0x5   : > { %v2711_v0 = vld [vmem:[%s3399_s1 + $0x40] sm:$0xff] (!%p140_p2)   ;;  %v2715_v4 = vld [vmem:[%s3399_s1 + $0x48] sm:$0xff] (!%p140_p2)   ;;  %v2719_v8 = vld [vmem:[%s3399_s1 + $0x50] sm:$0xff] (!%p140_p2)   ;;  %s2182_s21 = sshll.u32 (!%p140_p2), %s2177_s13, 3 }
   0x6   : > { %143 = sbr.rel (%p140_p2) target bundleno = 381 (0x17d), region = 32  ;;  %v2712_v1 = vld [vmem:[%s3399_s1 + $0xc0] sm:$0xff] (!%p140_p2)   ;;  %2383 = vmatprep.subr.bf16.mxu0 (!%p140_p2), %v2711_v0  ;;  %v2716_v5 = vld [vmem:[%s3399_s1 + $0xc8] sm:$0xff] (!%p140_p2)   ;;  %v2720_v9 = vld [vmem:[%s3399_s1 + $0xd0] sm:$0xff] (!%p140_p2)   ;;  %p165_p3 = scmp.lt.s32.totalorder (!%p140_p2), %s2182_s21, 15 }
   0x7   : > { %v2713_v2 = vld [vmem:[%s3399_s1] sm:$0xff] (!%p140_p2)   ;;  %2423 = vmatprep.subr.bf16.mxu1 (!%p140_p2), %v2712_v1  ;;  %v2717_v6 = vld [vmem:[%s3399_s1 + $0x8] sm:$0xff] (!%p140_p2)   ;;  %v2721_v10 = vld [vmem:[%s3399_s1 + $0x10] sm:$0xff] (!%p140_p2)  }
   0x8   : > { %v2714_v3 = vld [vmem:[%s3399_s1 + $0x80] sm:$0xff] (!%p140_p2)   ;;  %2384 = vmatpush3.bf16.msra.mxu0 (!%p140_p2), %v2713_v2  ;;  %v2718_v7 = vld [vmem:[%s3399_s1 + $0x88] sm:$0xff] (!%p140_p2)   ;;  %v2722_v11 = vld [vmem:[%s3399_s1 + $0x90] sm:$0xff] (!%p140_p2)  }
   0x9   : > { %2424 = vmatpush3.bf16.msra.mxu1 (!%p140_p2), %v2714_v3  ;;  %2385 = vmatprep.subr.bf16.mxu0 (!%p140_p2), %v2715_v4  ;;  %v2723_v12 = vld [vmem:[%s3399_s1 + $0x58] sm:$0xff] (!%p140_p2)   ;;  %v2727_v16 = vld [vmem:[%s3399_s1 + $0x60] sm:$0xff] (!%p140_p2)   ;;  %v2731_v20 = vld [vmem:[%s3399_s1 + $0x68] sm:$0xff] (!%p140_p2)  }
   0xa   : > { %2425 = vmatprep.subr.bf16.mxu1 (!%p140_p2), %v2716_v5  ;;  %v2724_v13 = vld [vmem:[%s3399_s1 + $0xd8] sm:$0xff] (!%p140_p2)   ;;  %v2728_v17 = vld [vmem:[%s3399_s1 + $0xe0] sm:$0xff] (!%p140_p2)   ;;  %v2732_v21 = vld [vmem:[%s3399_s1 + $0xe8] sm:$0xff] (!%p140_p2)  }
   0xb   : > { %v2725_v14 = vld [vmem:[%s3399_s1 + $0x18] sm:$0xff] (!%p140_p2)   ;;  %v2729_v18 = vld [vmem:[%s3399_s1 + $0x20] sm:$0xff] (!%p140_p2)   ;;  %v2733_v22 = vld [vmem:[%s3399_s1 + $0x28] sm:$0xff] (!%p140_p2)  }
   0xc   : > { %2386 = vmatpush3.bf16.msra.mxu0 (!%p140_p2), %v2717_v6  ;;  %v2726_v15 = vld [vmem:[%s3399_s1 + $0x98] sm:$0xff] (!%p140_p2)   ;;  %v2730_v19 = vld [vmem:[%s3399_s1 + $0xa0] sm:$0xff] (!%p140_p2)   ;;  %v2734_v23 = vld [vmem:[%s3399_s1 + $0xa8] sm:$0xff] (!%p140_p2)  }
   0xd   : > { %2426 = vmatpush3.bf16.msra.mxu1 %v2718_v7  ;;  %2387 = vmatprep.subr.bf16.mxu0 %v2719_v8  ;;  %s3403_s21 = smov (!%p165_p3, %s2182_s21), 15  ;;  %v2735_v24 = vld [vmem:[%s3399_s1 + $0x70] sm:$0xff]   ;;  %v2739_v28 = vld [vmem:[%s3399_s1 + $0x78] sm:$0xff]   ;;  %v2743_v40 = vld [vmem:[%s3399_s1 + $0x140] sm:$0xff]  }
   0xe   : > { %2427 = vmatprep.subr.bf16.mxu1 %v2720_v9  ;;  %v2736_v25 = vld [vmem:[%s3399_s1 + $0xf0] sm:$0xff]   ;;  %s2382_s18 = sshll.u32 %s3403_s21, 6  ;;  %v2740_v29 = vld [vmem:[%s3399_s1 + $0xf8] sm:$0xff]   ;;  %v2744_v41 = vld [vmem:[%s3399_s1 + $0x1c0] sm:$0xff]  }
   0xf   : > { %v2737_v26 = vld [vmem:[%s3399_s1 + $0x30] sm:$0xff]   ;;  %s2973_s28 = scalar_lea.vmem %s3398_s0, %s2382_s18  ;;  %v2741_v30 = vld [vmem:[%s3399_s1 + $0x38] sm:$0xff]   ;;  %v2745_v42 = vld [vmem:[%s3399_s1 + $0x100] sm:$0xff]  }
  0x10   : > { %2388 = vmatpush3.bf16.msra.mxu0 %v2721_v10  ;;  %v2738_v27 = vld [vmem:[%s3399_s1 + $0xb0] sm:$0xff]   ;;  %v2742_v31 = vld [vmem:[%s3399_s1 + $0xb8] sm:$0xff]   ;;  %v178_v32 = vld [vmem:[%s2973_s28] sm:$0xff] }
  0x11   : > { %2428 = vmatpush3.bf16.msra.mxu1 %v2722_v11  ;;  %2389 = vmatprep.subr.bf16.mxu0 %v2723_v12  ;;  %v186_v33 = vld [vmem:[%s2973_s28 + $0x40] sm:$0xff]  ;;  %v179_v34 = vld [vmem:[%s2973_s28 + $0x8] sm:$0xff]  ;;  %v2751_v56 = vld [vmem:[%s3399_s1 + $0x150] sm:$0xff]  }
  0x12   : > { %2429 = vmatprep.subr.bf16.mxu1 %v2724_v13  ;;  %v2188_v35 = vcombine.low %v178_v32, %v186_v33  ;;  %v2189_v36 = vcombine.high %v178_v32, %v186_v33  ;;  %v187_v37 = vld [vmem:[%s2973_s28 + $0x48] sm:$0xff]  ;;  %v2746_v43 = vld [vmem:[%s3399_s1 + $0x180] sm:$0xff]   ;;  %v2752_v57 = vld [vmem:[%s3399_s1 + $0x1d0] sm:$0xff]  }
  0x13   : > { %v2190_v38 = vcombine.low %v179_v34, %v187_v37  ;;  %v2191_v39 = vcombine.high %v179_v34, %v187_v37  ;;  %v2747_v44 = vld [vmem:[%s3399_s1 + $0x148] sm:$0xff]   ;;  %v194_v48 = vld [vmem:[%s2973_s28 + $0x80] sm:$0xff]  ;;  %v2753_v58 = vld [vmem:[%s3399_s1 + $0x110] sm:$0xff]  }
  0x14   : > { %2390 = vmatpush3.bf16.msra.mxu0 %v2725_v14  ;;  %1625 = vmatprep.mubr.bf16.mxu0 %v2189_v36  ;;  %v2748_v45 = vld [vmem:[%s3399_s1 + $0x1c8] sm:$0xff]   ;;  %v202_v49 = vld [vmem:[%s2973_s28 + $0xc0] sm:$0xff]  ;;  %v2754_v59 = vld [vmem:[%s3399_s1 + $0x190] sm:$0xff]  }
  0x15   : > { %2430 = vmatpush3.bf16.msra.mxu1 %v2726_v15  ;;  %2391 = vmatprep.subr.bf16.mxu0 %v2727_v16  ;;  %v2749_v46 = vld [vmem:[%s3399_s1 + $0x108] sm:$0xff]   ;;  %v2205_v50 = vcombine.high %v194_v48, %v202_v49  ;;  %v2204_v53 = vcombine.low %v194_v48, %v202_v49  ;;  %v2755_v60 = vld [vmem:[%s3399_s1 + $0x158] sm:$0xff]   ;;  %v210_v0 = vld [vmem:[%s2973_s28 + $0x100] sm:$0xff] }
  0x16   : > { %2431 = vmatprep.subr.bf16.mxu1 %v2728_v17  ;;  %1690 = vmatprep.mubr.bf16.mxu1 %v2191_v39  ;;  %v2750_v47 = vld [vmem:[%s3399_s1 + $0x188] sm:$0xff]   ;;  %v2756_v61 = vld [vmem:[%s3399_s1 + $0x1d8] sm:$0xff]   ;;  %v218_v1 = vld [vmem:[%s2973_s28 + $0x140] sm:$0xff] }
  0x17   : > { %v195_v51 = vld [vmem:[%s2973_s28 + $0x88] sm:$0xff]  ;;  %v2757_v62 = vld [vmem:[%s3399_s1 + $0x118] sm:$0xff]   ;;  %v2221_v4 = vcombine.high %v210_v0, %v218_v1  ;;  %v2220_v6 = vcombine.low %v210_v0, %v218_v1  ;;  %v2759_v8 = vld [vmem:[%s3399_s1 + $0x160] sm:$0xff]  }
  0x18   : > { %2392 = vmatpush3.bf16.msra.mxu0 %v2729_v18  ;;  %v203_v52 = vld [vmem:[%s2973_s28 + $0xc8] sm:$0xff]  ;;  %v2758_v63 = vld [vmem:[%s3399_s1 + $0x198] sm:$0xff]   ;;  %v2760_v9 = vld [vmem:[%s3399_s1 + $0x1e0] sm:$0xff]  }
  0x19   : > { %2432 = vmatpush3.bf16.msra.mxu1 %v2730_v19  ;;  %2393 = vmatprep.subr.bf16.mxu0 %v2731_v20  ;;  %v2207_v54 = vcombine.high %v195_v51, %v203_v52  ;;  %v2206_v55 = vcombine.low %v195_v51, %v203_v52  ;;  %v211_v2 = vld [vmem:[%s2973_s28 + $0x108] sm:$0xff]  ;;  %v2761_v10 = vld [vmem:[%s3399_s1 + $0x120] sm:$0xff]   ;;  %v180_v32 = vld [vmem:[%s2973_s28 + $0x10] sm:$0xff] }
  0x1a   : > { %2433 = vmatprep.subr.bf16.mxu1 %v2732_v21  ;;  %v219_v3 = vld [vmem:[%s2973_s28 + $0x148] sm:$0xff]  ;;  %v2762_v11 = vld [vmem:[%s3399_s1 + $0x1a0] sm:$0xff]   ;;  %v188_v33 = vld [vmem:[%s2973_s28 + $0x50] sm:$0xff] }
  0x1b   : > { %v2223_v5 = vcombine.high %v211_v2, %v219_v3  ;;  %v2222_v7 = vcombine.low %v211_v2, %v219_v3  ;;  %v2763_v12 = vld [vmem:[%s3399_s1 + $0x168] sm:$0xff]   ;;  %v226_v16 = vld [vmem:[%s2973_s28 + $0x180] sm:$0xff]  ;;  %v2192_v34 = vcombine.low %v180_v32, %v188_v33  ;;  %v181_v36 = vld [vmem:[%s2973_s28 + $0x18] sm:$0xff] }
  0x1c   : > { %2394 = vmatpush3.bf16.msra.mxu0 %v2733_v22  ;;  %v2764_v13 = vld [vmem:[%s3399_s1 + $0x1e8] sm:$0xff]   ;;  %v234_v17 = vld [vmem:[%s2973_s28 + $0x1c0] sm:$0xff]  ;;  %v189_v37 = vld [vmem:[%s2973_s28 + $0x58] sm:$0xff] }
  0x1d   : > { %2434 = vmatpush3.bf16.msra.mxu1 %v2734_v23  ;;  %2395 = vmatprep.subr.bf16.mxu0 %v2735_v24  ;;  %v2765_v14 = vld [vmem:[%s3399_s1 + $0x128] sm:$0xff]   ;;  %v2237_v19 = vcombine.high %v226_v16, %v234_v17  ;;  %v2236_v21 = vcombine.low %v226_v16, %v234_v17  ;;  %v2767_v24 = vld [vmem:[%s3399_s1 + $0x170] sm:$0xff]   ;;  %v2195_v39 = vcombine.high %v181_v36, %v189_v37  ;;  %v205_v51 = vld [vmem:[%s2973_s28 + $0xd8] sm:$0xff] }
  0x1e   : > { %2435 = vmatprep.subr.bf16.mxu1 %v2736_v25  ;;  %v2766_v15 = vld [vmem:[%s3399_s1 + $0x1a8] sm:$0xff]   ;;  %v2768_v25 = vld [vmem:[%s3399_s1 + $0x1f0] sm:$0xff]   ;;  %v213_v2 = vld [vmem:[%s2973_s28 + $0x118] sm:$0xff] }
  0x1f   : > { %v227_v18 = vld [vmem:[%s2973_s28 + $0x188] sm:$0xff]  ;;  %v196_v48 = vld [vmem:[%s2973_s28 + $0x90] sm:$0xff] }
  0x20   : > { %2396 = vmatpush3.bf16.msra.mxu0 %v2737_v26  ;;  %v235_v20 = vld [vmem:[%s2973_s28 + $0x1c8] sm:$0xff]  ;;  %v2769_v26 = vld [vmem:[%s3399_s1 + $0x130] sm:$0xff]  }
  0x21   : > { %2436 = vmatpush3.bf16.msra.mxu1 %v2738_v27  ;;  %2397 = vmatprep.subr.bf16.mxu0 %v2739_v28  ;;  %v2239_v22 = vcombine.high %v227_v18, %v235_v20  ;;  %v2238_v23 = vcombine.low %v227_v18, %v235_v20  ;;  %v2770_v27 = vld [vmem:[%s3399_s1 + $0x1b0] sm:$0xff]   ;;  %v2771_v28 = vld [vmem:[%s3399_s1 + $0x178] sm:$0xff]  }
  0x22   : > { %2437 = vmatprep.subr.bf16.mxu1 %v2740_v29  ;;  %v2772_v29 = vld [vmem:[%s3399_s1 + $0x1f8] sm:$0xff]   ;;  %v204_v49 = vld [vmem:[%s2973_s28 + $0xd0] sm:$0xff] }
  0x23   : > { %v2209_v52 = vcombine.high %v196_v48, %v204_v49  ;;  %v212_v0 = vld [vmem:[%s2973_s28 + $0x110] sm:$0xff]  ;;  %v237_v20 = vld [vmem:[%s2973_s28 + $0x1d8] sm:$0xff] }
  0x24   : > { %2398 = vmatpush3.bf16.msra.mxu0 %v2741_v30  ;;  %v2773_v30 = vld [vmem:[%s3399_s1 + $0x138] sm:$0xff]   ;;  %v220_v1 = vld [vmem:[%s2973_s28 + $0x150] sm:$0xff] }
  0x25   : > { %2438 = vmatpush3.bf16.msra.mxu1 %v2742_v31  ;;  %2463 = vmatprep.subr.bf16.mxu0 %v2743_v40  ;;  %v2774_v31 = vld [vmem:[%s3399_s1 + $0x1b8] sm:$0xff]   ;;  %v2775_v40 = vld [vmem:[%s3399_s1 + $0x240] sm:$0xff]   ;;  %v2225_v3 = vcombine.high %v212_v0, %v220_v1  ;;  %v228_v16 = vld [vmem:[%s2973_s28 + $0x190] sm:$0xff] }
  0x26   : > { %2503 = vmatprep.subr.bf16.mxu1 %v2744_v41  ;;  %v2776_v41 = vld [vmem:[%s3399_s1 + $0x2c0] sm:$0xff]   ;;  %v236_v17 = vld [vmem:[%s2973_s28 + $0x1d0] sm:$0xff] }
  0x27   : > { %1626 = vmatmul.mubr.bf16.vlgmr.msra.gmra.mrb[0].mxu0 %v2188_v35  ;;  %v2193_v35 = vcombine.high %v180_v32, %v188_v33  ;;  %v2241_v18 = vcombine.high %v228_v16, %v236_v17  ;;  %v182_v32 = vld [vmem:[%s2973_s28 + $0x20] sm:$0xff] }
  0x28   : > { %1691 = vmatmul.mubr.bf16.vlgmr.msra.gmra.mrb[0].mxu1 %v2190_v38  ;;  %2464 = vmatpush3.bf16.msra.mxu0 %v2745_v42  ;;  %v2194_v38 = vcombine.low %v181_v36, %v189_v37  ;;  %v2777_v42 = vld [vmem:[%s3399_s1 + $0x200] sm:$0xff]  }
  0x29   : > { %2504 = vmatpush3.bf16.msra.mxu1 %v2746_v43  ;;  %2465 = vmatprep.subr.bf16.mxu0 %v2747_v44  ;;  %v2778_v43 = vld [vmem:[%s3399_s1 + $0x280] sm:$0xff]   ;;  %v2779_v44 = vld [vmem:[%s3399_s1 + $0x248] sm:$0xff]  }
  0x2a   : > { %2505 = vmatprep.subr.bf16.mxu1 %v2748_v45  ;;  %1633 = vmatprep.mubr.bf16.mxu0 %v2205_v50  ;;  %v2780_v45 = vld [vmem:[%s3399_s1 + $0x2c8] sm:$0xff]   ;;  %v197_v50 = vld [vmem:[%s2973_s28 + $0x98] sm:$0xff]  ;;  %v190_v33 = vld [vmem:[%s2973_s28 + $0x60] sm:$0xff] }
  0x2b   : > { %1698 = vmatprep.mubr.bf16.mxu1 %v2207_v54  ;;  %v2208_v54 = vcombine.low %v196_v48, %v204_v49  ;;  %v2196_v36 = vcombine.low %v182_v32, %v190_v33  ;;  %v2197_v37 = vcombine.high %v182_v32, %v190_v33  ;;  %v198_v48 = vld [vmem:[%s2973_s28 + $0xa0] sm:$0xff]  ;;  %v184_v32 = vld [vmem:[%s2973_s28 + $0x30] sm:$0xff] }
  0x2c   : > { %2466 = vmatpush3.bf16.msra.mxu0 %v2749_v46  ;;  %v2781_v46 = vld [vmem:[%s3399_s1 + $0x208] sm:$0xff]   ;;  %v206_v49 = vld [vmem:[%s2973_s28 + $0xe0] sm:$0xff]  ;;  %v192_v33 = vld [vmem:[%s2973_s28 + $0x70] sm:$0xff] }
  0x2d   : > { %2506 = vmatpush3.bf16.msra.mxu1 %v2750_v47  ;;  %2467 = vmatprep.subr.bf16.mxu0 %v2751_v56  ;;  %v2782_v47 = vld [vmem:[%s3399_s1 + $0x288] sm:$0xff]   ;;  %v2783_v56 = vld [vmem:[%s3399_s1 + $0x250] sm:$0xff]  }
  0x2e   : > { %2507 = vmatprep.subr.bf16.mxu1 %v2752_v57  ;;  %v2784_v57 = vld [vmem:[%s3399_s1 + $0x2d0] sm:$0xff]  }
  0x2f   : > { %1634 = vmatmul.mubr.bf16.gmra.mrb[4].mxu0 %v2204_v53  ;;  %v2211_v53 = vcombine.high %v197_v50, %v205_v51 }
  0x30   : > { %1699 = vmatmul.mubr.bf16.gmra.mrb[4].mxu1 %v2206_v55  ;;  %2468 = vmatpush3.bf16.msra.mxu0 %v2753_v58  ;;  %v2210_v55 = vcombine.low %v197_v50, %v205_v51  ;;  %v2785_v58 = vld [vmem:[%s3399_s1 + $0x210] sm:$0xff]   ;;  %v199_v50 = vld [vmem:[%s2973_s28 + $0xa8] sm:$0xff]  ;;  %v2213_v51 = vcombine.high %v198_v48, %v206_v49 }
  0x31   : > { %2508 = vmatpush3.bf16.msra.mxu1 %v2754_v59  ;;  %2469 = vmatprep.subr.bf16.mxu0 %v2755_v60  ;;  %v2786_v59 = vld [vmem:[%s3399_s1 + $0x290] sm:$0xff]   ;;  %v2787_v60 = vld [vmem:[%s3399_s1 + $0x258] sm:$0xff]  }
  0x32   : > { %2509 = vmatprep.subr.bf16.mxu1 %v2756_v61  ;;  %1641 = vmatprep.mubr.bf16.mxu0 %v2221_v4  ;;  %v2788_v61 = vld [vmem:[%s3399_s1 + $0x2d8] sm:$0xff]  }
  0x33   : > { %1706 = vmatprep.mubr.bf16.mxu1 %v2223_v5  ;;  %v221_v4 = vld [vmem:[%s2973_s28 + $0x158] sm:$0xff]  ;;  %v2224_v5 = vcombine.low %v212_v0, %v220_v1  ;;  %v214_v0 = vld [vmem:[%s2973_s28 + $0x120] sm:$0xff] }
  0x34   : > { %2470 = vmatpush3.bf16.msra.mxu0 %v2757_v62  ;;  %v2789_v62 = vld [vmem:[%s3399_s1 + $0x218] sm:$0xff]   ;;  %v222_v1 = vld [vmem:[%s2973_s28 + $0x160] sm:$0xff] }
  0x35   : > { %2510 = vmatpush3.bf16.msra.mxu1 %v2758_v63  ;;  %2471 = vmatprep.subr.bf16.mxu0 %v2759_v8  ;;  %v2790_v63 = vld [vmem:[%s3399_s1 + $0x298] sm:$0xff]   ;;  %v2791_v8 = vld [vmem:[%s3399_s1 + $0x260] sm:$0xff]  }
  0x36   : > { %2511 = vmatprep.subr.bf16.mxu1 %v2760_v9  ;;  %v2792_v9 = vld [vmem:[%s3399_s1 + $0x2e0] sm:$0xff]  }
  0x37   : > { %1642 = vmatmul.mubr.bf16.gmra.mrb[8].mxu0 %v2220_v6  ;;  %v2227_v6 = vcombine.high %v213_v2, %v221_v4 }
  0x38   : > { %1707 = vmatmul.mubr.bf16.gmra.mrb[8].mxu1 %v2222_v7  ;;  %2472 = vmatpush3.bf16.msra.mxu0 %v2761_v10  ;;  %v2226_v7 = vcombine.low %v213_v2, %v221_v4  ;;  %v2793_v10 = vld [vmem:[%s3399_s1 + $0x220] sm:$0xff]   ;;  %v2229_v2 = vcombine.high %v214_v0, %v222_v1  ;;  %v223_v4 = vld [vmem:[%s2973_s28 + $0x168] sm:$0xff] }
  0x39   : > { %2512 = vmatpush3.bf16.msra.mxu1 %v2762_v11  ;;  %2473 = vmatprep.subr.bf16.mxu0 %v2763_v12  ;;  %v2794_v11 = vld [vmem:[%s3399_s1 + $0x2a0] sm:$0xff]   ;;  %v2795_v12 = vld [vmem:[%s3399_s1 + $0x268] sm:$0xff]  }
  0x3a   : > { %2513 = vmatprep.subr.bf16.mxu1 %v2764_v13  ;;  %1649 = vmatprep.mubr.bf16.mxu0 %v2237_v19  ;;  %v2796_v13 = vld [vmem:[%s3399_s1 + $0x2e8] sm:$0xff]   ;;  %v229_v19 = vld [vmem:[%s2973_s28 + $0x198] sm:$0xff] }
  0x3b   : > { %1714 = vmatprep.mubr.bf16.mxu1 %v2239_v22  ;;  %v2243_v22 = vcombine.high %v229_v19, %v237_v20 }
  0x3c   : > { %2474 = vmatpush3.bf16.msra.mxu0 %v2765_v14  ;;  %v2797_v14 = vld [vmem:[%s3399_s1 + $0x228] sm:$0xff]  }
  0x3d   : > { %2514 = vmatpush3.bf16.msra.mxu1 %v2766_v15  ;;  %2475 = vmatprep.subr.bf16.mxu0 %v2767_v24  ;;  %v2798_v15 = vld [vmem:[%s3399_s1 + $0x2a8] sm:$0xff]   ;;  %v2799_v24 = vld [vmem:[%s3399_s1 + $0x270] sm:$0xff]  }
  0x3e   : > { %2515 = vmatprep.subr.bf16.mxu1 %v2768_v25  ;;  %v2800_v25 = vld [vmem:[%s3399_s1 + $0x2f0] sm:$0xff]  }
  0x3f   : > { %1650 = vmatmul.mubr.bf16.gmra.mrb[12].mxu0 %v2236_v21  ;;  %v2240_v21 = vcombine.low %v228_v16, %v236_v17  ;;  %v230_v16 = vld [vmem:[%s2973_s28 + $0x1a0] sm:$0xff] }
  0x40   : > { %1715 = vmatmul.mubr.bf16.gmra.mrb[12].mxu1 %v2238_v23  ;;  %2476 = vmatpush3.bf16.msra.mxu0 %v2769_v26  ;;  %v2242_v23 = vcombine.low %v229_v19, %v237_v20  ;;  %v2801_v26 = vld [vmem:[%s3399_s1 + $0x230] sm:$0xff]   ;;  %v238_v17 = vld [vmem:[%s2973_s28 + $0x1e0] sm:$0xff]  ;;  %v239_v19 = vld [vmem:[%s2973_s28 + $0x1e8] sm:$0xff] }
  0x41   : > { %2516 = vmatpush3.bf16.msra.mxu1 %v2770_v27  ;;  %2477 = vmatprep.subr.bf16.mxu0 %v2771_v28  ;;  %v2802_v27 = vld [vmem:[%s3399_s1 + $0x2b0] sm:$0xff]   ;;  %v2803_v28 = vld [vmem:[%s3399_s1 + $0x278] sm:$0xff]   ;;  %v2245_v20 = vcombine.high %v230_v16, %v238_v17 }
  0x42   : > { %2517 = vmatprep.subr.bf16.mxu1 %v2772_v29  ;;  %1755 = vmatprep.mubr.bf16.mxu0 %v2193_v35  ;;  %v2804_v29 = vld [vmem:[%s3399_s1 + $0x2f8] sm:$0xff]   ;;  %v191_v35 = vld [vmem:[%s2973_s28 + $0x68] sm:$0xff] }
  0x43   : > { %1820 = vmatprep.mubr.bf16.mxu1 %v2195_v39 }
  0x44   : > { %2478 = vmatpush3.bf16.msra.mxu0 %v2773_v30  ;;  %v2805_v30 = vld [vmem:[%s3399_s1 + $0x238] sm:$0xff]  }
  0x45   : > { %2518 = vmatpush3.bf16.msra.mxu1 %v2774_v31  ;;  %2543 = vmatprep.subr.bf16.mxu0 %v2775_v40  ;;  %v2806_v31 = vld [vmem:[%s3399_s1 + $0x2b8] sm:$0xff]   ;;  %v2807_v40 = vld [vmem:[%s3399_s1 + $0x340] sm:$0xff]  }
  0x46   : > { %2583 = vmatprep.subr.bf16.mxu1 %v2776_v41  ;;  %v2808_v41 = vld [vmem:[%s3399_s1 + $0x3c0] sm:$0xff]  }
  0x47   : > { %1756 = vmatmul.mubr.bf16.vlgmr.msra.gmra.mrb[16].mxu0 %v2192_v34  ;;  %v183_v34 = vld [vmem:[%s2973_s28 + $0x28] sm:$0xff] }
  0x48   : > { %1821 = vmatmul.mubr.bf16.vlgmr.msra.gmra.mrb[16].mxu1 %v2194_v38  ;;  %2544 = vmatpush3.bf16.msra.mxu0 %v2777_v42  ;;  %v2198_v38 = vcombine.low %v183_v34, %v191_v35  ;;  %v2199_v39 = vcombine.high %v183_v34, %v191_v35  ;;  %v2809_v42 = vld [vmem:[%s3399_s1 + $0x300] sm:$0xff]   ;;  %v185_v34 = vld [vmem:[%s2973_s28 + $0x38] sm:$0xff]  ;;  %v2200_v35 = vcombine.low %v184_v32, %v192_v33 }
  0x49   : > { %2584 = vmatpush3.bf16.msra.mxu1 %v2778_v43  ;;  %2545 = vmatprep.subr.bf16.mxu0 %v2779_v44  ;;  %v2810_v43 = vld [vmem:[%s3399_s1 + $0x380] sm:$0xff]   ;;  %v2811_v44 = vld [vmem:[%s3399_s1 + $0x348] sm:$0xff]  }
  0x4a   : > { %2585 = vmatprep.subr.bf16.mxu1 %v2780_v45  ;;  %1763 = vmatprep.mubr.bf16.mxu0 %v2209_v52  ;;  %v2812_v45 = vld [vmem:[%s3399_s1 + $0x3c8] sm:$0xff]  }
  0x4b   : > { %1828 = vmatprep.mubr.bf16.mxu1 %v2211_v53  ;;  %v207_v52 = vld [vmem:[%s2973_s28 + $0xe8] sm:$0xff]  ;;  %v2212_v53 = vcombine.low %v198_v48, %v206_v49  ;;  %v217_v48 = vld [vmem:[%s2973_s28 + $0x138] sm:$0xff] }
  0x4c   : > { %2546 = vmatpush3.bf16.msra.mxu0 %v2781_v46  ;;  %v2813_v46 = vld [vmem:[%s3399_s1 + $0x308] sm:$0xff]   ;;  %v225_v49 = vld [vmem:[%s2973_s28 + $0x178] sm:$0xff] }
  0x4d   : > { %2586 = vmatpush3.bf16.msra.mxu1 %v2782_v47  ;;  %2547 = vmatprep.subr.bf16.mxu0 %v2783_v56  ;;  %v2814_v47 = vld [vmem:[%s3399_s1 + $0x388] sm:$0xff]   ;;  %v2815_v56 = vld [vmem:[%s3399_s1 + $0x350] sm:$0xff]  }
  0x4e   : > { %2587 = vmatprep.subr.bf16.mxu1 %v2784_v57  ;;  %v2816_v57 = vld [vmem:[%s3399_s1 + $0x3d0] sm:$0xff]  }
  0x4f   : > { %1764 = vmatmul.mubr.bf16.gmra.mrb[20].mxu0 %v2208_v54  ;;  %v2215_v54 = vcombine.high %v199_v50, %v207_v52 }
  0x50   : > { %1829 = vmatmul.mubr.bf16.gmra.mrb[20].mxu1 %v2210_v55  ;;  %2548 = vmatpush3.bf16.msra.mxu0 %v2785_v58  ;;  %v2214_v55 = vcombine.low %v199_v50, %v207_v52  ;;  %v2817_v58 = vld [vmem:[%s3399_s1 + $0x310] sm:$0xff]  }
  0x51   : > { %2588 = vmatpush3.bf16.msra.mxu1 %v2786_v59  ;;  %2549 = vmatprep.subr.bf16.mxu0 %v2787_v60  ;;  %v2818_v59 = vld [vmem:[%s3399_s1 + $0x390] sm:$0xff]   ;;  %v2819_v60 = vld [vmem:[%s3399_s1 + $0x358] sm:$0xff]  }
  0x52   : > { %2589 = vmatprep.subr.bf16.mxu1 %v2788_v61  ;;  %1771 = vmatprep.mubr.bf16.mxu0 %v2225_v3  ;;  %v2820_v61 = vld [vmem:[%s3399_s1 + $0x3d8] sm:$0xff]   ;;  %v215_v3 = vld [vmem:[%s2973_s28 + $0x128] sm:$0xff] }
  0x53   : > { %1836 = vmatprep.mubr.bf16.mxu1 %v2227_v6  ;;  %v2231_v6 = vcombine.high %v215_v3, %v223_v4 }
  0x54   : > { %2550 = vmatpush3.bf16.msra.mxu0 %v2789_v62  ;;  %v2821_v62 = vld [vmem:[%s3399_s1 + $0x318] sm:$0xff]  }
  0x55   : > { %2590 = vmatpush3.bf16.msra.mxu1 %v2790_v63  ;;  %2551 = vmatprep.subr.bf16.mxu0 %v2791_v8  ;;  %v2822_v63 = vld [vmem:[%s3399_s1 + $0x398] sm:$0xff]   ;;  %v2823_v8 = vld [vmem:[%s3399_s1 + $0x360] sm:$0xff]  }
  0x56   : > { %2591 = vmatprep.subr.bf16.mxu1 %v2792_v9  ;;  %v2824_v9 = vld [vmem:[%s3399_s1 + $0x3e0] sm:$0xff]  }
  0x57   : > { %1772 = vmatmul.mubr.bf16.gmra.mrb[24].mxu0 %v2224_v5  ;;  %v2228_v5 = vcombine.low %v214_v0, %v222_v1 }
  0x58   : > { %1837 = vmatmul.mubr.bf16.gmra.mrb[24].mxu1 %v2226_v7  ;;  %2552 = vmatpush3.bf16.msra.mxu0 %v2793_v10  ;;  %v2230_v7 = vcombine.low %v215_v3, %v223_v4  ;;  %v2825_v10 = vld [vmem:[%s3399_s1 + $0x320] sm:$0xff]  }
  0x59   : > { %2592 = vmatpush3.bf16.msra.mxu1 %v2794_v11  ;;  %2553 = vmatprep.subr.bf16.mxu0 %v2795_v12  ;;  %v2826_v11 = vld [vmem:[%s3399_s1 + $0x3a0] sm:$0xff]   ;;  %v2827_v12 = vld [vmem:[%s3399_s1 + $0x368] sm:$0xff]  }
  0x5a   : > { %2593 = vmatprep.subr.bf16.mxu1 %v2796_v13  ;;  %1779 = vmatprep.mubr.bf16.mxu0 %v2241_v18  ;;  %v2828_v13 = vld [vmem:[%s3399_s1 + $0x3e8] sm:$0xff]  }
  0x5b   : > { %1844 = vmatprep.mubr.bf16.mxu1 %v2243_v22  ;;  %v231_v18 = vld [vmem:[%s2973_s28 + $0x1a8] sm:$0xff]  ;;  %v2244_v22 = vcombine.low %v230_v16, %v238_v17 }
  0x5c   : > { %2554 = vmatpush3.bf16.msra.mxu0 %v2797_v14  ;;  %v2829_v14 = vld [vmem:[%s3399_s1 + $0x328] sm:$0xff]  }
  0x5d   : > { %2594 = vmatpush3.bf16.msra.mxu1 %v2798_v15  ;;  %2555 = vmatprep.subr.bf16.mxu0 %v2799_v24  ;;  %v2830_v15 = vld [vmem:[%s3399_s1 + $0x3a8] sm:$0xff]   ;;  %v2831_v24 = vld [vmem:[%s3399_s1 + $0x370] sm:$0xff]  }
  0x5e   : > { %2595 = vmatprep.subr.bf16.mxu1 %v2800_v25  ;;  %v2832_v25 = vld [vmem:[%s3399_s1 + $0x3f0] sm:$0xff]  }
  0x5f   : > { %1780 = vmatmul.mubr.bf16.gmra.mrb[28].mxu0 %v2240_v21  ;;  %v2247_v21 = vcombine.high %v231_v18, %v239_v19 }
  0x60   : > { %1845 = vmatmul.mubr.bf16.gmra.mrb[28].mxu1 %v2242_v23  ;;  %2556 = vmatpush3.bf16.msra.mxu0 %v2801_v26  ;;  %v2246_v23 = vcombine.low %v231_v18, %v239_v19  ;;  %v2833_v26 = vld [vmem:[%s3399_s1 + $0x330] sm:$0xff]  }
  0x61   : > { %2596 = vmatpush3.bf16.msra.mxu1 %v2802_v27  ;;  %2557 = vmatprep.subr.bf16.mxu0 %v2803_v28  ;;  %v2834_v27 = vld [vmem:[%s3399_s1 + $0x3b0] sm:$0xff]   ;;  %v2835_v28 = vld [vmem:[%s3399_s1 + $0x378] sm:$0xff]  }
  0x62   : > { %2597 = vmatprep.subr.bf16.mxu1 %v2804_v29  ;;  %1885 = vmatprep.mubr.bf16.mxu0 %v2197_v37  ;;  %v2836_v29 = vld [vmem:[%s3399_s1 + $0x3f8] sm:$0xff]  }
  0x63   : > { %1950 = vmatprep.mubr.bf16.mxu1 %v2199_v39  ;;  %v193_v37 = vld [vmem:[%s2973_s28 + $0x78] sm:$0xff]  ;;  %v208_v39 = vld [vmem:[%s2973_s28 + $0xf0] sm:$0xff] }
  0x64   : > { %2558 = vmatpush3.bf16.msra.mxu0 %v2805_v30  ;;  %v2837_v30 = vld [vmem:[%s3399_s1 + $0x338] sm:$0xff]  }
  0x65   : > { %2598 = vmatpush3.bf16.msra.mxu1 %v2806_v31  ;;  %2623 = vmatprep.subr.bf16.mxu0 %v2807_v40  ;;  %v2838_v31 = vld [vmem:[%s3399_s1 + $0x3b8] sm:$0xff]   ;;  %v2202_v40 = vcombine.low %v185_v34, %v193_v37 }
  0x66   : > { %2663 = vmatprep.subr.bf16.mxu1 %v2808_v41  ;;  %v2203_v41 = vcombine.high %v185_v34, %v193_v37 }
  0x67   : > { %1886 = vmatmul.mubr.bf16.vlgmr.msra.gmra.mrb[32].mxu0 %v2196_v36  ;;  %v2201_v36 = vcombine.high %v184_v32, %v192_v33 }
  0x68   : > { %1951 = vmatmul.mubr.bf16.vlgmr.msra.gmra.mrb[32].mxu1 %v2198_v38  ;;  %2624 = vmatpush3.bf16.msra.mxu0 %v2809_v42  ;;  %v200_v38 = vld [vmem:[%s2973_s28 + $0xb0] sm:$0xff] }
  0x69   : > { %2664 = vmatpush3.bf16.msra.mxu1 %v2810_v43  ;;  %2625 = vmatprep.subr.bf16.mxu0 %v2811_v44  ;;  %v2217_v42 = vcombine.high %v200_v38, %v208_v39  ;;  %v201_v43 = vld [vmem:[%s2973_s28 + $0xb8] sm:$0xff]  ;;  %v2216_v50 = vcombine.low %v200_v38, %v208_v39 }
  0x6a   : > { %2665 = vmatprep.subr.bf16.mxu1 %v2812_v45  ;;  %1893 = vmatprep.mubr.bf16.mxu0 %v2213_v51  ;;  %v209_v44 = vld [vmem:[%s2973_s28 + $0xf8] sm:$0xff] }
  0x6b   : > { %1958 = vmatprep.mubr.bf16.mxu1 %v2215_v54  ;;  %v2219_v45 = vcombine.high %v201_v43, %v209_v44  ;;  %v2218_v51 = vcombine.low %v201_v43, %v209_v44  ;;  %v232_v54 = vld [vmem:[%s2973_s28 + $0x1b0] sm:$0xff] }
  0x6c   : > { %2626 = vmatpush3.bf16.msra.mxu0 %v2813_v46  ;;  %v216_v46 = vld [vmem:[%s2973_s28 + $0x130] sm:$0xff] }
  0x6d   : > { %2666 = vmatpush3.bf16.msra.mxu1 %v2814_v47  ;;  %2627 = vmatprep.subr.bf16.mxu0 %v2815_v56  ;;  %v224_v47 = vld [vmem:[%s2973_s28 + $0x170] sm:$0xff]  ;;  %v233_v56 = vld [vmem:[%s2973_s28 + $0x1b8] sm:$0xff] }
  0x6e   : > { %2667 = vmatprep.subr.bf16.mxu1 %v2816_v57  ;;  %v2233_v52 = vcombine.high %v216_v46, %v224_v47  ;;  %v241_v57 = vld [vmem:[%s2973_s28 + $0x1f8] sm:$0xff] }
  0x6f   : > { %1894 = vmatmul.mubr.bf16.gmra.mrb[36].mxu0 %v2212_v53  ;;  %v2235_v53 = vcombine.high %v217_v48, %v225_v49 }
  0x70   : > { %1959 = vmatmul.mubr.bf16.gmra.mrb[36].mxu1 %v2214_v55  ;;  %2628 = vmatpush3.bf16.msra.mxu0 %v2817_v58  ;;  %v240_v55 = vld [vmem:[%s2973_s28 + $0x1f0] sm:$0xff]  ;;  %v2232_v58 = vcombine.low %v216_v46, %v224_v47  ;;  %s2186_s28 = sshll.u32 %s3403_s21, 3 }
  0x71   : > { %2668 = vmatpush3.bf16.msra.mxu1 %v2818_v59  ;;  %2629 = vmatprep.subr.bf16.mxu0 %v2819_v60  ;;  %v2234_v59 = vcombine.low %v217_v48, %v225_v49  ;;  %v2249_v60 = vcombine.high %v232_v54, %v240_v55  ;;  %s3378_s9 = scalar_lea.vmem %s3401_s3, %s2186_s28 }
  0x72   : > { %2669 = vmatprep.subr.bf16.mxu1 %v2820_v61  ;;  %1901 = vmatprep.mubr.bf16.mxu0 %v2229_v2  ;;  %v2251_v61 = vcombine.high %v233_v56, %v241_v57  ;;  %v2187_v2 = vld [vmem:[%s3400_s2] ss:$0 sm:$0xff] }
  0x73   : > { %1966 = vmatprep.mubr.bf16.mxu1 %v2231_v6 }
  0x74   : > { %2630 = vmatpush3.bf16.msra.mxu0 %v2821_v62  ;;  %v2248_v62 = vcombine.low %v232_v54, %v240_v55 }
  0x75   : > { %2670 = vmatpush3.bf16.msra.mxu1 %v2822_v63  ;;  %2631 = vmatprep.subr.bf16.mxu0 %v2823_v8  ;;  %v2250_v63 = vcombine.low %v233_v56, %v241_v57 }
  0x76   : > { %2671 = vmatprep.subr.bf16.mxu1 %v2824_v9 }
  0x77   : > { %1902 = vmatmul.mubr.bf16.gmra.mrb[40].mxu0 %v2228_v5 }
  0x78   : > { %1967 = vmatmul.mubr.bf16.gmra.mrb[40].mxu1 %v2230_v7  ;;  %2632 = vmatpush3.bf16.msra.mxu0 %v2825_v10 }
  0x79   : > { %2672 = vmatpush3.bf16.msra.mxu1 %v2826_v11  ;;  %2633 = vmatprep.subr.bf16.mxu0 %v2827_v12 }
  0x7a   : > { %2673 = vmatprep.subr.bf16.mxu1 %v2828_v13  ;;  %1909 = vmatprep.mubr.bf16.mxu0 %v2245_v20 }
  0x7b   : > { %1974 = vmatprep.mubr.bf16.mxu1 %v2247_v21 }
  0x7c   : > { %2634 = vmatpush3.bf16.msra.mxu0 %v2829_v14 }
  0x7d   : > { %2674 = vmatpush3.bf16.msra.mxu1 %v2830_v15  ;;  %2635 = vmatprep.subr.bf16.mxu0 %v2831_v24 }
  0x7e   : > { %2675 = vmatprep.subr.bf16.mxu1 %v2832_v25 }
  0x7f   : > { %1910 = vmatmul.mubr.bf16.gmra.mrb[44].mxu0 %v2244_v22 }
  0x80   : > { %1975 = vmatmul.mubr.bf16.gmra.mrb[44].mxu1 %v2246_v23  ;;  %2636 = vmatpush3.bf16.msra.mxu0 %v2833_v26 }
  0x81   : > { %2676 = vmatpush3.bf16.msra.mxu1 %v2834_v27  ;;  %2637 = vmatprep.subr.bf16.mxu0 %v2835_v28 }
  0x82   : > { %2677 = vmatprep.subr.bf16.mxu1 %v2836_v29  ;;  %2015 = vmatprep.mubr.bf16.mxu0 %v2201_v36 }
  0x83   : > { %2080 = vmatprep.mubr.bf16.mxu1 %v2203_v41 }
  0x84   : > { %2638 = vmatpush3.bf16.msra.mxu0 %v2837_v30 }
  0x85   : > { %2678 = vmatpush3.bf16.msra.mxu1 %v2838_v31 }
  0x87   : > { %2016 = vmatmul.mubr.bf16.vlgmr.msra.gmra.mrb[48].mxu0 %v2200_v35 }
  0x88   : > { %2081 = vmatmul.mubr.bf16.vlgmr.msra.gmra.mrb[48].mxu1 %v2202_v40  ;;  %2023 = vmatprep.mubr.bf16.mxu0 %v2217_v42 }
  0x89   : > { %2088 = vmatprep.mubr.bf16.mxu1 %v2219_v45 }
  0x8f   : > { %2024 = vmatmul.mubr.bf16.gmra.mrb[52].mxu0 %v2216_v50 }
  0x90   : > { %2089 = vmatmul.mubr.bf16.gmra.mrb[52].mxu1 %v2218_v51  ;;  %2031 = vmatprep.mubr.bf16.mxu0 %v2233_v52 }
  0x91   : > { %2096 = vmatprep.mubr.bf16.mxu1 %v2235_v53 }
  0x97   : > { %2032 = vmatmul.mubr.bf16.gmra.mrb[56].mxu0 %v2232_v58 }
  0x98   : > { %2097 = vmatmul.mubr.bf16.gmra.mrb[56].mxu1 %v2234_v59  ;;  %2039 = vmatprep.mubr.bf16.mxu0 %v2249_v60 }
  0x99   : > { %2104 = vmatprep.mubr.bf16.mxu1 %v2251_v61 }
  0x9f   : > { %2040 = vmatmul.mubr.bf16.gmra.mrb[60].mxu0 %v2248_v62 }
  0xa0   : > { %2105 = vmatmul.mubr.bf16.gmra.mrb[60].mxu1 %v2250_v63 }
  0xfa   : > { %v2399_v0 = vpop.f32.mrb[0].mxu0 }
  0xfb   : > { %v2439_v1 = vpop.f32.mrb[0].mxu1  ;;  %v2400_v3 = vpop.f32.mrb[1].mxu0 }
  0xfc   : > { %v2401_v4 = vadd.f32 %v2400_v3, %v2399_v0  ;;  %v2440_v5 = vpop.f32.mrb[1].mxu1  ;;  %v2402_v6 = vpop.f32.mrb[2].mxu0 }
  0xfd   : > { %v2441_v7 = vadd.f32 %v2440_v5, %v2439_v1  ;;  %v2442_v8 = vpop.f32.mrb[2].mxu1  ;;  %v2403_v9 = vpop.f32.mrb[3].mxu0 }
  0xfe   : > { %v1628_v10 = vadd.f32 %v2401_v4, %v2187_v2  ;;  %v2404_v11 = vadd.f32 %v2403_v9, %v2402_v6  ;;  %v2443_v12 = vpop.f32.mrb[3].mxu1 }
  0xff   : > { %v2444_v13 = vadd.f32 %v2443_v12, %v2442_v8 }
 0x100   : > { %v1693_v14 = vadd.f32 %v2441_v7, %v1628_v10  ;;  %v1631_v15 = vadd.f32 %v2404_v11, %v2187_v2 }
 0x102   : > { %v3336_v16 = vadd.f32 %v2444_v13, %v1631_v15  ;;  %v2405_v17 = vpop.f32.mrb[4].mxu0 }
 0x103   : > { %v2445_v18 = vpop.f32.mrb[4].mxu1  ;;  %v2406_v19 = vpop.f32.mrb[5].mxu0 }
 0x104   : > { %v2407_v20 = vadd.f32 %v2406_v19, %v2405_v17  ;;  %v2446_v21 = vpop.f32.mrb[5].mxu1  ;;  %v2408_v22 = vpop.f32.mrb[6].mxu0 }
 0x105   : > { %v2447_v23 = vadd.f32 %v2446_v21, %v2445_v18  ;;  %v2448_v24 = vpop.f32.mrb[6].mxu1  ;;  %v2409_v25 = vpop.f32.mrb[7].mxu0 }
 0x106   : > { %v1636_v26 = vadd.f32 %v2407_v20, %v2187_v2  ;;  %v2410_v27 = vadd.f32 %v2409_v25, %v2408_v22  ;;  %v2449_v28 = vpop.f32.mrb[7].mxu1 }
 0x107   : > { %v2450_v29 = vadd.f32 %v2449_v28, %v2448_v24 }
 0x108   : > { %v1701_v30 = vadd.f32 %v2447_v23, %v1636_v26  ;;  %v1639_v31 = vadd.f32 %v2410_v27, %v2187_v2 }
 0x10a   : > { %v3338_v32 = vadd.f32 %v2450_v29, %v1639_v31  ;;  %v2411_v33 = vpop.f32.mrb[8].mxu0 }
 0x10b   : > { %v2451_v34 = vpop.f32.mrb[8].mxu1  ;;  %v2412_v35 = vpop.f32.mrb[9].mxu0 }
 0x10c   : > { %v2452_v36 = vpop.f32.mrb[9].mxu1  ;;  %v2413_v37 = vadd.f32 %v2412_v35, %v2411_v33  ;;  %v2414_v39 = vpop.f32.mrb[10].mxu0 }
 0x10d   : > { %v2453_v38 = vadd.f32 %v2452_v36, %v2451_v34  ;;  %v2454_v40 = vpop.f32.mrb[10].mxu1  ;;  %v2415_v41 = vpop.f32.mrb[11].mxu0 }
 0x10e   : > { %v2455_v42 = vpop.f32.mrb[11].mxu1  ;;  %v1644_v43 = vadd.f32 %v2413_v37, %v2187_v2  ;;  %v2416_v44 = vadd.f32 %v2415_v41, %v2414_v39 }
 0x10f   : > { %v2456_v45 = vadd.f32 %v2455_v42, %v2454_v40 }
 0x110   : > { %v1709_v46 = vadd.f32 %v2453_v38, %v1644_v43  ;;  %v1647_v47 = vadd.f32 %v2416_v44, %v2187_v2 }
 0x112   : > { %v3340_v48 = vadd.f32 %v2456_v45, %v1647_v47  ;;  %v2417_v49 = vpop.f32.mrb[12].mxu0 }
 0x113   : > { %v2457_v50 = vpop.f32.mrb[12].mxu1  ;;  %v2418_v51 = vpop.f32.mrb[13].mxu0 }
 0x114   : > { %v2419_v52 = vadd.f32 %v2418_v51, %v2417_v49  ;;  %v2458_v53 = vpop.f32.mrb[13].mxu1  ;;  %v2420_v54 = vpop.f32.mrb[14].mxu0 }
 0x115   : > { %v2459_v55 = vadd.f32 %v2458_v53, %v2457_v50  ;;  %v2460_v56 = vpop.f32.mrb[14].mxu1  ;;  %v2421_v57 = vpop.f32.mrb[15].mxu0 }
 0x116   : > { %v1652_v58 = vadd.f32 %v2419_v52, %v2187_v2  ;;  %v2422_v59 = vadd.f32 %v2421_v57, %v2420_v54  ;;  %v2461_v60 = vpop.f32.mrb[15].mxu1 }
 0x117   : > { %v2462_v61 = vadd.f32 %v2461_v60, %v2460_v56 }
 0x118   : > { %v1717_v62 = vadd.f32 %v2459_v55, %v1652_v58  ;;  %v1655_v63 = vadd.f32 %v2422_v59, %v2187_v2 }
 0x11a   : > { %v3342_v0 = vadd.f32 %v2462_v61, %v1655_v63  ;;  %v2479_v1 = vpop.f32.mrb[16].mxu0 }
 0x11b   : > { %v2519_v3 = vpop.f32.mrb[16].mxu1  ;;  %v2480_v4 = vpop.f32.mrb[17].mxu0 }
 0x11c   : > { %v2481_v5 = vadd.f32 %v2480_v4, %v2479_v1  ;;  %v2520_v6 = vpop.f32.mrb[17].mxu1  ;;  %v2482_v7 = vpop.f32.mrb[18].mxu0 }
 0x11d   : > { %v2521_v8 = vadd.f32 %v2520_v6, %v2519_v3  ;;  %v2522_v9 = vpop.f32.mrb[18].mxu1  ;;  %v2483_v10 = vpop.f32.mrb[19].mxu0 }
 0x11e   : > { %v1758_v11 = vadd.f32 %v2481_v5, %v1693_v14  ;;  %v2484_v12 = vadd.f32 %v2483_v10, %v2482_v7  ;;  %v2523_v13 = vpop.f32.mrb[19].mxu1 }
 0x11f   : > { %v2524_v15 = vadd.f32 %v2523_v13, %v2522_v9 }
 0x120   : > { %v1823_v17 = vadd.f32 %v2521_v8, %v1758_v11  ;;  %v1761_v18 = vadd.f32 %v2484_v12, %v3336_v16 }
 0x122   : > { %v3345_v19 = vadd.f32 %v2524_v15, %v1761_v18  ;;  %v2485_v2 = vpop.f32.mrb[20].mxu0 }
 0x123   : > { %v2525_v20 = vpop.f32.mrb[20].mxu1  ;;  %v2486_v21 = vpop.f32.mrb[21].mxu0 }
 0x124   : > { %v2526_v22 = vpop.f32.mrb[21].mxu1  ;;  %v2487_v23 = vadd.f32 %v2486_v21, %v2485_v2  ;;  %v2488_v25 = vpop.f32.mrb[22].mxu0 }
 0x125   : > { %v2527_v24 = vadd.f32 %v2526_v22, %v2525_v20  ;;  %v2528_v26 = vpop.f32.mrb[22].mxu1  ;;  %v2489_v27 = vpop.f32.mrb[23].mxu0 }
 0x126   : > { %v2529_v28 = vpop.f32.mrb[23].mxu1  ;;  %v1766_v29 = vadd.f32 %v2487_v23, %v1701_v30  ;;  %v2490_v14 = vadd.f32 %v2489_v27, %v2488_v25 }
 0x127   : > { %v2530_v31 = vadd.f32 %v2529_v28, %v2528_v26 }
 0x128   : > { %v1831_v33 = vadd.f32 %v2527_v24, %v1766_v29  ;;  %v1769_v34 = vadd.f32 %v2490_v14, %v3338_v32 }
 0x12a   : > { %v3348_v35 = vadd.f32 %v2530_v31, %v1769_v34  ;;  %v2491_v16 = vpop.f32.mrb[24].mxu0 }
 0x12b   : > { %v2531_v36 = vpop.f32.mrb[24].mxu1  ;;  %v2492_v37 = vpop.f32.mrb[25].mxu0 }
 0x12c   : > { %v2493_v38 = vadd.f32 %v2492_v37, %v2491_v16  ;;  %v2532_v39 = vpop.f32.mrb[25].mxu1  ;;  %v2494_v40 = vpop.f32.mrb[26].mxu0 }
 0x12d   : > { %v2533_v41 = vadd.f32 %v2532_v39, %v2531_v36  ;;  %v2534_v42 = vpop.f32.mrb[26].mxu1  ;;  %v2495_v43 = vpop.f32.mrb[27].mxu0 }
 0x12e   : > { %v1774_v44 = vadd.f32 %v2493_v38, %v1709_v46  ;;  %v2496_v45 = vadd.f32 %v2495_v43, %v2494_v40  ;;  %v2535_v47 = vpop.f32.mrb[27].mxu1 }
 0x12f   : > { %v2536_v30 = vadd.f32 %v2535_v47, %v2534_v42 }
 0x130   : > { %v1839_v49 = vadd.f32 %v2533_v41, %v1774_v44  ;;  %v1777_v50 = vadd.f32 %v2496_v45, %v3340_v48 }
 0x132   : > { %v3351_v51 = vadd.f32 %v2536_v30, %v1777_v50  ;;  %v2497_v32 = vpop.f32.mrb[28].mxu0 }
 0x133   : > { %v2537_v52 = vpop.f32.mrb[28].mxu1  ;;  %v2498_v53 = vpop.f32.mrb[29].mxu0 }
 0x134   : > { %v2499_v54 = vadd.f32 %v2498_v53, %v2497_v32  ;;  %v2538_v55 = vpop.f32.mrb[29].mxu1  ;;  %v2500_v56 = vpop.f32.mrb[30].mxu0 }
 0x135   : > { %v2539_v57 = vadd.f32 %v2538_v55, %v2537_v52  ;;  %v2540_v58 = vpop.f32.mrb[30].mxu1  ;;  %v2501_v59 = vpop.f32.mrb[31].mxu0 }
 0x136   : > { %v1782_v60 = vadd.f32 %v2499_v54, %v1717_v62  ;;  %v2502_v61 = vadd.f32 %v2501_v59, %v2500_v56  ;;  %v2541_v46 = vpop.f32.mrb[31].mxu1 }
 0x137   : > { %v2542_v63 = vadd.f32 %v2541_v46, %v2540_v58 }
 0x138   : > { %v1847_v1 = vadd.f32 %v2539_v57, %v1782_v60  ;;  %v1785_v3 = vadd.f32 %v2502_v61, %v3342_v0 }
 0x13a   : > { %v3354_v4 = vadd.f32 %v2542_v63, %v1785_v3  ;;  %v2559_v48 = vpop.f32.mrb[32].mxu0 }
 0x13b   : > { %v2599_v5 = vpop.f32.mrb[32].mxu1  ;;  %v2560_v6 = vpop.f32.mrb[33].mxu0 }
 0x13c   : > { %v2600_v7 = vpop.f32.mrb[33].mxu1  ;;  %v2561_v8 = vadd.f32 %v2560_v6, %v2559_v48  ;;  %v2562_v10 = vpop.f32.mrb[34].mxu0 }
 0x13d   : > { %v2601_v9 = vadd.f32 %v2600_v7, %v2599_v5  ;;  %v2602_v11 = vpop.f32.mrb[34].mxu1  ;;  %v2563_v12 = vpop.f32.mrb[35].mxu0 }
 0x13e   : > { %v2603_v13 = vpop.f32.mrb[35].mxu1  ;;  %v1888_v15 = vadd.f32 %v2561_v8, %v1823_v17  ;;  %v2564_v62 = vadd.f32 %v2563_v12, %v2562_v10 }
 0x13f   : > { %v2604_v18 = vadd.f32 %v2603_v13, %v2602_v11 }
 0x140   : > { %v1953_v2 = vadd.f32 %v2601_v9, %v1888_v15  ;;  %v1891_v20 = vadd.f32 %v2564_v62, %v3345_v19 }
 0x142   : > { %v3357_v21 = vadd.f32 %v2604_v18, %v1891_v20  ;;  %v2565_v0 = vpop.f32.mrb[36].mxu0 }
 0x143   : > { %v2605_v22 = vpop.f32.mrb[36].mxu1  ;;  %v2566_v23 = vpop.f32.mrb[37].mxu0 }
 0x144   : > { %v2567_v24 = vadd.f32 %v2566_v23, %v2565_v0  ;;  %v2606_v25 = vpop.f32.mrb[37].mxu1  ;;  %v2568_v26 = vpop.f32.mrb[38].mxu0 }
 0x145   : > { %v2607_v27 = vadd.f32 %v2606_v25, %v2605_v22  ;;  %v2608_v28 = vpop.f32.mrb[38].mxu1  ;;  %v2569_v29 = vpop.f32.mrb[39].mxu0 }
 0x146   : > { %v1896_v14 = vadd.f32 %v2567_v24, %v1831_v33  ;;  %v2570_v31 = vadd.f32 %v2569_v29, %v2568_v26  ;;  %v2609_v34 = vpop.f32.mrb[39].mxu1 }
 0x147   : > { %v2610_v17 = vadd.f32 %v2609_v34, %v2608_v28 }
 0x148   : > { %v3359_v16 = vadd.f32 %v2607_v27, %v1896_v14  ;;  %v1899_v36 = vadd.f32 %v2570_v31, %v3348_v35 }
 0x14a   : > { %v3362_v19 = vadd.f32 %v2610_v17, %v1899_v36  ;;  %v2571_v37 = vpop.f32.mrb[40].mxu0 }
 0x14b   : > { %v2611_v38 = vpop.f32.mrb[40].mxu1  ;;  %v2572_v39 = vpop.f32.mrb[41].mxu0 }
 0x14c   : > { %v2573_v40 = vadd.f32 %v2572_v39, %v2571_v37  ;;  %v2612_v41 = vpop.f32.mrb[41].mxu1  ;;  %v2574_v42 = vpop.f32.mrb[42].mxu0 }
 0x14d   : > { %v2613_v43 = vadd.f32 %v2612_v41, %v2611_v38  ;;  %v2614_v44 = vpop.f32.mrb[42].mxu1  ;;  %v2575_v45 = vpop.f32.mrb[43].mxu0 }
 0x14e   : > { %v1904_v47 = vadd.f32 %v2573_v40, %v1839_v49  ;;  %v2576_v33 = vadd.f32 %v2575_v45, %v2574_v42  ;;  %v2615_v30 = vpop.f32.mrb[43].mxu1 }
 0x14f   : > { %v2616_v50 = vadd.f32 %v2615_v30, %v2614_v44 }
 0x150   : > { %v3364_v32 = vadd.f32 %v2613_v43, %v1904_v47  ;;  %v1907_v52 = vadd.f32 %v2576_v33, %v3351_v51 }
 0x152   : > { %v3367_v35 = vadd.f32 %v2616_v50, %v1907_v52  ;;  %v2577_v53 = vpop.f32.mrb[44].mxu0 }
 0x153   : > { %v2617_v54 = vpop.f32.mrb[44].mxu1  ;;  %v2578_v55 = vpop.f32.mrb[45].mxu0 }
 0x154   : > { %v2618_v56 = vpop.f32.mrb[45].mxu1  ;;  %v2579_v57 = vadd.f32 %v2578_v55, %v2577_v53  ;;  %v2580_v59 = vpop.f32.mrb[46].mxu0 }
 0x155   : > { %v2619_v58 = vadd.f32 %v2618_v56, %v2617_v54  ;;  %v2620_v60 = vpop.f32.mrb[46].mxu1  ;;  %v2581_v61 = vpop.f32.mrb[47].mxu0 }
 0x156   : > { %v2621_v49 = vpop.f32.mrb[47].mxu1  ;;  %v1912_v46 = vadd.f32 %v2579_v57, %v1847_v1  ;;  %v2582_v63 = vadd.f32 %v2581_v61, %v2580_v59 }
 0x157   : > { %v2622_v3 = vadd.f32 %v2621_v49, %v2620_v60 }
 0x158   : > { %v3369_v48 = vadd.f32 %v2619_v58, %v1912_v46  ;;  %v1915_v51 = vadd.f32 %v2582_v63, %v3354_v4 }
 0x15a   : > { %v3372_v5 = vadd.f32 %v2622_v3, %v1915_v51  ;;  %v2639_v6 = vpop.f32.mrb[48].mxu0 }
 0x15b   : > { %v2679_v7 = vpop.f32.mrb[48].mxu1  ;;  %v2640_v8 = vpop.f32.mrb[49].mxu0 }
 0x15c   : > { %v2641_v9 = vadd.f32 %v2640_v8, %v2639_v6  ;;  %v2680_v10 = vpop.f32.mrb[49].mxu1  ;;  %v2642_v11 = vpop.f32.mrb[50].mxu0 }
 0x15d   : > { %v2681_v12 = vadd.f32 %v2680_v10, %v2679_v7  ;;  %v2682_v13 = vpop.f32.mrb[50].mxu1  ;;  %v2643_v15 = vpop.f32.mrb[51].mxu0 }
 0x15e   : > { %v2018_v62 = vadd.f32 %v2641_v9, %v1953_v2  ;;  %v2644_v1 = vadd.f32 %v2643_v15, %v2642_v11  ;;  %v2683_v18 = vpop.f32.mrb[51].mxu1 }
 0x15f   : > { %v2684_v4 = vadd.f32 %v2683_v18, %v2682_v13 }
 0x160   : > { %v2083_v20 = vadd.f32 %v2681_v12, %v2018_v62  ;;  %v2021_v0 = vadd.f32 %v2644_v1, %v3357_v21 }
 0x162   : > { %2113 = vst [vmem:[%s3378_s9] sm:$0xff] %v2083_v20  ;;  %v2086_v22 = vadd.f32 %v2684_v4, %v2021_v0  ;;  %v2645_v23 = vpop.f32.mrb[52].mxu0 }
 0x163   : > { %v2685_v24 = vpop.f32.mrb[52].mxu1  ;;  %v2646_v25 = vpop.f32.mrb[53].mxu0 }
 0x164   : > { %2114 = vst [vmem:[%s3378_s9 + $0x8] sm:$0xff] %v2086_v22  ;;  %v2647_v2 = vadd.f32 %v2646_v25, %v2645_v23  ;;  %v2686_v26 = vpop.f32.mrb[53].mxu1  ;;  %v2648_v27 = vpop.f32.mrb[54].mxu0 }
 0x165   : > { %v2687_v28 = vadd.f32 %v2686_v26, %v2685_v24  ;;  %v2688_v29 = vpop.f32.mrb[54].mxu1  ;;  %v2649_v14 = vpop.f32.mrb[55].mxu0 }
 0x166   : > { %v2026_v31 = vadd.f32 %v2647_v2, %v3359_v16  ;;  %v2650_v34 = vadd.f32 %v2649_v14, %v2648_v27  ;;  %v2689_v17 = vpop.f32.mrb[55].mxu1 }
 0x167   : > { %v2690_v36 = vadd.f32 %v2689_v17, %v2688_v29 }
 0x168   : > { %v2091_v21 = vadd.f32 %v2687_v28, %v2026_v31  ;;  %v2029_v37 = vadd.f32 %v2650_v34, %v3362_v19 }
 0x16a   : > { %2115 = vst [vmem:[%s3378_s9 + $0x10] sm:$0xff] %v2091_v21  ;;  %v2094_v38 = vadd.f32 %v2690_v36, %v2029_v37  ;;  %v2651_v39 = vpop.f32.mrb[56].mxu0 }
 0x16b   : > { %v2691_v40 = vpop.f32.mrb[56].mxu1  ;;  %v2652_v41 = vpop.f32.mrb[57].mxu0 }
 0x16c   : > { %2116 = vst [vmem:[%s3378_s9 + $0x18] sm:$0xff] %v2094_v38  ;;  %v2653_v42 = vadd.f32 %v2652_v41, %v2651_v39  ;;  %v2692_v43 = vpop.f32.mrb[57].mxu1  ;;  %v2654_v44 = vpop.f32.mrb[58].mxu0 }
 0x16d   : > { %v2693_v45 = vadd.f32 %v2692_v43, %v2691_v40  ;;  %v2694_v47 = vpop.f32.mrb[58].mxu1  ;;  %v2655_v16 = vpop.f32.mrb[59].mxu0 }
 0x16e   : > { %v2034_v33 = vadd.f32 %v2653_v42, %v3364_v32  ;;  %v2656_v30 = vadd.f32 %v2655_v16, %v2654_v44  ;;  %v2695_v50 = vpop.f32.mrb[59].mxu1 }
 0x16f   : > { %v2696_v52 = vadd.f32 %v2695_v50, %v2694_v47 }
 0x170   : > { %v2099_v19 = vadd.f32 %v2693_v45, %v2034_v33  ;;  %v2037_v53 = vadd.f32 %v2656_v30, %v3367_v35 }
 0x172   : > { %2117 = vst [vmem:[%s3378_s9 + $0x20] sm:$0xff] %v2099_v19  ;;  %v2102_v54 = vadd.f32 %v2696_v52, %v2037_v53  ;;  %v2657_v55 = vpop.f32.mrb[60].mxu0 }
 0x173   : > { %v2697_v56 = vpop.f32.mrb[60].mxu1  ;;  %v2658_v57 = vpop.f32.mrb[61].mxu0 }
 0x174   : > { %2118 = vst [vmem:[%s3378_s9 + $0x28] sm:$0xff] %v2102_v54  ;;  %v2659_v58 = vadd.f32 %v2658_v57, %v2657_v55  ;;  %v2698_v59 = vpop.f32.mrb[61].mxu1  ;;  %v2660_v60 = vpop.f32.mrb[62].mxu0 }
 0x175   : > { %v2699_v61 = vadd.f32 %v2698_v59, %v2697_v56  ;;  %v2700_v49 = vpop.f32.mrb[62].mxu1  ;;  %v2661_v32 = vpop.f32.mrb[63].mxu0 }
 0x176   : > { %v2042_v46 = vadd.f32 %v2659_v58, %v3369_v48  ;;  %v2662_v63 = vadd.f32 %v2661_v32, %v2660_v60  ;;  %v2701_v3 = vpop.f32.mrb[63].mxu1 }
 0x177   : > { %v2702_v51 = vadd.f32 %v2701_v3, %v2700_v49 }
 0x178   : > { %v2107_v35 = vadd.f32 %v2699_v61, %v2042_v46  ;;  %v2045_v6 = vadd.f32 %v2662_v63, %v3372_v5 }
 0x17a   : > { %2119 = vst [vmem:[%s3378_s9 + $0x30] sm:$0xff] %v2107_v35  ;;  %v2110_v7 = vadd.f32 %v2702_v51, %v2045_v6 }
 0x17c   : > { %2120 = vst [vmem:[%s3378_s9 + $0x38] sm:$0xff] %v2110_v7 }
 0x17d PF: > { %s13_s12 = sadd.s32 1, %s2845_s12  }
 0x17e   : > { %p10_p4 = scmp.ge.s32.totalorder %s13_s12, 4  }
 0x180   :  { %12 = sbr.rel (!%p10_p4) target bundleno = 1 (0x1), region = 62 }

// kernel: nlayer_discriminator_forward.18
= control target key start
LH: loop header
LB: loop body
LE: loop exit
PB: predicated region body
PF: predicated region fallthrough
CT: control target
= control target key end

     0   :  { %s356_s6 = smov 0   ;;  %s358_s7 = smov 0   ;;  %s393_s0 = inlined_call_operand.vmem [shape: f32[2,16,128], index: 0, kind: input, shape index: {}]   ;;  %s394_s1 = inlined_call_operand.vmem [shape: bf16[2,16,128], index: 1, kind: output, shape index: {}]  }
   0x1   :  { %s360_s8 = smov 0  }
   0x2 LB: > { %s23_s9 = sadd.s32 1, %s340_s7  ;;  %p278_p0 = scmp.ge.s32.totalorder %s344_s8, 1  ;;  %s344_s8 = sphi %s360_s8, %s11_s8   ;;  %s340_s7 = sphi %s358_s7, %s396_s7   ;;  %s336_s6 = sphi %s356_s6, %s395_s6  }
   0x3   : > { %p25_p1 = scmp.ge.s32.totalorder %s23_s9, 2  ;;  %p106_p2 = scmp.lt.s32.totalorder %s344_s8, 3 }
   0x5   : > { %s398_s9 = smov (%p25_p1, %s23_s9), 0  ;;  %p107_p3 = pnand %p278_p0, %p106_p2 }
   0x6   : > { %p132_p4 = scmp.lt.s32.totalorder (!%p107_p3), %s336_s6, 1 }
   0x7   : > { %110 = sbr.rel (%p107_p3) target bundleno = 75 (0x4b), region = 24 }
   0xe   : > { %s400_s6 = smov (!%p132_p4, %s336_s6), 1 }
   0xf   : > { %s287_s10 = sshll.u32 %s400_s6, 4  ;;  %s288_s14 = sshll.u32 %s400_s6, 3 }
  0x10   : > { %s139_s13 = scalar_lea.vmem %s393_s0, %s287_s10  ;;  %s147_s17 = scalar_lea.vmem %s394_s1, %s288_s14 }
  0x11   : > { %v148_v0 = vld [vmem:[%s139_s13] sm:$0xff]  ;;  %v149_v1 = vld [vmem:[%s139_s13 + $0x8] sm:$0xff] }
  0x12   : > { %v150_v2 = vadd.f32 %v149_v1, %v148_v0 }
  0x14   : > { %v151_v3 = vrot.slane %v150_v2, 4 }
  0x16   : > { %v152_v4 = vadd.f32 %v151_v3, %v150_v2 }
  0x18   : > { %v153_v5 = vrot.slane %v152_v4, 2 }
  0x1a   : > { %v154_v6 = vadd.f32 %v153_v5, %v152_v4 }
  0x1c   : > { %v155_v7 = vrot.slane %v154_v6, 1 }
  0x1e   : > { %v156_v8 = vadd.f32 %v155_v7, %v154_v6 }
  0x20   : > { %v158_v9 = vmul.f32 0.0625, %v156_v8 }
  0x22   : > { %v159_v10 = vsub.f32 %v148_v0, %v158_v9  ;;  %v160_v11 = vsub.f32 %v149_v1, %v158_v9 }
  0x24   : > { %v161_v12 = vmul.f32 %v159_v10, %v159_v10  ;;  %v162_v13 = vmul.f32 %v160_v11, %v160_v11 }
  0x26   : > { %v163_v14 = vadd.f32 %v162_v13, %v161_v12 }
  0x28   : > { %v164_v15 = vrot.slane %v163_v14, 4 }
  0x2a   : > { %v165_v16 = vadd.f32 %v164_v15, %v163_v14 }
  0x2c   : > { %v166_v17 = vrot.slane %v165_v16, 2 }
  0x2e   : > { %v167_v18 = vadd.f32 %v166_v17, %v165_v16 }
  0x30   : > { %v168_v19 = vrot.slane %v167_v18, 1 }
  0x32   : > { %v169_v20 = vadd.f32 %v168_v19, %v167_v18 }
  0x34   : > { %v170_v21 = vmul.f32 0.0625, %v169_v20 }
  0x36   : > { %v171_v22 = vadd.f32 1e-05, %v170_v21 }
  0x38   : > { %320 = vrsqrt.f32 %v171_v22 }
  0x42   : > { %v321_v23 = vpop.eup %320 }
  0x43   : > { %v173_v24 = vmul.f32 %v321_v23, %v159_v10  ;;  %v174_v25 = vmul.f32 %v321_v23, %v160_v11 }
  0x45   : > { %vm175_vm0 = vcmp.ge.f32.partialorder %v173_v24, 0.0  ;;  %vm176_vm1 = vcmp.ge.f32.partialorder %v174_v25, 0.0  ;;  %v177_v26 = vmul.f32 0.2, %v173_v24  ;;  %v178_v27 = vmul.f32 0.2, %v174_v25 }
  0x47   : > { %v179_v28 = vsel %vm175_vm0, %v173_v24, %v177_v26  ;;  %v180_v29 = vsel %vm176_vm1, %v174_v25, %v178_v27 }
  0x48   : > { %v294_v30 = vpack.c.bf16 %v180_v29, %v179_v28 }
  0x4a   : > { %295 = vst [vmem:[%s147_s17] sm:$0xff] %v294_v30  }
  0x4b PF: > { %s11_s8 = sadd.s32 1, %s344_s8   ;;  %s395_s6 = smov %s340_s7 }
  0x4c   : > { %p8_p5 = scmp.ge.s32.totalorder %s11_s8, 4   ;;  %s396_s7 = smov %s398_s9 }
  0x4e   :  { %10 = sbr.rel (!%p8_p5) target bundleno = 2 (0x2), region = 54 }

// kernel: nlayer_discriminator_forward.17
= control target key start
LH: loop header
LB: loop body
LE: loop exit
PB: predicated region body
PF: predicated region fallthrough
CT: control target
= control target key end

     0   :  { %s2666_s1 = inlined_call_operand.vmem [shape: bf16[2048,128], index: 1, kind: input, shape index: {}]   ;;  %s2667_s0 = inlined_call_operand.vmem [shape: bf16[32,2048], index: 0, kind: input, shape index: {}]   ;;  %s2668_s2 = inlined_call_operand.vmem [shape: f32[1,128], index: 2, kind: input, shape index: {}]   ;;  %s2669_s3 = inlined_call_operand.vmem [shape: f32[32,128], index: 3, kind: output, shape index: {}]  }
   0x1   :  { %v2023_v0 = vld [vmem:[%s2666_s1 + $0x40] sm:$0xff]   ;;  %v2027_v4 = vld [vmem:[%s2666_s1 + $0x48] sm:$0xff]   ;;  %v2031_v8 = vld [vmem:[%s2666_s1 + $0x50] sm:$0xff]  }
   0x2   :  { %v2024_v1 = vld [vmem:[%s2666_s1 + $0xc0] sm:$0xff]   ;;  %1799 = vmatprep.subr.bf16.mxu0 %v2023_v0  ;;  %v2028_v5 = vld [vmem:[%s2666_s1 + $0xc8] sm:$0xff]   ;;  %v2032_v9 = vld [vmem:[%s2666_s1 + $0xd0] sm:$0xff]  }
   0x3   :  { %v2025_v2 = vld [vmem:[%s2666_s1] sm:$0xff]   ;;  %1827 = vmatprep.subr.bf16.mxu1 %v2024_v1  ;;  %v2029_v6 = vld [vmem:[%s2666_s1 + $0x8] sm:$0xff]   ;;  %v2033_v10 = vld [vmem:[%s2666_s1 + $0x10] sm:$0xff]  }
   0x4   :  { %v2026_v3 = vld [vmem:[%s2666_s1 + $0x80] sm:$0xff]   ;;  %1800 = vmatpush3.bf16.msra.mxu0 %v2025_v2  ;;  %v2030_v7 = vld [vmem:[%s2666_s1 + $0x88] sm:$0xff]   ;;  %v2034_v11 = vld [vmem:[%s2666_s1 + $0x90] sm:$0xff]  }
   0x5   :  { %1828 = vmatpush3.bf16.msra.mxu1 %v2026_v3  ;;  %1801 = vmatprep.subr.bf16.mxu0 %v2027_v4  ;;  %v2035_v12 = vld [vmem:[%s2666_s1 + $0x58] sm:$0xff]   ;;  %v2039_v16 = vld [vmem:[%s2666_s1 + $0x60] sm:$0xff]   ;;  %v2043_v20 = vld [vmem:[%s2666_s1 + $0x68] sm:$0xff]  }
   0x6   :  { %1829 = vmatprep.subr.bf16.mxu1 %v2028_v5  ;;  %v2036_v13 = vld [vmem:[%s2666_s1 + $0xd8] sm:$0xff]   ;;  %v2040_v17 = vld [vmem:[%s2666_s1 + $0xe0] sm:$0xff]   ;;  %v2044_v21 = vld [vmem:[%s2666_s1 + $0xe8] sm:$0xff]  }
   0x7   :  { %v2037_v14 = vld [vmem:[%s2666_s1 + $0x18] sm:$0xff]   ;;  %v2041_v18 = vld [vmem:[%s2666_s1 + $0x20] sm:$0xff]   ;;  %v2045_v22 = vld [vmem:[%s2666_s1 + $0x28] sm:$0xff]  }
   0x8   :  { %1802 = vmatpush3.bf16.msra.mxu0 %v2029_v6  ;;  %v2038_v15 = vld [vmem:[%s2666_s1 + $0x98] sm:$0xff]   ;;  %v2042_v19 = vld [vmem:[%s2666_s1 + $0xa0] sm:$0xff]   ;;  %v2046_v23 = vld [vmem:[%s2666_s1 + $0xa8] sm:$0xff]  }
   0x9   :  { %1830 = vmatpush3.bf16.msra.mxu1 %v2030_v7  ;;  %1803 = vmatprep.subr.bf16.mxu0 %v2031_v8  ;;  %v2047_v24 = vld [vmem:[%s2666_s1 + $0x70] sm:$0xff]   ;;  %v2051_v28 = vld [vmem:[%s2666_s1 + $0x78] sm:$0xff]   ;;  %v15_v32 = vld [vmem:[%s2667_s0] sm:$0xff] }
   0xa   :  { %1831 = vmatprep.subr.bf16.mxu1 %v2032_v9  ;;  %v2048_v25 = vld [vmem:[%s2666_s1 + $0xf0] sm:$0xff]   ;;  %v2052_v29 = vld [vmem:[%s2666_s1 + $0xf8] sm:$0xff]   ;;  %v23_v33 = vld [vmem:[%s2667_s0 + $0x40] sm:$0xff] }
   0xb   :  { %v2049_v26 = vld [vmem:[%s2666_s1 + $0x30] sm:$0xff]   ;;  %v2053_v30 = vld [vmem:[%s2666_s1 + $0x38] sm:$0xff]   ;;  %v16_v34 = vld [vmem:[%s2667_s0 + $0x8] sm:$0xff]  ;;  %v1639_v35 = vcombine.low %v15_v32, %v23_v33  ;;  %v1640_v36 = vcombine.high %v15_v32, %v23_v33 }
   0xc   :  { %1804 = vmatpush3.bf16.msra.mxu0 %v2033_v10  ;;  %v2050_v27 = vld [vmem:[%s2666_s1 + $0xb0] sm:$0xff]   ;;  %v2054_v31 = vld [vmem:[%s2666_s1 + $0xb8] sm:$0xff]   ;;  %v24_v37 = vld [vmem:[%s2667_s0 + $0x48] sm:$0xff] }
   0xd   :  { %1832 = vmatpush3.bf16.msra.mxu1 %v2034_v11  ;;  %1805 = vmatprep.subr.bf16.mxu0 %v2035_v12  ;;  %v1641_v38 = vcombine.low %v16_v34, %v24_v37  ;;  %v1642_v39 = vcombine.high %v16_v34, %v24_v37  ;;  %v2055_v40 = vld [vmem:[%s2666_s1 + $0x140] sm:$0xff]   ;;  %v2059_v44 = vld [vmem:[%s2666_s1 + $0x148] sm:$0xff]   ;;  %v2063_v48 = vld [vmem:[%s2666_s1 + $0x150] sm:$0xff]  }
   0xe   :  { %1833 = vmatprep.subr.bf16.mxu1 %v2036_v13  ;;  %1270 = vmatprep.mubr.bf16.mxu0 %v1640_v36  ;;  %v2056_v41 = vld [vmem:[%s2666_s1 + $0x1c0] sm:$0xff]   ;;  %v2060_v45 = vld [vmem:[%s2666_s1 + $0x1c8] sm:$0xff]   ;;  %v2064_v49 = vld [vmem:[%s2666_s1 + $0x1d0] sm:$0xff]  }
   0xf   :  { %1319 = vmatprep.mubr.bf16.mxu1 %v1642_v39  ;;  %v2057_v42 = vld [vmem:[%s2666_s1 + $0x100] sm:$0xff]   ;;  %v2061_v46 = vld [vmem:[%s2666_s1 + $0x108] sm:$0xff]   ;;  %v2065_v50 = vld [vmem:[%s2666_s1 + $0x110] sm:$0xff]  }
  0x10   :  { %1806 = vmatpush3.bf16.msra.mxu0 %v2037_v14  ;;  %v2058_v43 = vld [vmem:[%s2666_s1 + $0x180] sm:$0xff]   ;;  %v2062_v47 = vld [vmem:[%s2666_s1 + $0x188] sm:$0xff]   ;;  %v2066_v51 = vld [vmem:[%s2666_s1 + $0x190] sm:$0xff]  }
  0x11   :  { %1834 = vmatpush3.bf16.msra.mxu1 %v2038_v15  ;;  %1807 = vmatprep.subr.bf16.mxu0 %v2039_v16  ;;  %v2067_v52 = vld [vmem:[%s2666_s1 + $0x158] sm:$0xff]   ;;  %v2071_v56 = vld [vmem:[%s2666_s1 + $0x160] sm:$0xff]   ;;  %v2075_v60 = vld [vmem:[%s2666_s1 + $0x168] sm:$0xff]  }
  0x12   :  { %1835 = vmatprep.subr.bf16.mxu1 %v2040_v17  ;;  %v2068_v53 = vld [vmem:[%s2666_s1 + $0x1d8] sm:$0xff]   ;;  %v2072_v57 = vld [vmem:[%s2666_s1 + $0x1e0] sm:$0xff]   ;;  %v2076_v61 = vld [vmem:[%s2666_s1 + $0x1e8] sm:$0xff]  }
  0x13   :  { %v2069_v54 = vld [vmem:[%s2666_s1 + $0x118] sm:$0xff]   ;;  %v2073_v58 = vld [vmem:[%s2666_s1 + $0x120] sm:$0xff]   ;;  %v2077_v1 = vld [vmem:[%s2666_s1 + $0x128] sm:$0xff]  }
  0x14   :  { %1808 = vmatpush3.bf16.msra.mxu0 %v2041_v18  ;;  %v2070_v55 = vld [vmem:[%s2666_s1 + $0x198] sm:$0xff]   ;;  %v2074_v59 = vld [vmem:[%s2666_s1 + $0x1a0] sm:$0xff]   ;;  %v2078_v3 = vld [vmem:[%s2666_s1 + $0x1a8] sm:$0xff]  }
  0x15   :  { %1836 = vmatpush3.bf16.msra.mxu1 %v2042_v19  ;;  %1809 = vmatprep.subr.bf16.mxu0 %v2043_v20  ;;  %v31_v62 = vld [vmem:[%s2667_s0 + $0x80] sm:$0xff]  ;;  %v32_v4 = vld [vmem:[%s2667_s0 + $0x88] sm:$0xff]  ;;  %v2079_v8 = vld [vmem:[%s2666_s1 + $0x170] sm:$0xff]  }
  0x16   :  { %1837 = vmatprep.subr.bf16.mxu1 %v2044_v21  ;;  %v39_v63 = vld [vmem:[%s2667_s0 + $0xc0] sm:$0xff]  ;;  %v40_v5 = vld [vmem:[%s2667_s0 + $0xc8] sm:$0xff]  ;;  %v2080_v9 = vld [vmem:[%s2666_s1 + $0x1f0] sm:$0xff]  }
  0x17   :  { %v1656_v0 = vcombine.high %v31_v62, %v39_v63  ;;  %v1655_v2 = vcombine.low %v31_v62, %v39_v63  ;;  %v1658_v6 = vcombine.high %v32_v4, %v40_v5  ;;  %v1657_v7 = vcombine.low %v32_v4, %v40_v5  ;;  %v2081_v10 = vld [vmem:[%s2666_s1 + $0x130] sm:$0xff]   ;;  %v2083_v12 = vld [vmem:[%s2666_s1 + $0x178] sm:$0xff]   ;;  %v20_v4 = vld [vmem:[%s2667_s0 + $0x28] sm:$0xff] }
  0x18   :  { %1810 = vmatpush3.bf16.msra.mxu0 %v2045_v22  ;;  %v2082_v11 = vld [vmem:[%s2666_s1 + $0x1b0] sm:$0xff]   ;;  %v2084_v13 = vld [vmem:[%s2666_s1 + $0x1f8] sm:$0xff]   ;;  %v28_v5 = vld [vmem:[%s2667_s0 + $0x68] sm:$0xff] }
  0x19   :  { %1838 = vmatpush3.bf16.msra.mxu1 %v2046_v23  ;;  %1811 = vmatprep.subr.bf16.mxu0 %v2047_v24  ;;  %v2085_v14 = vld [vmem:[%s2666_s1 + $0x138] sm:$0xff]   ;;  %v17_v16 = vld [vmem:[%s2667_s0 + $0x10] sm:$0xff]  ;;  %v2087_v24 = vld [vmem:[%s2666_s1 + $0x240] sm:$0xff]  }
  0x1a   :  { %1839 = vmatprep.subr.bf16.mxu1 %v2048_v25  ;;  %v2086_v15 = vld [vmem:[%s2666_s1 + $0x1b8] sm:$0xff]   ;;  %v25_v17 = vld [vmem:[%s2667_s0 + $0x50] sm:$0xff]  ;;  %v2088_v25 = vld [vmem:[%s2666_s1 + $0x2c0] sm:$0xff]  }
  0x1b   :  { %v18_v18 = vld [vmem:[%s2667_s0 + $0x18] sm:$0xff]  ;;  %v1643_v20 = vcombine.low %v17_v16, %v25_v17  ;;  %v1644_v21 = vcombine.high %v17_v16, %v25_v17  ;;  %v33_v32 = vld [vmem:[%s2667_s0 + $0x90] sm:$0xff]  ;;  %v35_v16 = vld [vmem:[%s2667_s0 + $0xa0] sm:$0xff] }
  0x1c   :  { %1812 = vmatpush3.bf16.msra.mxu0 %v2049_v26  ;;  %v26_v19 = vld [vmem:[%s2667_s0 + $0x58] sm:$0xff]  ;;  %v2089_v26 = vld [vmem:[%s2666_s1 + $0x200] sm:$0xff]   ;;  %v41_v33 = vld [vmem:[%s2667_s0 + $0xd0] sm:$0xff] }
  0x1d   :  { %1840 = vmatpush3.bf16.msra.mxu1 %v2050_v27  ;;  %1813 = vmatprep.subr.bf16.mxu0 %v2051_v28  ;;  %v1645_v22 = vcombine.low %v18_v18, %v26_v19  ;;  %v1646_v23 = vcombine.high %v18_v18, %v26_v19  ;;  %v2090_v27 = vld [vmem:[%s2666_s1 + $0x280] sm:$0xff]   ;;  %v2091_v28 = vld [vmem:[%s2666_s1 + $0x248] sm:$0xff]   ;;  %v1660_v34 = vcombine.high %v33_v32, %v41_v33  ;;  %v2095_v36 = vld [vmem:[%s2666_s1 + $0x250] sm:$0xff]  }
  0x1e   :  { %1841 = vmatprep.subr.bf16.mxu1 %v2052_v29  ;;  %v2092_v29 = vld [vmem:[%s2666_s1 + $0x2c8] sm:$0xff]   ;;  %v2096_v37 = vld [vmem:[%s2666_s1 + $0x2d0] sm:$0xff]   ;;  %v42_v39 = vld [vmem:[%s2667_s0 + $0xd8] sm:$0xff] }
  0x1f   :  { %v2117_v62 = vld [vmem:[%s2666_s1 + $0x238] sm:$0xff]   ;;  %v43_v17 = vld [vmem:[%s2667_s0 + $0xe0] sm:$0xff] }
  0x20   :  { %1814 = vmatpush3.bf16.msra.mxu0 %v2053_v30  ;;  %v2093_v30 = vld [vmem:[%s2666_s1 + $0x208] sm:$0xff]   ;;  %v2118_v63 = vld [vmem:[%s2666_s1 + $0x2b8] sm:$0xff]   ;;  %v1664_v18 = vcombine.high %v35_v16, %v43_v17  ;;  %v1663_v19 = vcombine.low %v35_v16, %v43_v17 }
  0x21   :  { %1842 = vmatpush3.bf16.msra.mxu1 %v2054_v31  ;;  %1855 = vmatprep.subr.bf16.mxu0 %v2055_v40  ;;  %v2094_v31 = vld [vmem:[%s2666_s1 + $0x288] sm:$0xff]  }
  0x22   :  { %1883 = vmatprep.subr.bf16.mxu1 %v2056_v41  ;;  %v2097_v41 = vld [vmem:[%s2666_s1 + $0x210] sm:$0xff]  }
  0x23   :  { %1271 = vmatmul.mubr.bf16.vlgmr.msra.gmra.mrb[0].mxu0 %v1639_v35  ;;  %v1659_v35 = vcombine.low %v33_v32, %v41_v33  ;;  %v2135_v32 = vld [vmem:[%s2666_s1 + $0x360] sm:$0xff]  }
  0x24   :  { %1320 = vmatmul.mubr.bf16.vlgmr.msra.gmra.mrb[0].mxu1 %v1641_v38  ;;  %1856 = vmatpush3.bf16.msra.mxu0 %v2057_v42  ;;  %v34_v38 = vld [vmem:[%s2667_s0 + $0x98] sm:$0xff]  ;;  %v2136_v33 = vld [vmem:[%s2666_s1 + $0x3e0] sm:$0xff]  }
  0x25   :  { %1884 = vmatpush3.bf16.msra.mxu1 %v2058_v43  ;;  %1857 = vmatprep.subr.bf16.mxu0 %v2059_v44  ;;  %v1662_v40 = vcombine.high %v34_v38, %v42_v39  ;;  %v1661_v42 = vcombine.low %v34_v38, %v42_v39  ;;  %v2098_v43 = vld [vmem:[%s2666_s1 + $0x290] sm:$0xff]   ;;  %v2099_v44 = vld [vmem:[%s2666_s1 + $0x258] sm:$0xff]   ;;  %v2141_v38 = vld [vmem:[%s2666_s1 + $0x328] sm:$0xff]  }
  0x26   :  { %1885 = vmatprep.subr.bf16.mxu1 %v2060_v45  ;;  %1278 = vmatprep.mubr.bf16.mxu0 %v1656_v0  ;;  %v2100_v45 = vld [vmem:[%s2666_s1 + $0x2d8] sm:$0xff]   ;;  %v19_v0 = vld [vmem:[%s2667_s0 + $0x20] sm:$0xff]  ;;  %v2142_v39 = vld [vmem:[%s2666_s1 + $0x3a8] sm:$0xff]  }
  0x27   :  { %1327 = vmatprep.mubr.bf16.mxu1 %v1658_v6  ;;  %v1649_v6 = vcombine.low %v20_v4, %v28_v5 }
  0x28   :  { %1858 = vmatpush3.bf16.msra.mxu0 %v2061_v46  ;;  %v2101_v46 = vld [vmem:[%s2666_s1 + $0x218] sm:$0xff]  }
  0x29   :  { %1886 = vmatpush3.bf16.msra.mxu1 %v2062_v47  ;;  %1859 = vmatprep.subr.bf16.mxu0 %v2063_v48  ;;  %v2102_v47 = vld [vmem:[%s2666_s1 + $0x298] sm:$0xff]   ;;  %v2103_v48 = vld [vmem:[%s2666_s1 + $0x260] sm:$0xff]  }
  0x2a   :  { %1887 = vmatprep.subr.bf16.mxu1 %v2064_v49  ;;  %v2104_v49 = vld [vmem:[%s2666_s1 + $0x2e0] sm:$0xff]  }
  0x2b   :  { %1279 = vmatmul.mubr.bf16.gmra.mrb[4].mxu0 %v1655_v2 }
  0x2c   :  { %1860 = vmatpush3.bf16.msra.mxu0 %v2065_v50  ;;  %1328 = vmatmul.mubr.bf16.gmra.mrb[4].mxu1 %v1657_v7  ;;  %v2105_v50 = vld [vmem:[%s2666_s1 + $0x220] sm:$0xff]   ;;  %v1650_v7 = vcombine.high %v20_v4, %v28_v5 }
  0x2d   :  { %1888 = vmatpush3.bf16.msra.mxu1 %v2066_v51  ;;  %1861 = vmatprep.subr.bf16.mxu0 %v2067_v52  ;;  %v2106_v51 = vld [vmem:[%s2666_s1 + $0x2a0] sm:$0xff]   ;;  %v2107_v52 = vld [vmem:[%s2666_s1 + $0x268] sm:$0xff]  }
  0x2e   :  { %1889 = vmatprep.subr.bf16.mxu1 %v2068_v53  ;;  %1368 = vmatprep.mubr.bf16.mxu0 %v1644_v21  ;;  %v2108_v53 = vld [vmem:[%s2666_s1 + $0x2e8] sm:$0xff]   ;;  %v2128_v21 = vld [vmem:[%s2666_s1 + $0x3d0] sm:$0xff]  }
  0x2f   :  { %1417 = vmatprep.mubr.bf16.mxu1 %v1646_v23  ;;  %v44_v23 = vld [vmem:[%s2667_s0 + $0xe8] sm:$0xff] }
  0x30   :  { %1862 = vmatpush3.bf16.msra.mxu0 %v2069_v54  ;;  %v2109_v54 = vld [vmem:[%s2666_s1 + $0x228] sm:$0xff]  }
  0x31   :  { %1890 = vmatpush3.bf16.msra.mxu1 %v2070_v55  ;;  %1863 = vmatprep.subr.bf16.mxu0 %v2071_v56  ;;  %v2110_v55 = vld [vmem:[%s2666_s1 + $0x2a8] sm:$0xff]   ;;  %v2111_v56 = vld [vmem:[%s2666_s1 + $0x270] sm:$0xff]  }
  0x32   :  { %1891 = vmatprep.subr.bf16.mxu1 %v2072_v57  ;;  %v2112_v57 = vld [vmem:[%s2666_s1 + $0x2f0] sm:$0xff]  }
  0x34   :  { %1864 = vmatpush3.bf16.msra.mxu0 %v2073_v58  ;;  %v2113_v58 = vld [vmem:[%s2666_s1 + $0x230] sm:$0xff]  }
  0x35   :  { %1892 = vmatpush3.bf16.msra.mxu1 %v2074_v59  ;;  %1865 = vmatprep.subr.bf16.mxu0 %v2075_v60  ;;  %v2114_v59 = vld [vmem:[%s2666_s1 + $0x2b0] sm:$0xff]   ;;  %v2115_v60 = vld [vmem:[%s2666_s1 + $0x278] sm:$0xff]  }
  0x36   :  { %1893 = vmatprep.subr.bf16.mxu1 %v2076_v61  ;;  %v2116_v61 = vld [vmem:[%s2666_s1 + $0x2f8] sm:$0xff]  }
  0x38   :  { %1866 = vmatpush3.bf16.msra.mxu0 %v2077_v1  ;;  %v27_v1 = vld [vmem:[%s2667_s0 + $0x60] sm:$0xff] }
  0x39   :  { %1894 = vmatpush3.bf16.msra.mxu1 %v2078_v3  ;;  %1867 = vmatprep.subr.bf16.mxu0 %v2079_v8  ;;  %v1647_v2 = vcombine.low %v19_v0, %v27_v1  ;;  %v1648_v3 = vcombine.high %v19_v0, %v27_v1  ;;  %v2119_v8 = vld [vmem:[%s2666_s1 + $0x340] sm:$0xff]  }
  0x3a   :  { %1895 = vmatprep.subr.bf16.mxu1 %v2080_v9  ;;  %v2120_v9 = vld [vmem:[%s2666_s1 + $0x3c0] sm:$0xff]  }
  0x3c   :  { %1868 = vmatpush3.bf16.msra.mxu0 %v2081_v10  ;;  %v2121_v10 = vld [vmem:[%s2666_s1 + $0x300] sm:$0xff]  }
  0x3d   :  { %1896 = vmatpush3.bf16.msra.mxu1 %v2082_v11  ;;  %1869 = vmatprep.subr.bf16.mxu0 %v2083_v12  ;;  %v2122_v11 = vld [vmem:[%s2666_s1 + $0x380] sm:$0xff]   ;;  %v2123_v12 = vld [vmem:[%s2666_s1 + $0x348] sm:$0xff]  }
  0x3e   :  { %1897 = vmatprep.subr.bf16.mxu1 %v2084_v13  ;;  %v2124_v13 = vld [vmem:[%s2666_s1 + $0x3c8] sm:$0xff]  }
  0x40   :  { %1870 = vmatpush3.bf16.msra.mxu0 %v2085_v14  ;;  %v2125_v14 = vld [vmem:[%s2666_s1 + $0x308] sm:$0xff]  }
  0x41   :  { %1898 = vmatpush3.bf16.msra.mxu1 %v2086_v15  ;;  %1911 = vmatprep.subr.bf16.mxu0 %v2087_v24  ;;  %v2126_v15 = vld [vmem:[%s2666_s1 + $0x388] sm:$0xff]  }
  0x42   :  { %1939 = vmatprep.subr.bf16.mxu1 %v2088_v25  ;;  %v2129_v25 = vld [vmem:[%s2666_s1 + $0x310] sm:$0xff]  }
  0x43   :  { %1369 = vmatmul.mubr.bf16.vlgmr.msra.gmra.mrb[8].mxu0 %v1643_v20  ;;  %v2127_v20 = vld [vmem:[%s2666_s1 + $0x350] sm:$0xff]  }
  0x44   :  { %1418 = vmatmul.mubr.bf16.vlgmr.msra.gmra.mrb[8].mxu1 %v1645_v22  ;;  %1912 = vmatpush3.bf16.msra.mxu0 %v2089_v26  ;;  %v36_v22 = vld [vmem:[%s2667_s0 + $0xa8] sm:$0xff] }
  0x45   :  { %1940 = vmatpush3.bf16.msra.mxu1 %v2090_v27  ;;  %1913 = vmatprep.subr.bf16.mxu0 %v2091_v28  ;;  %v1666_v24 = vcombine.high %v36_v22, %v44_v23  ;;  %v1665_v26 = vcombine.low %v36_v22, %v44_v23  ;;  %v2130_v27 = vld [vmem:[%s2666_s1 + $0x390] sm:$0xff]   ;;  %v2131_v28 = vld [vmem:[%s2666_s1 + $0x358] sm:$0xff]  }
  0x46   :  { %1941 = vmatprep.subr.bf16.mxu1 %v2092_v29  ;;  %1376 = vmatprep.mubr.bf16.mxu0 %v1660_v34  ;;  %v2132_v29 = vld [vmem:[%s2666_s1 + $0x3d8] sm:$0xff]   ;;  %v2137_v34 = vld [vmem:[%s2666_s1 + $0x320] sm:$0xff]  }
  0x47   :  { %1425 = vmatprep.mubr.bf16.mxu1 %v1662_v40  ;;  %v2143_v40 = vld [vmem:[%s2666_s1 + $0x370] sm:$0xff]  }
  0x48   :  { %1914 = vmatpush3.bf16.msra.mxu0 %v2093_v30  ;;  %v2133_v30 = vld [vmem:[%s2666_s1 + $0x318] sm:$0xff]  }
  0x49   :  { %1942 = vmatpush3.bf16.msra.mxu1 %v2094_v31  ;;  %1915 = vmatprep.subr.bf16.mxu0 %v2095_v36  ;;  %v2134_v31 = vld [vmem:[%s2666_s1 + $0x398] sm:$0xff]   ;;  %v2139_v36 = vld [vmem:[%s2666_s1 + $0x368] sm:$0xff]  }
  0x4a   :  { %1943 = vmatprep.subr.bf16.mxu1 %v2096_v37  ;;  %v2140_v37 = vld [vmem:[%s2666_s1 + $0x3e8] sm:$0xff]  }
  0x4b   :  { %1377 = vmatmul.mubr.bf16.gmra.mrb[12].mxu0 %v1659_v35  ;;  %v2138_v35 = vld [vmem:[%s2666_s1 + $0x3a0] sm:$0xff]  }
  0x4c   :  { %1916 = vmatpush3.bf16.msra.mxu0 %v2097_v41  ;;  %1426 = vmatmul.mubr.bf16.gmra.mrb[12].mxu1 %v1661_v42  ;;  %v2144_v41 = vld [vmem:[%s2666_s1 + $0x3f0] sm:$0xff]  }
  0x4d   :  { %1944 = vmatpush3.bf16.msra.mxu1 %v2098_v43  ;;  %1917 = vmatprep.subr.bf16.mxu0 %v2099_v44  ;;  %v2145_v42 = vld [vmem:[%s2666_s1 + $0x330] sm:$0xff]   ;;  %v2147_v44 = vld [vmem:[%s2666_s1 + $0x378] sm:$0xff]  }
  0x4e   :  { %1945 = vmatprep.subr.bf16.mxu1 %v2100_v45  ;;  %1466 = vmatprep.mubr.bf16.mxu0 %v1648_v3  ;;  %v2146_v43 = vld [vmem:[%s2666_s1 + $0x3b0] sm:$0xff]   ;;  %v2148_v45 = vld [vmem:[%s2666_s1 + $0x3f8] sm:$0xff]  }
  0x4f   :  { %1515 = vmatprep.mubr.bf16.mxu1 %v1650_v7 }
  0x50   :  { %1918 = vmatpush3.bf16.msra.mxu0 %v2101_v46  ;;  %v2149_v46 = vld [vmem:[%s2666_s1 + $0x338] sm:$0xff]  }
  0x51   :  { %1946 = vmatpush3.bf16.msra.mxu1 %v2102_v47  ;;  %1919 = vmatprep.subr.bf16.mxu0 %v2103_v48  ;;  %v2150_v47 = vld [vmem:[%s2666_s1 + $0x3b8] sm:$0xff]   ;;  %v21_v48 = vld [vmem:[%s2667_s0 + $0x30] sm:$0xff] }
  0x52   :  { %1947 = vmatprep.subr.bf16.mxu1 %v2104_v49  ;;  %v29_v49 = vld [vmem:[%s2667_s0 + $0x70] sm:$0xff] }
  0x54   :  { %1920 = vmatpush3.bf16.msra.mxu0 %v2105_v50  ;;  %v22_v50 = vld [vmem:[%s2667_s0 + $0x38] sm:$0xff] }
  0x55   :  { %1948 = vmatpush3.bf16.msra.mxu1 %v2106_v51  ;;  %1921 = vmatprep.subr.bf16.mxu0 %v2107_v52  ;;  %v1651_v51 = vcombine.low %v21_v48, %v29_v49  ;;  %v1652_v52 = vcombine.high %v21_v48, %v29_v49 }
  0x56   :  { %1949 = vmatprep.subr.bf16.mxu1 %v2108_v53  ;;  %v30_v53 = vld [vmem:[%s2667_s0 + $0x78] sm:$0xff] }
  0x58   :  { %1922 = vmatpush3.bf16.msra.mxu0 %v2109_v54  ;;  %v37_v54 = vld [vmem:[%s2667_s0 + $0xb0] sm:$0xff] }
  0x59   :  { %1950 = vmatpush3.bf16.msra.mxu1 %v2110_v55  ;;  %1923 = vmatprep.subr.bf16.mxu0 %v2111_v56  ;;  %v45_v55 = vld [vmem:[%s2667_s0 + $0xf0] sm:$0xff]  ;;  %v1653_v56 = vcombine.low %v22_v50, %v30_v53 }
  0x5a   :  { %1951 = vmatprep.subr.bf16.mxu1 %v2112_v57  ;;  %v1654_v57 = vcombine.high %v22_v50, %v30_v53 }
  0x5c   :  { %1924 = vmatpush3.bf16.msra.mxu0 %v2113_v58  ;;  %v1668_v58 = vcombine.high %v37_v54, %v45_v55 }
  0x5d   :  { %1952 = vmatpush3.bf16.msra.mxu1 %v2114_v59  ;;  %1925 = vmatprep.subr.bf16.mxu0 %v2115_v60  ;;  %v38_v59 = vld [vmem:[%s2667_s0 + $0xb8] sm:$0xff] }
  0x5e   :  { %1953 = vmatprep.subr.bf16.mxu1 %v2116_v61  ;;  %v46_v60 = vld [vmem:[%s2667_s0 + $0xf8] sm:$0xff] }
  0x5f   :  { %v1670_v61 = vcombine.high %v38_v59, %v46_v60 }
  0x60   :  { %1926 = vmatpush3.bf16.msra.mxu0 %v2117_v62  ;;  %v1667_v62 = vcombine.low %v37_v54, %v45_v55 }
  0x61   :  { %1954 = vmatpush3.bf16.msra.mxu1 %v2118_v63  ;;  %1967 = vmatprep.subr.bf16.mxu0 %v2119_v8  ;;  %v1669_v63 = vcombine.low %v38_v59, %v46_v60 }
  0x62   :  { %1995 = vmatprep.subr.bf16.mxu1 %v2120_v9 }
  0x63   :  { %1467 = vmatmul.mubr.bf16.vlgmr.msra.gmra.mrb[16].mxu0 %v1647_v2  ;;  %v1638_v2 = vld [vmem:[%s2668_s2] ss:$0 sm:$0xff] }
  0x64   :  { %1516 = vmatmul.mubr.bf16.vlgmr.msra.gmra.mrb[16].mxu1 %v1649_v6  ;;  %1968 = vmatpush3.bf16.msra.mxu0 %v2121_v10 }
  0x65   :  { %1996 = vmatpush3.bf16.msra.mxu1 %v2122_v11  ;;  %1969 = vmatprep.subr.bf16.mxu0 %v2123_v12 }
  0x66   :  { %1997 = vmatprep.subr.bf16.mxu1 %v2124_v13  ;;  %1474 = vmatprep.mubr.bf16.mxu0 %v1664_v18 }
  0x67   :  { %1523 = vmatprep.mubr.bf16.mxu1 %v1666_v24 }
  0x68   :  { %1970 = vmatpush3.bf16.msra.mxu0 %v2125_v14 }
  0x69   :  { %1998 = vmatpush3.bf16.msra.mxu1 %v2126_v15  ;;  %1971 = vmatprep.subr.bf16.mxu0 %v2127_v20 }
  0x6a   :  { %1999 = vmatprep.subr.bf16.mxu1 %v2128_v21 }
  0x6b   :  { %1475 = vmatmul.mubr.bf16.gmra.mrb[20].mxu0 %v1663_v19 }
  0x6c   :  { %1972 = vmatpush3.bf16.msra.mxu0 %v2129_v25  ;;  %1524 = vmatmul.mubr.bf16.gmra.mrb[20].mxu1 %v1665_v26 }
  0x6d   :  { %2000 = vmatpush3.bf16.msra.mxu1 %v2130_v27  ;;  %1973 = vmatprep.subr.bf16.mxu0 %v2131_v28 }
  0x6e   :  { %2001 = vmatprep.subr.bf16.mxu1 %v2132_v29  ;;  %1564 = vmatprep.mubr.bf16.mxu0 %v1652_v52 }
  0x6f   :  { %1613 = vmatprep.mubr.bf16.mxu1 %v1654_v57 }
  0x70   :  { %1974 = vmatpush3.bf16.msra.mxu0 %v2133_v30 }
  0x71   :  { %2002 = vmatpush3.bf16.msra.mxu1 %v2134_v31  ;;  %1975 = vmatprep.subr.bf16.mxu0 %v2135_v32 }
  0x72   :  { %2003 = vmatprep.subr.bf16.mxu1 %v2136_v33 }
  0x74   :  { %1976 = vmatpush3.bf16.msra.mxu0 %v2137_v34 }
  0x75   :  { %2004 = vmatpush3.bf16.msra.mxu1 %v2138_v35  ;;  %1977 = vmatprep.subr.bf16.mxu0 %v2139_v36 }
  0x76   :  { %2005 = vmatprep.subr.bf16.mxu1 %v2140_v37 }
  0x78   :  { %1978 = vmatpush3.bf16.msra.mxu0 %v2141_v38 }
  0x79   :  { %2006 = vmatpush3.bf16.msra.mxu1 %v2142_v39  ;;  %1979 = vmatprep.subr.bf16.mxu0 %v2143_v40 }
  0x7a   :  { %2007 = vmatprep.subr.bf16.mxu1 %v2144_v41 }
  0x7c   :  { %1980 = vmatpush3.bf16.msra.mxu0 %v2145_v42 }
  0x7d   :  { %2008 = vmatpush3.bf16.msra.mxu1 %v2146_v43  ;;  %1981 = vmatprep.subr.bf16.mxu0 %v2147_v44 }
  0x7e   :  { %2009 = vmatprep.subr.bf16.mxu1 %v2148_v45 }
  0x80   :  { %1982 = vmatpush3.bf16.msra.mxu0 %v2149_v46 }
  0x81   :  { %2010 = vmatpush3.bf16.msra.mxu1 %v2150_v47 }
  0x83   :  { %1565 = vmatmul.mubr.bf16.vlgmr.msra.gmra.mrb[24].mxu0 %v1651_v51 }
  0x84   :  { %1614 = vmatmul.mubr.bf16.vlgmr.msra.gmra.mrb[24].mxu1 %v1653_v56  ;;  %1572 = vmatprep.mubr.bf16.mxu0 %v1668_v58 }
  0x85   :  { %1621 = vmatprep.mubr.bf16.mxu1 %v1670_v61 }
  0x8b   :  { %1573 = vmatmul.mubr.bf16.gmra.mrb[28].mxu0 %v1667_v62 }
  0x8c   :  { %1622 = vmatmul.mubr.bf16.gmra.mrb[28].mxu1 %v1669_v63 }
  0xf6   :  { %v1815_v0 = vpop.f32.mrb[0].mxu0 }
  0xf7   :  { %v1843_v1 = vpop.f32.mrb[0].mxu1  ;;  %v1816_v3 = vpop.f32.mrb[1].mxu0 }
  0xf8   :  { %v1817_v4 = vadd.f32 %v1816_v3, %v1815_v0  ;;  %v1844_v5 = vpop.f32.mrb[1].mxu1  ;;  %v1818_v6 = vpop.f32.mrb[2].mxu0 }
  0xf9   :  { %v1845_v7 = vadd.f32 %v1844_v5, %v1843_v1  ;;  %v1846_v8 = vpop.f32.mrb[2].mxu1  ;;  %v1819_v9 = vpop.f32.mrb[3].mxu0 }
  0xfa   :  { %v1273_v10 = vadd.f32 %v1817_v4, %v1638_v2  ;;  %v1820_v11 = vadd.f32 %v1819_v9, %v1818_v6  ;;  %v1847_v12 = vpop.f32.mrb[3].mxu1 }
  0xfb   :  { %v1848_v13 = vadd.f32 %v1847_v12, %v1846_v8 }
  0xfc   :  { %v1322_v14 = vadd.f32 %v1845_v7, %v1273_v10  ;;  %v1276_v15 = vadd.f32 %v1820_v11, %v1638_v2 }
  0xfe   :  { %v1325_v16 = vadd.f32 %v1848_v13, %v1276_v15  ;;  %v1821_v17 = vpop.f32.mrb[4].mxu0 }
  0xff   :  { %v1822_v18 = vpop.f32.mrb[5].mxu0  ;;  %v1849_v21 = vpop.f32.mrb[4].mxu1 }
 0x100   :  { %v1823_v19 = vadd.f32 %v1822_v18, %v1821_v17  ;;  %v1824_v20 = vpop.f32.mrb[6].mxu0  ;;  %v1850_v25 = vpop.f32.mrb[5].mxu1 }
 0x101   :  { %v1825_v22 = vpop.f32.mrb[7].mxu0  ;;  %v1851_v26 = vadd.f32 %v1850_v25, %v1849_v21  ;;  %v1852_v27 = vpop.f32.mrb[6].mxu1 }
 0x102   :  { %v1281_v23 = vadd.f32 %v1823_v19, %v1638_v2  ;;  %v1826_v24 = vadd.f32 %v1825_v22, %v1824_v20  ;;  %v1853_v29 = vpop.f32.mrb[7].mxu1 }
 0x103   :  { %v1854_v31 = vadd.f32 %v1853_v29, %v1852_v27 }
 0x104   :  { %v1284_v28 = vadd.f32 %v1826_v24, %v1638_v2  ;;  %v1330_v30 = vadd.f32 %v1851_v26, %v1281_v23 }
 0x106   :  { %v1333_v32 = vadd.f32 %v1854_v31, %v1284_v28 }
 0x116   :  { %v1871_v33 = vpop.f32.mrb[8].mxu0 }
 0x117   :  { %v1899_v34 = vpop.f32.mrb[8].mxu1  ;;  %v1872_v35 = vpop.f32.mrb[9].mxu0 }
 0x118   :  { %v1900_v36 = vpop.f32.mrb[9].mxu1  ;;  %v1873_v37 = vadd.f32 %v1872_v35, %v1871_v33  ;;  %v1874_v39 = vpop.f32.mrb[10].mxu0 }
 0x119   :  { %v1901_v38 = vadd.f32 %v1900_v36, %v1899_v34  ;;  %v1902_v40 = vpop.f32.mrb[10].mxu1  ;;  %v1875_v41 = vpop.f32.mrb[11].mxu0 }
 0x11a   :  { %v1903_v42 = vpop.f32.mrb[11].mxu1  ;;  %v1371_v43 = vadd.f32 %v1873_v37, %v1322_v14  ;;  %v1876_v44 = vadd.f32 %v1875_v41, %v1874_v39 }
 0x11b   :  { %v1904_v45 = vadd.f32 %v1903_v42, %v1902_v40 }
 0x11c   :  { %v1420_v46 = vadd.f32 %v1901_v38, %v1371_v43  ;;  %v1374_v47 = vadd.f32 %v1876_v44, %v1325_v16 }
 0x11e   :  { %v1423_v48 = vadd.f32 %v1904_v45, %v1374_v47  ;;  %v1877_v49 = vpop.f32.mrb[12].mxu0 }
 0x11f   :  { %v1878_v50 = vpop.f32.mrb[13].mxu0  ;;  %v1905_v55 = vpop.f32.mrb[12].mxu1 }
 0x120   :  { %v1879_v51 = vadd.f32 %v1878_v50, %v1877_v49  ;;  %v1880_v52 = vpop.f32.mrb[14].mxu0  ;;  %v1906_v57 = vpop.f32.mrb[13].mxu1 }
 0x121   :  { %v1881_v53 = vpop.f32.mrb[15].mxu0  ;;  %v1907_v59 = vadd.f32 %v1906_v57, %v1905_v55  ;;  %v1908_v60 = vpop.f32.mrb[14].mxu1 }
 0x122   :  { %v1379_v54 = vadd.f32 %v1879_v51, %v1330_v30  ;;  %v1882_v56 = vadd.f32 %v1881_v53, %v1880_v52  ;;  %v1909_v61 = vpop.f32.mrb[15].mxu1 }
 0x123   :  { %v1910_v63 = vadd.f32 %v1909_v61, %v1908_v60 }
 0x124   :  { %v1382_v58 = vadd.f32 %v1882_v56, %v1333_v32  ;;  %v1428_v62 = vadd.f32 %v1907_v59, %v1379_v54 }
 0x126   :  { %v1431_v0 = vadd.f32 %v1910_v63, %v1382_v58 }
 0x136   :  { %v1927_v1 = vpop.f32.mrb[16].mxu0 }
 0x137   :  { %v1955_v2 = vpop.f32.mrb[16].mxu1  ;;  %v1928_v3 = vpop.f32.mrb[17].mxu0 }
 0x138   :  { %v1929_v4 = vadd.f32 %v1928_v3, %v1927_v1  ;;  %v1956_v5 = vpop.f32.mrb[17].mxu1  ;;  %v1930_v6 = vpop.f32.mrb[18].mxu0 }
 0x139   :  { %v1957_v7 = vadd.f32 %v1956_v5, %v1955_v2  ;;  %v1958_v8 = vpop.f32.mrb[18].mxu1  ;;  %v1931_v9 = vpop.f32.mrb[19].mxu0 }
 0x13a   :  { %v1469_v10 = vadd.f32 %v1929_v4, %v1420_v46  ;;  %v1932_v11 = vadd.f32 %v1931_v9, %v1930_v6  ;;  %v1959_v12 = vpop.f32.mrb[19].mxu1 }
 0x13b   :  { %v1960_v13 = vadd.f32 %v1959_v12, %v1958_v8 }
 0x13c   :  { %v1518_v14 = vadd.f32 %v1957_v7, %v1469_v10  ;;  %v1472_v15 = vadd.f32 %v1932_v11, %v1423_v48 }
 0x13e   :  { %v1521_v16 = vadd.f32 %v1960_v13, %v1472_v15  ;;  %v1933_v17 = vpop.f32.mrb[20].mxu0 }
 0x13f   :  { %v1934_v18 = vpop.f32.mrb[21].mxu0  ;;  %v1961_v21 = vpop.f32.mrb[20].mxu1 }
 0x140   :  { %v1935_v19 = vadd.f32 %v1934_v18, %v1933_v17  ;;  %v1936_v20 = vpop.f32.mrb[22].mxu0  ;;  %v1962_v25 = vpop.f32.mrb[21].mxu1 }
 0x141   :  { %v1937_v22 = vpop.f32.mrb[23].mxu0  ;;  %v1963_v26 = vadd.f32 %v1962_v25, %v1961_v21  ;;  %v1964_v27 = vpop.f32.mrb[22].mxu1 }
 0x142   :  { %v1477_v23 = vadd.f32 %v1935_v19, %v1428_v62  ;;  %v1938_v24 = vadd.f32 %v1937_v22, %v1936_v20  ;;  %v1965_v29 = vpop.f32.mrb[23].mxu1 }
 0x143   :  { %v1966_v31 = vadd.f32 %v1965_v29, %v1964_v27 }
 0x144   :  { %v1480_v28 = vadd.f32 %v1938_v24, %v1431_v0  ;;  %v1526_v30 = vadd.f32 %v1963_v26, %v1477_v23 }
 0x146   :  { %v1529_v32 = vadd.f32 %v1966_v31, %v1480_v28 }
 0x156   :  { %v1983_v33 = vpop.f32.mrb[24].mxu0 }
 0x157   :  { %v2011_v34 = vpop.f32.mrb[24].mxu1  ;;  %v1984_v35 = vpop.f32.mrb[25].mxu0 }
 0x158   :  { %v1985_v36 = vadd.f32 %v1984_v35, %v1983_v33  ;;  %v2012_v37 = vpop.f32.mrb[25].mxu1  ;;  %v1986_v38 = vpop.f32.mrb[26].mxu0 }
 0x159   :  { %v2013_v39 = vadd.f32 %v2012_v37, %v2011_v34  ;;  %v2014_v40 = vpop.f32.mrb[26].mxu1  ;;  %v1987_v41 = vpop.f32.mrb[27].mxu0 }
 0x15a   :  { %v1567_v42 = vadd.f32 %v1985_v36, %v1518_v14  ;;  %v1988_v43 = vadd.f32 %v1987_v41, %v1986_v38  ;;  %v2015_v44 = vpop.f32.mrb[27].mxu1 }
 0x15b   :  { %v2016_v45 = vadd.f32 %v2015_v44, %v2014_v40 }
 0x15c   :  { %v1616_v46 = vadd.f32 %v2013_v39, %v1567_v42  ;;  %v1570_v47 = vadd.f32 %v1988_v43, %v1521_v16 }
 0x15e   :  { %1630 = vst [vmem:[%s2669_s3] sm:$0xff] %v1616_v46  ;;  %v1619_v48 = vadd.f32 %v2016_v45, %v1570_v47  ;;  %v1989_v49 = vpop.f32.mrb[28].mxu0 }
 0x15f   :  { %v2017_v50 = vpop.f32.mrb[28].mxu1  ;;  %v1990_v51 = vpop.f32.mrb[29].mxu0 }
 0x160   :  { %1631 = vst [vmem:[%s2669_s3 + $0x8] sm:$0xff] %v1619_v48  ;;  %v1991_v52 = vadd.f32 %v1990_v51, %v1989_v49  ;;  %v2018_v53 = vpop.f32.mrb[29].mxu1  ;;  %v1992_v54 = vpop.f32.mrb[30].mxu0 }
 0x161   :  { %v2019_v55 = vadd.f32 %v2018_v53, %v2017_v50  ;;  %v2020_v56 = vpop.f32.mrb[30].mxu1  ;;  %v1993_v57 = vpop.f32.mrb[31].mxu0 }
 0x162   :  { %v1575_v58 = vadd.f32 %v1991_v52, %v1526_v30  ;;  %v1994_v59 = vadd.f32 %v1993_v57, %v1992_v54  ;;  %v2021_v60 = vpop.f32.mrb[31].mxu1 }
 0x163   :  { %v2022_v61 = vadd.f32 %v2021_v60, %v2020_v56 }
 0x164   :  { %v1624_v62 = vadd.f32 %v2019_v55, %v1575_v58  ;;  %v1578_v63 = vadd.f32 %v1994_v59, %v1529_v32 }
 0x166   :  { %1632 = vst [vmem:[%s2669_s3 + $0x10] sm:$0xff] %v1624_v62  ;;  %v1627_v0 = vadd.f32 %v2022_v61, %v1578_v63 }
 0x168   :  { %1633 = vst [vmem:[%s2669_s3 + $0x18] sm:$0xff] %v1627_v0 }

// kernel: nlayer_discriminator_forward.20
= control target key start
LH: loop header
LB: loop body
LE: loop exit
PB: predicated region body
PF: predicated region fallthrough
CT: control target
= control target key end

     0   :  { %s359_s6 = smov 0   ;;  %s361_s7 = smov 0   ;;  %s399_s0 = inlined_call_operand.vmem [shape: f32[2,9,128], index: 0, kind: input, shape index: {}]   ;;  %s400_s1 = inlined_call_operand.vmem [shape: bf16[2,9,128], index: 1, kind: output, shape index: {}]  }
   0x1   :  { %s363_s8 = smov 0  }
   0x2 LB: > { %s23_s9 = sadd.s32 1, %s343_s7  ;;  %p286_p0 = scmp.ge.s32.totalorder %s347_s8, 1  ;;  %s347_s8 = sphi %s363_s8, %s11_s8   ;;  %s343_s7 = sphi %s361_s7, %s402_s7   ;;  %s339_s6 = sphi %s359_s6, %s401_s6  }
   0x3   : > { %p25_p1 = scmp.ge.s32.totalorder %s23_s9, 2  ;;  %p106_p2 = scmp.lt.s32.totalorder %s347_s8, 3 }
   0x5   : > { %s404_s9 = smov (%p25_p1, %s23_s9), 0  ;;  %p107_p3 = pnand %p286_p0, %p106_p2 }
   0x6   : > { %p132_p4 = scmp.lt.s32.totalorder (!%p107_p3), %s339_s6, 1  ;;  %vm150_vm0 = vcmask (!%p107_p3), 1040384   ;;  %vm194_vm1 = vsmask.f32 (!%p107_p3), 256 }
   0x7   : > { %110 = sbr.rel (%p107_p3) target bundleno = 78 (0x4e), region = 24  ;;  %vm195_vm4 = vmand (!%p107_p3), %vm150_vm0, %vm194_vm1 }
   0xe   : > { %s406_s6 = smov (!%p132_p4, %s339_s6), 1 }
   0xf   : > { %s295_s10 = sshll.u32 %s406_s6, 4  ;;  %s296_s14 = sshll.u32 %s406_s6, 3 }
  0x10   : > { %s139_s13 = scalar_lea.vmem %s399_s0, %s295_s10  ;;  %s147_s17 = scalar_lea.vmem %s400_s1, %s296_s14 }
  0x11   : > { %v148_v0 = vld [vmem:[%s139_s13] sm:$0xff]  ;;  %v149_v1 = vld [vmem:[%s139_s13 + $0x8] sm:$0x1] }
  0x12   : > { %v151_v2 = vsel %vm150_vm0, %v149_v1, 0.0  ;;  %v196_v32 = vld [vmem:[%s147_s17 + $0x4] sm:$0x1] }
  0x13   : > { %v152_v3 = vadd.f32 %v151_v2, %v148_v0 }
  0x15   : > { %v153_v4 = vrot.slane %v152_v3, 4 }
  0x17   : > { %v154_v5 = vadd.f32 %v153_v4, %v152_v3 }
  0x19   : > { %v155_v6 = vrot.slane %v154_v5, 2 }
  0x1b   : > { %v156_v7 = vadd.f32 %v155_v6, %v154_v5 }
  0x1d   : > { %v157_v8 = vrot.slane %v156_v7, 1 }
  0x1f   : > { %v158_v9 = vadd.f32 %v157_v8, %v156_v7 }
  0x21   : > { %v160_v10 = vmul.f32 0.11111111, %v158_v9 }
  0x23   : > { %v161_v11 = vsub.f32 %v148_v0, %v160_v10  ;;  %v162_v12 = vsub.f32 %v149_v1, %v160_v10 }
  0x25   : > { %v163_v13 = vmul.f32 %v161_v11, %v161_v11  ;;  %v164_v14 = vmul.f32 %v162_v12, %v162_v12 }
  0x27   : > { %v165_v15 = vsel %vm150_vm0, %v164_v14, 0.0 }
  0x28   : > { %v166_v16 = vadd.f32 %v165_v15, %v163_v13 }
  0x2a   : > { %v167_v17 = vrot.slane %v166_v16, 4 }
  0x2c   : > { %v168_v18 = vadd.f32 %v167_v17, %v166_v16 }
  0x2e   : > { %v169_v19 = vrot.slane %v168_v18, 2 }
  0x30   : > { %v170_v20 = vadd.f32 %v169_v19, %v168_v18 }
  0x32   : > { %v171_v21 = vrot.slane %v170_v20, 1 }
  0x34   : > { %v172_v22 = vadd.f32 %v171_v21, %v170_v20 }
  0x36   : > { %v173_v23 = vmul.f32 0.11111111, %v172_v22 }
  0x38   : > { %v174_v24 = vadd.f32 1e-05, %v173_v23 }
  0x3a   : > { %323 = vrsqrt.f32 %v174_v24 }
  0x44   : > { %v324_v25 = vpop.eup %323 }
  0x45   : > { %v176_v26 = vmul.f32 %v324_v25, %v161_v11  ;;  %v177_v27 = vmul.f32 %v324_v25, %v162_v12 }
  0x47   : > { %vm178_vm2 = vcmp.ge.f32.partialorder %v176_v26, 0.0  ;;  %v180_v28 = vmul.f32 0.2, %v176_v26  ;;  %vm179_vm3 = vcmp.ge.f32.partialorder %v177_v27, 0.0  ;;  %v181_v29 = vmul.f32 0.2, %v177_v27 }
  0x49   : > { %v182_v30 = vsel %vm178_vm2, %v176_v26, %v180_v28  ;;  %v183_v31 = vsel %vm179_vm3, %v177_v27, %v181_v29 }
  0x4a   : > { %v297_v33 = vpack.c.bf16 %v182_v30, %v182_v30  ;;  %v298_v34 = vpack.c.bf16 %v183_v31, %v183_v31 }
  0x4c   : > { %192 = vst [vmem:[%s147_s17] sm:$0xf] %v297_v33  ;;  %v197_v35 = vsel %vm195_vm4, %v298_v34, %v196_v32 }
  0x4d   : > { %198 = vst [vmem:[%s147_s17 + $0x4] sm:$0x1] %v197_v35 }
  0x4e PF: > { %s11_s8 = sadd.s32 1, %s347_s8   ;;  %s401_s6 = smov %s343_s7 }
  0x4f   : > { %p8_p5 = scmp.ge.s32.totalorder %s11_s8, 4   ;;  %s402_s7 = smov %s404_s9 }
  0x51   :  { %10 = sbr.rel (!%p8_p5) target bundleno = 2 (0x2), region = 54 }

// kernel: nlayer_discriminator_forward.22
= control target key start
LH: loop header
LB: loop body
LE: loop exit
PB: predicated region body
PF: predicated region fallthrough
CT: control target
= control target key end

     0   :  { %s564_s12 = smov 0   ;;  %s602_s0 = inlined_call_operand.vmem [shape: bf16[128,48], index: 0, kind: input, shape index: {}]   ;;  %s603_s1 = inlined_call_operand.vmem [shape: bf16[48,128], index: 1, kind: input, shape index: {}]   ;;  %s604_s2 = inlined_call_operand.vmem [shape: f32[1,128], index: 2, kind: input, shape index: {}]   ;;  %s605_s3 = inlined_call_operand.vmem [shape: bf16[128,128], index: 3, kind: output, shape index: {}]  }
   0x1 LB: > { %s432_s13 = sadd.s32 4294967295, %s542_s12   ;;  %p436_p0 = scmp.ge.s32.totalorder %s542_s12, 1  ;;  %s542_s12 = sphi %s564_s12, %s13_s12  }
   0x2   : > { %p138_p1 = scmp.lt.s32.totalorder %s542_s12, 3 }
   0x4   : > { %p139_p2 = pnand %p436_p0, %p138_p1 }
   0x5   : > { %v529_v0 = vld [vmem:[%s603_s1] sm:$0xff] (!%p139_p2)   ;;  %s437_s16 = sshll.u32 (!%p139_p2), %s432_s13, 3  ;;  %v530_v1 = vld [vmem:[%s603_s1 + $0x8] sm:$0xff] (!%p139_p2)   ;;  %v531_v2 = vld [vmem:[%s603_s1 + $0x10] sm:$0xff] (!%p139_p2)   ;;  %vm234_vm0 = vcmask (!%p139_p2), 392192  }
   0x6   : > { %142 = sbr.rel (%p139_p2) target bundleno = 243 (0xf3), region = 32  ;;  %p163_p3 = scmp.lt.s32.totalorder (!%p139_p2), %s437_s16, 15  ;;  %501 = vmatprep.subr.bf16.mxu0 (!%p139_p2), %v529_v0  ;;  %515 = vmatprep.subr.bf16.mxu1 (!%p139_p2), %v529_v0  ;;  %v441_v7 = vld [vmem:[%s604_s2] ss:$0 sm:$0xff] (!%p139_p2) }
   0x7   : > { %502 = vmatpush3.bf16.msra.mxu0 (!%p139_p2), %v529_v0  ;;  %518 = vmatpush3.bf16.msra.mxu1 (!%p139_p2), %v529_v0 }
   0x8   : > { %503 = vmatprep.subr.bf16.mxu0 (!%p139_p2), %v530_v1  ;;  %516 = vmatprep.subr.bf16.mxu1 (!%p139_p2), %v530_v1 }
   0xb   : > { %504 = vmatpush3.bf16.msra.mxu0 (!%p139_p2), %v530_v1  ;;  %519 = vmatpush3.bf16.msra.mxu1 (!%p139_p2), %v530_v1 }
   0xc   : > { %505 = vmatprep.subr.bf16.mxu0 (!%p139_p2), %v531_v2  ;;  %517 = vmatprep.subr.bf16.mxu1 (!%p139_p2), %v531_v2 }
   0xd   : > { %s607_s16 = smov (!%p163_p3, %s437_s16), 15 }
   0xe   : > { %s438_s21 = sshll.u32 %s607_s16, 2 }
   0xf   : > { %s166_s24 = scalar_lea.vmem %s602_s0, %s438_s21  ;;  %506 = vmatpush3.bf16.msra.mxu0 %v531_v2  ;;  %520 = vmatpush3.bf16.msra.mxu1 %v531_v2  ;;  %s172_s29 = scalar_lea.vmem %s605_s3, %s438_s21 }
  0x10   : > { %v532_v3 = vld [vmem:[%s166_s24] sm:$0xff]   ;;  %v533_v4 = vld [vmem:[%s166_s24 + $0x10] sm:$0xff]   ;;  %v534_v5 = vld [vmem:[%s166_s24 + $0x8] sm:$0xff]  }
  0x11   : > { %507 = vmatprep.mubr.msk.bf16.mxu0 %vm234_vm0, %v532_v3  ;;  %511 = vmatprep.mubr.msk.bf16.mxu1 %vm234_vm0, %v533_v4  ;;  %v535_v6 = vld [vmem:[%s166_s24 + $0x18] sm:$0xff]  }
  0x12   : > { %508 = vmatmul.mubr.msk.bf16.vlgmr.msra.gmra.mrb[0].mxu0 %vm234_vm0, %v534_v5  ;;  %512 = vmatmul.mubr.msk.bf16.vlgmr.msra.gmra.mrb[0].mxu1 %vm234_vm0, %v535_v6 }
  0xe5   : > { %v509_v8 = vpop.f32.mrb[0].mxu0  ;;  %v513_v9 = vpop.f32.mrb[0].mxu1 }
  0xe6   : > { %v290_v10 = vadd.f32 %v509_v8, %v441_v7  ;;  %v306_v11 = vadd.f32 %v513_v9, %v441_v7  ;;  %v281_v12 = vpop.f32.mrb[1].mxu0  ;;  %v297_v13 = vpop.f32.mrb[1].mxu1 }
  0xe7   : > { %v282_v14 = vadd.f32 %v441_v7, %v281_v12  ;;  %v298_v15 = vadd.f32 %v441_v7, %v297_v13  ;;  %v510_v16 = vpop.f32.mrb[2].mxu0  ;;  %v514_v17 = vpop.f32.mrb[2].mxu1 }
  0xe8   : > { %vm314_vm1 = vcmp.ge.f32.partialorder %v290_v10, 0.0  ;;  %v322_v18 = vmul.f32 0.2, %v290_v10  ;;  %vm318_vm2 = vcmp.ge.f32.partialorder %v306_v11, 0.0  ;;  %v326_v19 = vmul.f32 0.2, %v306_v11 }
  0xe9   : > { %vm312_vm3 = vcmp.ge.f32.partialorder %v282_v14, 0.0  ;;  %v320_v20 = vmul.f32 0.2, %v282_v14  ;;  %vm316_vm4 = vcmp.ge.f32.partialorder %v298_v15, 0.0  ;;  %v324_v21 = vmul.f32 0.2, %v298_v15 }
  0xea   : > { %v293_v22 = vadd.f32 %v510_v16, %v441_v7  ;;  %v309_v23 = vadd.f32 %v514_v17, %v441_v7  ;;  %v284_v24 = vpop.f32.mrb[3].mxu0  ;;  %v300_v25 = vpop.f32.mrb[3].mxu1  ;;  %v330_v26 = vsel %vm314_vm1, %v290_v10, %v322_v18  ;;  %v334_v27 = vsel %vm318_vm2, %v306_v11, %v326_v19 }
  0xeb   : > { %v285_v28 = vadd.f32 %v441_v7, %v284_v24  ;;  %v301_v29 = vadd.f32 %v441_v7, %v300_v25  ;;  %v328_v34 = vsel %vm312_vm3, %v282_v14, %v320_v20  ;;  %v332_v35 = vsel %vm316_vm4, %v298_v15, %v324_v21 }
  0xec   : > { %vm315_vm5 = vcmp.ge.f32.partialorder %v293_v22, 0.0  ;;  %v323_v30 = vmul.f32 0.2, %v293_v22  ;;  %vm319_vm6 = vcmp.ge.f32.partialorder %v309_v23, 0.0  ;;  %v327_v31 = vmul.f32 0.2, %v309_v23 }
  0xed   : > { %vm313_vm7 = vcmp.ge.f32.partialorder %v285_v28, 0.0  ;;  %v321_v32 = vmul.f32 0.2, %v285_v28  ;;  %vm317_vm8 = vcmp.ge.f32.partialorder %v301_v29, 0.0  ;;  %v325_v33 = vmul.f32 0.2, %v301_v29 }
  0xee   : > { %v331_v36 = vsel %vm315_vm5, %v293_v22, %v323_v30  ;;  %v335_v37 = vsel %vm319_vm6, %v309_v23, %v327_v31 }
  0xef   : > { %v479_v38 = vpack.c.bf16 %v331_v36, %v330_v26  ;;  %v489_v39 = vpack.c.bf16 %v335_v37, %v334_v27  ;;  %v329_v40 = vsel %vm313_vm7, %v285_v28, %v321_v32  ;;  %v333_v41 = vsel %vm317_vm8, %v301_v29, %v325_v33 }
  0xf0   : > { %v474_v42 = vpack.c.bf16 %v329_v40, %v328_v34  ;;  %v484_v43 = vpack.c.bf16 %v333_v41, %v332_v35 }
  0xf1   : > { %491 = vst [vmem:[%s172_s29 + $0x8] sm:$0xff] %v479_v38   ;;  %493 = vst [vmem:[%s172_s29 + $0x18] sm:$0xff] %v489_v39  }
  0xf2   : > { %475 = vst [vmem:[%s172_s29] sm:$0xff] %v474_v42   ;;  %492 = vst [vmem:[%s172_s29 + $0x10] sm:$0xff] %v484_v43  }
  0xf3 PF: > { %s13_s12 = sadd.s32 1, %s542_s12  }
  0xf4   : > { %p10_p4 = scmp.ge.s32.totalorder %s13_s12, 4  }
  0xf6   :  { %12 = sbr.rel (!%p10_p4) target bundleno = 1 (0x1), region = 62 }

// kernel: nlayer_discriminator_forward.27
= control target key start
LH: loop header
LB: loop body
LE: loop exit
PB: predicated region body
PF: predicated region fallthrough
CT: control target
= control target key end

     0   :  { %s2386_s1 = inlined_call_operand.vmem [shape: bf16[2048,128], index: 1, kind: input, shape index: {}]   ;;  %s2387_s0 = inlined_call_operand.vmem [shape: bf16[16,2048], index: 0, kind: input, shape index: {}]   ;;  %s2388_s2 = inlined_call_operand.vmem [shape: f32[1,128], index: 2, kind: input, shape index: {}]   ;;  %s2389_s3 = inlined_call_operand.vmem [shape: f32[16,128], index: 3, kind: output, shape index: {}]  }
   0x1   :  { %v1797_v0 = vld [vmem:[%s2386_s1 + $0x40] sm:$0xff]   ;;  %v1801_v4 = vld [vmem:[%s2386_s1 + $0x48] sm:$0xff]   ;;  %v1805_v8 = vld [vmem:[%s2386_s1 + $0x50] sm:$0xff]  }
   0x2   :  { %v1798_v1 = vld [vmem:[%s2386_s1 + $0xc0] sm:$0xff]   ;;  %1621 = vmatprep.subr.bf16.mxu0 %v1797_v0  ;;  %v1802_v5 = vld [vmem:[%s2386_s1 + $0xc8] sm:$0xff]   ;;  %v1806_v9 = vld [vmem:[%s2386_s1 + $0xd0] sm:$0xff]  }
   0x3   :  { %v1799_v2 = vld [vmem:[%s2386_s1] sm:$0xff]   ;;  %1643 = vmatprep.subr.bf16.mxu1 %v1798_v1  ;;  %v1803_v6 = vld [vmem:[%s2386_s1 + $0x8] sm:$0xff]   ;;  %v1807_v10 = vld [vmem:[%s2386_s1 + $0x10] sm:$0xff]  }
   0x4   :  { %v1800_v3 = vld [vmem:[%s2386_s1 + $0x80] sm:$0xff]   ;;  %1622 = vmatpush3.bf16.msra.mxu0 %v1799_v2  ;;  %v1804_v7 = vld [vmem:[%s2386_s1 + $0x88] sm:$0xff]   ;;  %v1808_v11 = vld [vmem:[%s2386_s1 + $0x90] sm:$0xff]  }
   0x5   :  { %1644 = vmatpush3.bf16.msra.mxu1 %v1800_v3  ;;  %1623 = vmatprep.subr.bf16.mxu0 %v1801_v4  ;;  %v1809_v12 = vld [vmem:[%s2386_s1 + $0x58] sm:$0xff]   ;;  %v1813_v16 = vld [vmem:[%s2386_s1 + $0x60] sm:$0xff]   ;;  %v1817_v20 = vld [vmem:[%s2386_s1 + $0x68] sm:$0xff]  }
   0x6   :  { %1645 = vmatprep.subr.bf16.mxu1 %v1802_v5  ;;  %v1810_v13 = vld [vmem:[%s2386_s1 + $0xd8] sm:$0xff]   ;;  %v1814_v17 = vld [vmem:[%s2386_s1 + $0xe0] sm:$0xff]   ;;  %v1818_v21 = vld [vmem:[%s2386_s1 + $0xe8] sm:$0xff]  }
   0x7   :  { %v1811_v14 = vld [vmem:[%s2386_s1 + $0x18] sm:$0xff]   ;;  %v1815_v18 = vld [vmem:[%s2386_s1 + $0x20] sm:$0xff]   ;;  %v1819_v22 = vld [vmem:[%s2386_s1 + $0x28] sm:$0xff]  }
   0x8   :  { %1624 = vmatpush3.bf16.msra.mxu0 %v1803_v6  ;;  %v1812_v15 = vld [vmem:[%s2386_s1 + $0x98] sm:$0xff]   ;;  %v1816_v19 = vld [vmem:[%s2386_s1 + $0xa0] sm:$0xff]   ;;  %v1820_v23 = vld [vmem:[%s2386_s1 + $0xa8] sm:$0xff]  }
   0x9   :  { %1646 = vmatpush3.bf16.msra.mxu1 %v1804_v7  ;;  %1625 = vmatprep.subr.bf16.mxu0 %v1805_v8  ;;  %v1821_v24 = vld [vmem:[%s2386_s1 + $0x70] sm:$0xff]   ;;  %v1825_v28 = vld [vmem:[%s2386_s1 + $0x78] sm:$0xff]   ;;  %v15_v32 = vld [vmem:[%s2387_s0] sm:$0xff] }
   0xa   :  { %1647 = vmatprep.subr.bf16.mxu1 %v1806_v9  ;;  %v1822_v25 = vld [vmem:[%s2386_s1 + $0xf0] sm:$0xff]   ;;  %v1826_v29 = vld [vmem:[%s2386_s1 + $0xf8] sm:$0xff]   ;;  %v23_v33 = vld [vmem:[%s2387_s0 + $0x40] sm:$0xff] }
   0xb   :  { %v1823_v26 = vld [vmem:[%s2386_s1 + $0x30] sm:$0xff]   ;;  %v1827_v30 = vld [vmem:[%s2386_s1 + $0x38] sm:$0xff]   ;;  %v16_v34 = vld [vmem:[%s2387_s0 + $0x8] sm:$0xff]  ;;  %v1477_v35 = vcombine.low %v15_v32, %v23_v33  ;;  %v1478_v36 = vcombine.high %v15_v32, %v23_v33 }
   0xc   :  { %1626 = vmatpush3.bf16.msra.mxu0 %v1807_v10  ;;  %v1824_v27 = vld [vmem:[%s2386_s1 + $0xb0] sm:$0xff]   ;;  %v1828_v31 = vld [vmem:[%s2386_s1 + $0xb8] sm:$0xff]   ;;  %v24_v37 = vld [vmem:[%s2387_s0 + $0x48] sm:$0xff] }
   0xd   :  { %1648 = vmatpush3.bf16.msra.mxu1 %v1808_v11  ;;  %1627 = vmatprep.subr.bf16.mxu0 %v1809_v12  ;;  %v1479_v38 = vcombine.low %v16_v34, %v24_v37  ;;  %v1480_v39 = vcombine.high %v16_v34, %v24_v37  ;;  %v1829_v40 = vld [vmem:[%s2386_s1 + $0x140] sm:$0xff]   ;;  %v1833_v44 = vld [vmem:[%s2386_s1 + $0x148] sm:$0xff]   ;;  %v1837_v48 = vld [vmem:[%s2386_s1 + $0x150] sm:$0xff]  }
   0xe   :  { %1649 = vmatprep.subr.bf16.mxu1 %v1810_v13  ;;  %1174 = vmatprep.mubr.bf16.mxu0 %v1478_v36  ;;  %v1830_v41 = vld [vmem:[%s2386_s1 + $0x1c0] sm:$0xff]   ;;  %v1834_v45 = vld [vmem:[%s2386_s1 + $0x1c8] sm:$0xff]   ;;  %v1838_v49 = vld [vmem:[%s2386_s1 + $0x1d0] sm:$0xff]  }
   0xf   :  { %1215 = vmatprep.mubr.bf16.mxu1 %v1480_v39  ;;  %v1831_v42 = vld [vmem:[%s2386_s1 + $0x100] sm:$0xff]   ;;  %v1835_v46 = vld [vmem:[%s2386_s1 + $0x108] sm:$0xff]   ;;  %v1839_v50 = vld [vmem:[%s2386_s1 + $0x110] sm:$0xff]  }
  0x10   :  { %1628 = vmatpush3.bf16.msra.mxu0 %v1811_v14  ;;  %v1832_v43 = vld [vmem:[%s2386_s1 + $0x180] sm:$0xff]   ;;  %v1836_v47 = vld [vmem:[%s2386_s1 + $0x188] sm:$0xff]   ;;  %v1840_v51 = vld [vmem:[%s2386_s1 + $0x190] sm:$0xff]  }
  0x11   :  { %1650 = vmatpush3.bf16.msra.mxu1 %v1812_v15  ;;  %1629 = vmatprep.subr.bf16.mxu0 %v1813_v16  ;;  %v1841_v52 = vld [vmem:[%s2386_s1 + $0x158] sm:$0xff]   ;;  %v1845_v56 = vld [vmem:[%s2386_s1 + $0x160] sm:$0xff]   ;;  %v1849_v60 = vld [vmem:[%s2386_s1 + $0x168] sm:$0xff]  }
  0x12   :  { %1651 = vmatprep.subr.bf16.mxu1 %v1814_v17  ;;  %v1842_v53 = vld [vmem:[%s2386_s1 + $0x1d8] sm:$0xff]   ;;  %v1846_v57 = vld [vmem:[%s2386_s1 + $0x1e0] sm:$0xff]   ;;  %v1850_v61 = vld [vmem:[%s2386_s1 + $0x1e8] sm:$0xff]  }
  0x13   :  { %v1843_v54 = vld [vmem:[%s2386_s1 + $0x118] sm:$0xff]   ;;  %v1847_v58 = vld [vmem:[%s2386_s1 + $0x120] sm:$0xff]   ;;  %v1851_v62 = vld [vmem:[%s2386_s1 + $0x128] sm:$0xff]  }
  0x14   :  { %1630 = vmatpush3.bf16.msra.mxu0 %v1815_v18  ;;  %v1844_v55 = vld [vmem:[%s2386_s1 + $0x198] sm:$0xff]   ;;  %v1848_v59 = vld [vmem:[%s2386_s1 + $0x1a0] sm:$0xff]   ;;  %v1852_v63 = vld [vmem:[%s2386_s1 + $0x1a8] sm:$0xff]  }
  0x15   :  { %1652 = vmatpush3.bf16.msra.mxu1 %v1816_v19  ;;  %1631 = vmatprep.subr.bf16.mxu0 %v1817_v20  ;;  %v1853_v0 = vld [vmem:[%s2386_s1 + $0x170] sm:$0xff]   ;;  %v1857_v4 = vld [vmem:[%s2386_s1 + $0x178] sm:$0xff]   ;;  %v1861_v16 = vld [vmem:[%s2386_s1 + $0x240] sm:$0xff]  }
  0x16   :  { %1653 = vmatprep.subr.bf16.mxu1 %v1818_v21  ;;  %v1854_v1 = vld [vmem:[%s2386_s1 + $0x1f0] sm:$0xff]   ;;  %v1858_v5 = vld [vmem:[%s2386_s1 + $0x1f8] sm:$0xff]   ;;  %v1862_v17 = vld [vmem:[%s2386_s1 + $0x2c0] sm:$0xff]  }
  0x17   :  { %v1855_v2 = vld [vmem:[%s2386_s1 + $0x130] sm:$0xff]   ;;  %v1859_v6 = vld [vmem:[%s2386_s1 + $0x138] sm:$0xff]   ;;  %v1863_v18 = vld [vmem:[%s2386_s1 + $0x200] sm:$0xff]  }
  0x18   :  { %1632 = vmatpush3.bf16.msra.mxu0 %v1819_v22  ;;  %v1856_v3 = vld [vmem:[%s2386_s1 + $0x1b0] sm:$0xff]   ;;  %v1860_v7 = vld [vmem:[%s2386_s1 + $0x1b8] sm:$0xff]   ;;  %v1864_v19 = vld [vmem:[%s2386_s1 + $0x280] sm:$0xff]  }
  0x19   :  { %1654 = vmatpush3.bf16.msra.mxu1 %v1820_v23  ;;  %1633 = vmatprep.subr.bf16.mxu0 %v1821_v24  ;;  %v17_v8 = vld [vmem:[%s2387_s0 + $0x10] sm:$0xff]  ;;  %v18_v12 = vld [vmem:[%s2387_s0 + $0x18] sm:$0xff]  ;;  %v1865_v20 = vld [vmem:[%s2386_s1 + $0x248] sm:$0xff]  }
  0x1a   :  { %1655 = vmatprep.subr.bf16.mxu1 %v1822_v25  ;;  %v25_v9 = vld [vmem:[%s2387_s0 + $0x50] sm:$0xff]  ;;  %v26_v13 = vld [vmem:[%s2387_s0 + $0x58] sm:$0xff]  ;;  %v1866_v21 = vld [vmem:[%s2386_s1 + $0x2c8] sm:$0xff]  }
  0x1b   :  { %v1481_v10 = vcombine.low %v17_v8, %v25_v9  ;;  %v1482_v11 = vcombine.high %v17_v8, %v25_v9  ;;  %v1483_v14 = vcombine.low %v18_v12, %v26_v13  ;;  %v1484_v15 = vcombine.high %v18_v12, %v26_v13  ;;  %v1867_v22 = vld [vmem:[%s2386_s1 + $0x208] sm:$0xff]   ;;  %v1869_v24 = vld [vmem:[%s2386_s1 + $0x250] sm:$0xff]   ;;  %v1877_v32 = vld [vmem:[%s2386_s1 + $0x260] sm:$0xff]  }
  0x1c   :  { %1634 = vmatpush3.bf16.msra.mxu0 %v1823_v26  ;;  %v1868_v23 = vld [vmem:[%s2386_s1 + $0x288] sm:$0xff]   ;;  %v1870_v25 = vld [vmem:[%s2386_s1 + $0x2d0] sm:$0xff]   ;;  %v1878_v33 = vld [vmem:[%s2386_s1 + $0x2e0] sm:$0xff]  }
  0x1d   :  { %1656 = vmatpush3.bf16.msra.mxu1 %v1824_v27  ;;  %1635 = vmatprep.subr.bf16.mxu0 %v1825_v28  ;;  %v1871_v26 = vld [vmem:[%s2386_s1 + $0x210] sm:$0xff]   ;;  %v1873_v28 = vld [vmem:[%s2386_s1 + $0x258] sm:$0xff]   ;;  %v1879_v34 = vld [vmem:[%s2386_s1 + $0x220] sm:$0xff]  }
  0x1e   :  { %1657 = vmatprep.subr.bf16.mxu1 %v1826_v29  ;;  %v1872_v27 = vld [vmem:[%s2386_s1 + $0x290] sm:$0xff]   ;;  %v1874_v29 = vld [vmem:[%s2386_s1 + $0x2d8] sm:$0xff]   ;;  %v1881_v36 = vld [vmem:[%s2386_s1 + $0x268] sm:$0xff]  }
  0x1f   :  { %v1882_v37 = vld [vmem:[%s2386_s1 + $0x2e8] sm:$0xff]   ;;  %v1909_v8 = vld [vmem:[%s2386_s1 + $0x360] sm:$0xff]  }
  0x20   :  { %1636 = vmatpush3.bf16.msra.mxu0 %v1827_v30  ;;  %v1875_v30 = vld [vmem:[%s2386_s1 + $0x218] sm:$0xff]   ;;  %v1884_v39 = vld [vmem:[%s2386_s1 + $0x2a8] sm:$0xff]   ;;  %v1910_v9 = vld [vmem:[%s2386_s1 + $0x3e0] sm:$0xff]  }
  0x21   :  { %1658 = vmatpush3.bf16.msra.mxu1 %v1828_v31  ;;  %1665 = vmatprep.subr.bf16.mxu0 %v1829_v40  ;;  %v1876_v31 = vld [vmem:[%s2386_s1 + $0x298] sm:$0xff]   ;;  %v1885_v40 = vld [vmem:[%s2386_s1 + $0x270] sm:$0xff]   ;;  %v1913_v12 = vld [vmem:[%s2386_s1 + $0x368] sm:$0xff]  }
  0x22   :  { %1687 = vmatprep.subr.bf16.mxu1 %v1830_v41  ;;  %v1886_v41 = vld [vmem:[%s2386_s1 + $0x2f0] sm:$0xff]   ;;  %v1914_v13 = vld [vmem:[%s2386_s1 + $0x3e8] sm:$0xff]  }
  0x23   :  { %1175 = vmatmul.mubr.bf16.vlgmr.msra.gmra.mrb[0].mxu0 %v1477_v35  ;;  %v1880_v35 = vld [vmem:[%s2386_s1 + $0x2a0] sm:$0xff]  }
  0x24   :  { %1216 = vmatmul.mubr.bf16.vlgmr.msra.gmra.mrb[0].mxu1 %v1479_v38  ;;  %1666 = vmatpush3.bf16.msra.mxu0 %v1831_v42  ;;  %v1883_v38 = vld [vmem:[%s2386_s1 + $0x228] sm:$0xff]   ;;  %v1887_v42 = vld [vmem:[%s2386_s1 + $0x230] sm:$0xff]  }
  0x25   :  { %1688 = vmatpush3.bf16.msra.mxu1 %v1832_v43  ;;  %1667 = vmatprep.subr.bf16.mxu0 %v1833_v44  ;;  %v1888_v43 = vld [vmem:[%s2386_s1 + $0x2b0] sm:$0xff]   ;;  %v1889_v44 = vld [vmem:[%s2386_s1 + $0x278] sm:$0xff]  }
  0x26   :  { %1689 = vmatprep.subr.bf16.mxu1 %v1834_v45  ;;  %1256 = vmatprep.mubr.bf16.mxu0 %v1482_v11  ;;  %v1890_v45 = vld [vmem:[%s2386_s1 + $0x2f8] sm:$0xff]   ;;  %v1912_v11 = vld [vmem:[%s2386_s1 + $0x3a0] sm:$0xff]  }
  0x27   :  { %1297 = vmatprep.mubr.bf16.mxu1 %v1484_v15  ;;  %v1916_v15 = vld [vmem:[%s2386_s1 + $0x3a8] sm:$0xff]  }
  0x28   :  { %1668 = vmatpush3.bf16.msra.mxu0 %v1835_v46  ;;  %v1891_v46 = vld [vmem:[%s2386_s1 + $0x238] sm:$0xff]  }
  0x29   :  { %1690 = vmatpush3.bf16.msra.mxu1 %v1836_v47  ;;  %1669 = vmatprep.subr.bf16.mxu0 %v1837_v48  ;;  %v1892_v47 = vld [vmem:[%s2386_s1 + $0x2b8] sm:$0xff]   ;;  %v19_v48 = vld [vmem:[%s2387_s0 + $0x20] sm:$0xff] }
  0x2a   :  { %1691 = vmatprep.subr.bf16.mxu1 %v1838_v49  ;;  %v27_v49 = vld [vmem:[%s2387_s0 + $0x60] sm:$0xff] }
  0x2c   :  { %1670 = vmatpush3.bf16.msra.mxu0 %v1839_v50  ;;  %v20_v50 = vld [vmem:[%s2387_s0 + $0x28] sm:$0xff] }
  0x2d   :  { %1692 = vmatpush3.bf16.msra.mxu1 %v1840_v51  ;;  %1671 = vmatprep.subr.bf16.mxu0 %v1841_v52  ;;  %v28_v51 = vld [vmem:[%s2387_s0 + $0x68] sm:$0xff]  ;;  %v1485_v52 = vcombine.low %v19_v48, %v27_v49 }
  0x2e   :  { %1693 = vmatprep.subr.bf16.mxu1 %v1842_v53  ;;  %v1486_v53 = vcombine.high %v19_v48, %v27_v49 }
  0x30   :  { %1672 = vmatpush3.bf16.msra.mxu0 %v1843_v54  ;;  %v1487_v54 = vcombine.low %v20_v50, %v28_v51 }
  0x31   :  { %1694 = vmatpush3.bf16.msra.mxu1 %v1844_v55  ;;  %1673 = vmatprep.subr.bf16.mxu0 %v1845_v56  ;;  %v1488_v55 = vcombine.high %v20_v50, %v28_v51  ;;  %v1893_v56 = vld [vmem:[%s2386_s1 + $0x340] sm:$0xff]  }
  0x32   :  { %1695 = vmatprep.subr.bf16.mxu1 %v1846_v57  ;;  %v1894_v57 = vld [vmem:[%s2386_s1 + $0x3c0] sm:$0xff]  }
  0x34   :  { %1674 = vmatpush3.bf16.msra.mxu0 %v1847_v58  ;;  %v1895_v58 = vld [vmem:[%s2386_s1 + $0x300] sm:$0xff]  }
  0x35   :  { %1696 = vmatpush3.bf16.msra.mxu1 %v1848_v59  ;;  %1675 = vmatprep.subr.bf16.mxu0 %v1849_v60  ;;  %v1896_v59 = vld [vmem:[%s2386_s1 + $0x380] sm:$0xff]   ;;  %v1897_v60 = vld [vmem:[%s2386_s1 + $0x348] sm:$0xff]  }
  0x36   :  { %1697 = vmatprep.subr.bf16.mxu1 %v1850_v61  ;;  %v1898_v61 = vld [vmem:[%s2386_s1 + $0x3c8] sm:$0xff]  }
  0x38   :  { %1676 = vmatpush3.bf16.msra.mxu0 %v1851_v62  ;;  %v1899_v62 = vld [vmem:[%s2386_s1 + $0x308] sm:$0xff]  }
  0x39   :  { %1698 = vmatpush3.bf16.msra.mxu1 %v1852_v63  ;;  %1677 = vmatprep.subr.bf16.mxu0 %v1853_v0  ;;  %v1900_v63 = vld [vmem:[%s2386_s1 + $0x388] sm:$0xff]   ;;  %v1901_v0 = vld [vmem:[%s2386_s1 + $0x350] sm:$0xff]  }
  0x3a   :  { %1699 = vmatprep.subr.bf16.mxu1 %v1854_v1  ;;  %v1902_v1 = vld [vmem:[%s2386_s1 + $0x3d0] sm:$0xff]  }
  0x3c   :  { %1678 = vmatpush3.bf16.msra.mxu0 %v1855_v2  ;;  %v1903_v2 = vld [vmem:[%s2386_s1 + $0x310] sm:$0xff]  }
  0x3d   :  { %1700 = vmatpush3.bf16.msra.mxu1 %v1856_v3  ;;  %1679 = vmatprep.subr.bf16.mxu0 %v1857_v4  ;;  %v1904_v3 = vld [vmem:[%s2386_s1 + $0x390] sm:$0xff]   ;;  %v1905_v4 = vld [vmem:[%s2386_s1 + $0x358] sm:$0xff]  }
  0x3e   :  { %1701 = vmatprep.subr.bf16.mxu1 %v1858_v5  ;;  %v1906_v5 = vld [vmem:[%s2386_s1 + $0x3d8] sm:$0xff]  }
  0x40   :  { %1680 = vmatpush3.bf16.msra.mxu0 %v1859_v6  ;;  %v1907_v6 = vld [vmem:[%s2386_s1 + $0x318] sm:$0xff]  }
  0x41   :  { %1702 = vmatpush3.bf16.msra.mxu1 %v1860_v7  ;;  %1709 = vmatprep.subr.bf16.mxu0 %v1861_v16  ;;  %v1908_v7 = vld [vmem:[%s2386_s1 + $0x398] sm:$0xff]   ;;  %v1917_v16 = vld [vmem:[%s2386_s1 + $0x370] sm:$0xff]  }
  0x42   :  { %1731 = vmatprep.subr.bf16.mxu1 %v1862_v17  ;;  %v1918_v17 = vld [vmem:[%s2386_s1 + $0x3f0] sm:$0xff]  }
  0x43   :  { %1257 = vmatmul.mubr.bf16.vlgmr.msra.gmra.mrb[4].mxu0 %v1481_v10  ;;  %v1911_v10 = vld [vmem:[%s2386_s1 + $0x320] sm:$0xff]  }
  0x44   :  { %1298 = vmatmul.mubr.bf16.vlgmr.msra.gmra.mrb[4].mxu1 %v1483_v14  ;;  %1710 = vmatpush3.bf16.msra.mxu0 %v1863_v18  ;;  %v1915_v14 = vld [vmem:[%s2386_s1 + $0x328] sm:$0xff]   ;;  %v1919_v18 = vld [vmem:[%s2386_s1 + $0x330] sm:$0xff]  }
  0x45   :  { %1732 = vmatpush3.bf16.msra.mxu1 %v1864_v19  ;;  %1711 = vmatprep.subr.bf16.mxu0 %v1865_v20  ;;  %v1920_v19 = vld [vmem:[%s2386_s1 + $0x3b0] sm:$0xff]   ;;  %v1921_v20 = vld [vmem:[%s2386_s1 + $0x378] sm:$0xff]  }
  0x46   :  { %1733 = vmatprep.subr.bf16.mxu1 %v1866_v21  ;;  %1338 = vmatprep.mubr.bf16.mxu0 %v1486_v53  ;;  %v1922_v21 = vld [vmem:[%s2386_s1 + $0x3f8] sm:$0xff]  }
  0x47   :  { %1379 = vmatprep.mubr.bf16.mxu1 %v1488_v55 }
  0x48   :  { %1712 = vmatpush3.bf16.msra.mxu0 %v1867_v22  ;;  %v1923_v22 = vld [vmem:[%s2386_s1 + $0x338] sm:$0xff]  }
  0x49   :  { %1734 = vmatpush3.bf16.msra.mxu1 %v1868_v23  ;;  %1713 = vmatprep.subr.bf16.mxu0 %v1869_v24  ;;  %v1924_v23 = vld [vmem:[%s2386_s1 + $0x3b8] sm:$0xff]   ;;  %v21_v24 = vld [vmem:[%s2387_s0 + $0x30] sm:$0xff] }
  0x4a   :  { %1735 = vmatprep.subr.bf16.mxu1 %v1870_v25  ;;  %v29_v25 = vld [vmem:[%s2387_s0 + $0x70] sm:$0xff] }
  0x4c   :  { %1714 = vmatpush3.bf16.msra.mxu0 %v1871_v26  ;;  %v22_v26 = vld [vmem:[%s2387_s0 + $0x38] sm:$0xff] }
  0x4d   :  { %1736 = vmatpush3.bf16.msra.mxu1 %v1872_v27  ;;  %1715 = vmatprep.subr.bf16.mxu0 %v1873_v28  ;;  %v1489_v27 = vcombine.low %v21_v24, %v29_v25  ;;  %v1490_v28 = vcombine.high %v21_v24, %v29_v25 }
  0x4e   :  { %1737 = vmatprep.subr.bf16.mxu1 %v1874_v29  ;;  %v30_v29 = vld [vmem:[%s2387_s0 + $0x78] sm:$0xff] }
  0x50   :  { %1716 = vmatpush3.bf16.msra.mxu0 %v1875_v30  ;;  %v1491_v30 = vcombine.low %v22_v26, %v30_v29 }
  0x51   :  { %1738 = vmatpush3.bf16.msra.mxu1 %v1876_v31  ;;  %1717 = vmatprep.subr.bf16.mxu0 %v1877_v32  ;;  %v1492_v31 = vcombine.high %v22_v26, %v30_v29 }
  0x52   :  { %1739 = vmatprep.subr.bf16.mxu1 %v1878_v33 }
  0x54   :  { %1718 = vmatpush3.bf16.msra.mxu0 %v1879_v34  ;;  %v1476_v34 = vld [vmem:[%s2388_s2] ss:$0 sm:$0xff] }
  0x55   :  { %1740 = vmatpush3.bf16.msra.mxu1 %v1880_v35  ;;  %1719 = vmatprep.subr.bf16.mxu0 %v1881_v36 }
  0x56   :  { %1741 = vmatprep.subr.bf16.mxu1 %v1882_v37 }
  0x58   :  { %1720 = vmatpush3.bf16.msra.mxu0 %v1883_v38 }
  0x59   :  { %1742 = vmatpush3.bf16.msra.mxu1 %v1884_v39  ;;  %1721 = vmatprep.subr.bf16.mxu0 %v1885_v40 }
  0x5a   :  { %1743 = vmatprep.subr.bf16.mxu1 %v1886_v41 }
  0x5c   :  { %1722 = vmatpush3.bf16.msra.mxu0 %v1887_v42 }
  0x5d   :  { %1744 = vmatpush3.bf16.msra.mxu1 %v1888_v43  ;;  %1723 = vmatprep.subr.bf16.mxu0 %v1889_v44 }
  0x5e   :  { %1745 = vmatprep.subr.bf16.mxu1 %v1890_v45 }
  0x60   :  { %1724 = vmatpush3.bf16.msra.mxu0 %v1891_v46 }
  0x61   :  { %1746 = vmatpush3.bf16.msra.mxu1 %v1892_v47  ;;  %1753 = vmatprep.subr.bf16.mxu0 %v1893_v56 }
  0x62   :  { %1775 = vmatprep.subr.bf16.mxu1 %v1894_v57 }
  0x63   :  { %1339 = vmatmul.mubr.bf16.vlgmr.msra.gmra.mrb[8].mxu0 %v1485_v52 }
  0x64   :  { %1380 = vmatmul.mubr.bf16.vlgmr.msra.gmra.mrb[8].mxu1 %v1487_v54  ;;  %1754 = vmatpush3.bf16.msra.mxu0 %v1895_v58 }
  0x65   :  { %1776 = vmatpush3.bf16.msra.mxu1 %v1896_v59  ;;  %1755 = vmatprep.subr.bf16.mxu0 %v1897_v60 }
  0x66   :  { %1777 = vmatprep.subr.bf16.mxu1 %v1898_v61  ;;  %1420 = vmatprep.mubr.bf16.mxu0 %v1490_v28 }
  0x67   :  { %1461 = vmatprep.mubr.bf16.mxu1 %v1492_v31 }
  0x68   :  { %1756 = vmatpush3.bf16.msra.mxu0 %v1899_v62 }
  0x69   :  { %1778 = vmatpush3.bf16.msra.mxu1 %v1900_v63  ;;  %1757 = vmatprep.subr.bf16.mxu0 %v1901_v0 }
  0x6a   :  { %1779 = vmatprep.subr.bf16.mxu1 %v1902_v1 }
  0x6c   :  { %1758 = vmatpush3.bf16.msra.mxu0 %v1903_v2 }
  0x6d   :  { %1780 = vmatpush3.bf16.msra.mxu1 %v1904_v3  ;;  %1759 = vmatprep.subr.bf16.mxu0 %v1905_v4 }
  0x6e   :  { %1781 = vmatprep.subr.bf16.mxu1 %v1906_v5 }
  0x70   :  { %1760 = vmatpush3.bf16.msra.mxu0 %v1907_v6 }
  0x71   :  { %1782 = vmatpush3.bf16.msra.mxu1 %v1908_v7  ;;  %1761 = vmatprep.subr.bf16.mxu0 %v1909_v8 }
  0x72   :  { %1783 = vmatprep.subr.bf16.mxu1 %v1910_v9 }
  0x74   :  { %1762 = vmatpush3.bf16.msra.mxu0 %v1911_v10 }
  0x75   :  { %1784 = vmatpush3.bf16.msra.mxu1 %v1912_v11  ;;  %1763 = vmatprep.subr.bf16.mxu0 %v1913_v12 }
  0x76   :  { %1785 = vmatprep.subr.bf16.mxu1 %v1914_v13 }
  0x78   :  { %1764 = vmatpush3.bf16.msra.mxu0 %v1915_v14 }
  0x79   :  { %1786 = vmatpush3.bf16.msra.mxu1 %v1916_v15  ;;  %1765 = vmatprep.subr.bf16.mxu0 %v1917_v16 }
  0x7a   :  { %1787 = vmatprep.subr.bf16.mxu1 %v1918_v17 }
  0x7c   :  { %1766 = vmatpush3.bf16.msra.mxu0 %v1919_v18 }
  0x7d   :  { %1788 = vmatpush3.bf16.msra.mxu1 %v1920_v19  ;;  %1767 = vmatprep.subr.bf16.mxu0 %v1921_v20 }
  0x7e   :  { %1789 = vmatprep.subr.bf16.mxu1 %v1922_v21 }
  0x80   :  { %1768 = vmatpush3.bf16.msra.mxu0 %v1923_v22 }
  0x81   :  { %1790 = vmatpush3.bf16.msra.mxu1 %v1924_v23 }
  0x83   :  { %1421 = vmatmul.mubr.bf16.vlgmr.msra.gmra.mrb[12].mxu0 %v1489_v27 }
  0x84   :  { %1462 = vmatmul.mubr.bf16.vlgmr.msra.gmra.mrb[12].mxu1 %v1491_v30 }
  0xf6   :  { %v1637_v32 = vpop.f32.mrb[0].mxu0 }
  0xf7   :  { %v1659_v33 = vpop.f32.mrb[0].mxu1  ;;  %v1638_v35 = vpop.f32.mrb[1].mxu0 }
  0xf8   :  { %v1639_v36 = vadd.f32 %v1638_v35, %v1637_v32  ;;  %v1660_v37 = vpop.f32.mrb[1].mxu1  ;;  %v1640_v38 = vpop.f32.mrb[2].mxu0 }
  0xf9   :  { %v1661_v39 = vadd.f32 %v1660_v37, %v1659_v33  ;;  %v1662_v40 = vpop.f32.mrb[2].mxu1  ;;  %v1641_v41 = vpop.f32.mrb[3].mxu0 }
  0xfa   :  { %v1177_v42 = vadd.f32 %v1639_v36, %v1476_v34  ;;  %v1642_v43 = vadd.f32 %v1641_v41, %v1640_v38  ;;  %v1663_v44 = vpop.f32.mrb[3].mxu1 }
  0xfb   :  { %v1664_v45 = vadd.f32 %v1663_v44, %v1662_v40 }
  0xfc   :  { %v1218_v46 = vadd.f32 %v1661_v39, %v1177_v42  ;;  %v1180_v47 = vadd.f32 %v1642_v43, %v1476_v34 }
  0xfe   :  { %v1221_v48 = vadd.f32 %v1664_v45, %v1180_v47 }
 0x116   :  { %v1681_v49 = vpop.f32.mrb[4].mxu0 }
 0x117   :  { %v1703_v50 = vpop.f32.mrb[4].mxu1  ;;  %v1682_v51 = vpop.f32.mrb[5].mxu0 }
 0x118   :  { %v1683_v52 = vadd.f32 %v1682_v51, %v1681_v49  ;;  %v1704_v53 = vpop.f32.mrb[5].mxu1  ;;  %v1684_v54 = vpop.f32.mrb[6].mxu0 }
 0x119   :  { %v1705_v55 = vadd.f32 %v1704_v53, %v1703_v50  ;;  %v1706_v56 = vpop.f32.mrb[6].mxu1  ;;  %v1685_v57 = vpop.f32.mrb[7].mxu0 }
 0x11a   :  { %v1259_v58 = vadd.f32 %v1683_v52, %v1218_v46  ;;  %v1686_v59 = vadd.f32 %v1685_v57, %v1684_v54  ;;  %v1707_v60 = vpop.f32.mrb[7].mxu1 }
 0x11b   :  { %v1708_v61 = vadd.f32 %v1707_v60, %v1706_v56 }
 0x11c   :  { %v1300_v62 = vadd.f32 %v1705_v55, %v1259_v58  ;;  %v1262_v63 = vadd.f32 %v1686_v59, %v1221_v48 }
 0x11e   :  { %v1303_v0 = vadd.f32 %v1708_v61, %v1262_v63 }
 0x136   :  { %v1725_v1 = vpop.f32.mrb[8].mxu0 }
 0x137   :  { %v1747_v2 = vpop.f32.mrb[8].mxu1  ;;  %v1726_v3 = vpop.f32.mrb[9].mxu0 }
 0x138   :  { %v1748_v4 = vpop.f32.mrb[9].mxu1  ;;  %v1727_v5 = vadd.f32 %v1726_v3, %v1725_v1  ;;  %v1728_v7 = vpop.f32.mrb[10].mxu0 }
 0x139   :  { %v1749_v6 = vadd.f32 %v1748_v4, %v1747_v2  ;;  %v1750_v8 = vpop.f32.mrb[10].mxu1  ;;  %v1729_v9 = vpop.f32.mrb[11].mxu0 }
 0x13a   :  { %v1751_v10 = vpop.f32.mrb[11].mxu1  ;;  %v1341_v11 = vadd.f32 %v1727_v5, %v1300_v62  ;;  %v1730_v12 = vadd.f32 %v1729_v9, %v1728_v7 }
 0x13b   :  { %v1752_v13 = vadd.f32 %v1751_v10, %v1750_v8 }
 0x13c   :  { %v1382_v14 = vadd.f32 %v1749_v6, %v1341_v11  ;;  %v1344_v15 = vadd.f32 %v1730_v12, %v1303_v0 }
 0x13e   :  { %v1385_v16 = vadd.f32 %v1752_v13, %v1344_v15 }
 0x156   :  { %v1769_v17 = vpop.f32.mrb[12].mxu0 }
 0x157   :  { %v1791_v18 = vpop.f32.mrb[12].mxu1  ;;  %v1770_v19 = vpop.f32.mrb[13].mxu0 }
 0x158   :  { %v1771_v20 = vadd.f32 %v1770_v19, %v1769_v17  ;;  %v1792_v21 = vpop.f32.mrb[13].mxu1  ;;  %v1772_v22 = vpop.f32.mrb[14].mxu0 }
 0x159   :  { %v1793_v23 = vadd.f32 %v1792_v21, %v1791_v18  ;;  %v1794_v24 = vpop.f32.mrb[14].mxu1  ;;  %v1773_v25 = vpop.f32.mrb[15].mxu0 }
 0x15a   :  { %v1423_v26 = vadd.f32 %v1771_v20, %v1382_v14  ;;  %v1774_v27 = vadd.f32 %v1773_v25, %v1772_v22  ;;  %v1795_v28 = vpop.f32.mrb[15].mxu1 }
 0x15b   :  { %v1796_v29 = vadd.f32 %v1795_v28, %v1794_v24 }
 0x15c   :  { %v1464_v30 = vadd.f32 %v1793_v23, %v1423_v26  ;;  %v1426_v31 = vadd.f32 %v1774_v27, %v1385_v16 }
 0x15e   :  { %1470 = vst [vmem:[%s2389_s3] sm:$0xff] %v1464_v30  ;;  %v1467_v32 = vadd.f32 %v1796_v29, %v1426_v31 }
 0x160   :  { %1471 = vst [vmem:[%s2389_s3 + $0x8] sm:$0xff] %v1467_v32 }

</bundles_post_ra>
